<compile_context>
chip_gen: v5e
topology: v5e:2x2
jax: 0.10.0
libtpu: 0.0.40
codegen_flags: <defaults>
</compile_context>

<pallas_src>
import jax
import jax.numpy as jnp
from jax.experimental import pallas as pl
from jax.experimental.pallas import tpu as pltpu

IN_DIM = 784
DIM3 = 300
DIM3_PAD = 384        # 3 * 128 (zero-padded once at param-prep time)
LAYER_DIMS = [(IN_DIM, 1024), (1024, 512), (512, DIM3), (DIM3, 128), (128, 64), (64, 1)]
PADDED_DIMS = [(IN_DIM, 1024), (1024, 512), (512, DIM3_PAD), (DIM3_PAD, 128), (128, 64), (64, 1)]

MAX_TILE_B = 512      # cap keeps the per-step VMEM footprint v7x-safe (<< 32 MiB scoped)


def _round_up(x, m):
    return ((x + m - 1) // m) * m


def _cdiv(a, b):
    return -(-a // b)


def _choose_tiling(batch):
    """Return (tile_b, padded_batch).  tile_b multiple of 16; >=2 grid steps
    once the padded batch exceeds 128 rows (v7x has 2 TensorCores)."""
    b16 = _round_up(batch, 16)
    if b16 <= 128:
        return b16, b16                                   # single grid step
    tile = min(MAX_TILE_B, _round_up(_cdiv(b16, 2), 128))  # >=2 steps, 128-aligned
    b_pad = _round_up(b16, tile)
    return tile, b_pad


# -----------------------------------------------------------------------------
# Kernel: fused 6-layer MLP forward (one batch tile per grid step)
# -----------------------------------------------------------------------------
def _discriminator_kernel(
    x_ref,
    w1_ref, b1_ref,
    w2_ref, b2_ref,
    w3_ref, b3_ref,
    w4_ref, b4_ref,
    w5_ref, b5_ref,
    w6_ref, b6_ref,
    out_ref,
):
    def lrelu(h):
        # LeakyReLU(0.2) == max(h, 0.2*h) for slope in (0, 1): mul+max (2 VALU ops)
        return jnp.maximum(h, 0.2 * h)

    # In-kernel cast of the raw f32 input tile to bf16 for the MXU.
    x = x_ref[...].astype(jnp.bfloat16)

    # Layer 1: (TILE_B, 784) @ (784, 1024); Mosaic pads the contraction dim internally.
    h = jnp.dot(x, w1_ref[...], preferred_element_type=jnp.float32) + b1_ref[...]
    h = lrelu(h).astype(jnp.bfloat16)
    # Layer 2: -> 512
    h = jnp.dot(h, w2_ref[...], preferred_element_type=jnp.float32) + b2_ref[...]
    h = lrelu(h).astype(jnp.bfloat16)
    # Layer 3: -> 384 (300 padded; pad columns are exactly zero)
    h = jnp.dot(h, w3_ref[...], preferred_element_type=jnp.float32) + b3_ref[...]
    h = lrelu(h).astype(jnp.bfloat16)
    # Layer 4: -> 128
    h = jnp.dot(h, w4_ref[...], preferred_element_type=jnp.float32) + b4_ref[...]
    h = lrelu(h).astype(jnp.bfloat16)
    # Layer 5: -> 64 (no dropout in the torch module either)
    h = jnp.dot(h, w5_ref[...], preferred_element_type=jnp.float32) + b5_ref[...]
    h = lrelu(h)  # keep f32 for the head reduction

    # Head: Linear(64 -> 1) as a VPU/XLU reduction + Sigmoid, stored lane-dense.
    w6_row = w6_ref[...].astype(jnp.float32)                         # (1, 64)
    logits = jnp.sum(h * w6_row, axis=-1, keepdims=True) + b6_ref[...]  # (TILE_B, 1)
    probs = jax.nn.sigmoid(logits)
    out_ref[...] = probs.reshape(1, -1).astype(out_ref.dtype)        # (1, TILE_B)


# -----------------------------------------------------------------------------
# Parameter prep: pad 300->384 once, cast weights to bf16, biases f32 (1, out)
# -----------------------------------------------------------------------------
def prepare_params(params):
    """params: list of 6 (w: (in, out) f32, b: (out,) f32) tuples (torch layout, transposed)."""
    (w1, b1), (w2, b2), (w3, b3), (w4, b4), (w5, b5), (w6, b6) = params

    # Pad layer-3 output dim 300 -> 384 (zero cols of W3, zero bias pad, zero rows
    # of W4) — numerically identical since lrelu(0) = 0.
    w3p = jnp.pad(w3, ((0, 0), (0, DIM3_PAD - DIM3)))
    b3p = jnp.pad(b3, ((0, DIM3_PAD - DIM3),))
    w4p = jnp.pad(w4, ((0, DIM3_PAD - DIM3), (0, 0)))

    return [
        (w1.astype(jnp.bfloat16), b1.reshape(1, -1).astype(jnp.float32)),
        (w2.astype(jnp.bfloat16), b2.reshape(1, -1).astype(jnp.float32)),
        (w3p.astype(jnp.bfloat16), b3p.reshape(1, -1).astype(jnp.float32)),
        (w4p.astype(jnp.bfloat16), b4.reshape(1, -1).astype(jnp.float32)),
        (w5.astype(jnp.bfloat16), b5.reshape(1, -1).astype(jnp.float32)),
        # Head weight stored as a (1, 64) row for the VPU reduction.
        (w6.reshape(1, -1).astype(jnp.bfloat16), b6.reshape(1, 1).astype(jnp.float32)),
    ]


# -----------------------------------------------------------------------------
# Wrapper
# -----------------------------------------------------------------------------
def discriminator_forward(x, prepared_params):
    """x: (B, ...) with prod(...) == 784 (torch .view(B, 784) semantics). Returns (B, 1) f32."""
    B = x.shape[0]
    x2d = x.reshape(B, IN_DIM)          # no dtype cast, no feature pad (done in-kernel)

    tile_b, b_pad = _choose_tiling(B)
    if b_pad != B:                      # batch-row pad only (feature dim untouched)
        x2d = jnp.pad(x2d, ((0, b_pad - B), (0, 0)))
    n_tiles = b_pad // tile_b

    flat_args = [x2d]
    in_specs = [pl.BlockSpec((tile_b, IN_DIM), lambda i: (i, 0))]
    const_map = lambda i: (0, 0)        # weights/biases: fetched once, VMEM-resident
    for (w, b) in prepared_params:
        flat_args.append(w)
        flat_args.append(b)
        in_specs.append(pl.BlockSpec(w.shape, const_map, pipeline_mode=pl.Buffered(1)))
        in_specs.append(pl.BlockSpec(b.shape, const_map, pipeline_mode=pl.Buffered(1)))

    # Lane-dense output: (n_tiles, tile_b), one (1, tile_b) row per grid step.
    out_spec = pl.BlockSpec((1, tile_b), lambda i: (i, 0))

    weight_bytes = sum(int(w.size) * w.dtype.itemsize + int(b.size) * b.dtype.itemsize
                       for (w, b) in prepared_params)
    flops = 2 * b_pad * sum(i * o for (i, o) in PADDED_DIMS)
    bytes_accessed = (weight_bytes
                      + b_pad * IN_DIM * x2d.dtype.itemsize
                      + n_tiles * tile_b * 4)

    out = pl.pallas_call(
        _discriminator_kernel,
        out_shape=jax.ShapeDtypeStruct((n_tiles, tile_b), jnp.float32),
        grid=(n_tiles,),
        in_specs=in_specs,
        out_specs=out_spec,
        compiler_params=pltpu.CompilerParams(
            dimension_semantics=("parallel",),   # megacore / v7x 2-TC sharding
            vmem_limit_bytes=32 << 20,           # safe on v7x's 64 MiB physical VMEM
        ),
        cost_estimate=pl.CostEstimate(
            flops=flops,
            transcendentals=b_pad,
            bytes_accessed=bytes_accessed,
        ),
    )(*flat_args)

    # (n_tiles, tile_b) -> flat batch -> drop pad rows -> (B, 1)
    return out.reshape(b_pad)[:B].reshape(B, 1)


# -----------------------------------------------------------------------------
# Deterministic parameter init (PyTorch nn.Linear default: U(-1/sqrt(in), 1/sqrt(in)))
# -----------------------------------------------------------------------------
def init_params(key):
    params = []
    for (in_dim, out_dim) in LAYER_DIMS:
        key, kw, kb = jax.random.split(key, 3)
        bound = 1.0 / jnp.sqrt(in_dim)
        w = jax.random.uniform(kw, (in_dim, out_dim), jnp.float32, -bound, bound)
        b = jax.random.uniform(kb, (out_dim,), jnp.float32, -bound, bound)
        params.append((w, b))
    return params


def _reference_forward(x, params):
    """Pure-JAX f32 reference (eval-mode dropout = identity)."""
    h = x.reshape(x.shape[0], IN_DIM).astype(jnp.float32)
    for idx, (w, b) in enumerate(params):
        h = h @ w + b
        if idx < 5:
            h = jnp.where(h > 0, h, 0.2 * h)
    return jax.nn.sigmoid(h)


if __name__ == "__main__":
    key = jax.random.PRNGKey(0)
    key, kx = jax.random.split(key)

    raw_params = init_params(key)
    prepared = prepare_params(raw_params)     # pad + cast once

    # Small batch, MNIST-like input: (B, 1, 28, 28) -> view(B, 784)
    B = 2
    x = jax.random.normal(kx, (B, 1, 28, 28), jnp.float32)

    out = discriminator_forward(x, prepared)
    out = jax.block_until_ready(out)

    assert out.shape == (B, 1)
    assert bool(jnp.all((out >= 0.0) & (out <= 1.0)))

    # bf16 weights/activations -> expect ~1e-2-level deviation from the f32 reference.
    ref = _reference_forward(x, raw_params)
    assert bool(jnp.all(jnp.abs(out - ref) < 5e-2))

    print("KERNEL_OK")
</pallas_src>

<mosaic_0001>
module attributes {stable_mosaic.version = 11 : i64} {
  func.func @_discriminator_kernel(%arg0: i32, %arg1: memref<16x784xf32, #tpu.memory_space<vmem>>, %arg2: memref<784x1024xbf16, #tpu.memory_space<vmem>>, %arg3: memref<1x1024xf32, #tpu.memory_space<vmem>>, %arg4: memref<1024x512xbf16, #tpu.memory_space<vmem>>, %arg5: memref<1x512xf32, #tpu.memory_space<vmem>>, %arg6: memref<512x384xbf16, #tpu.memory_space<vmem>>, %arg7: memref<1x384xf32, #tpu.memory_space<vmem>>, %arg8: memref<384x128xbf16, #tpu.memory_space<vmem>>, %arg9: memref<1x128xf32, #tpu.memory_space<vmem>>, %arg10: memref<128x64xbf16, #tpu.memory_space<vmem>>, %arg11: memref<1x64xf32, #tpu.memory_space<vmem>>, %arg12: memref<1x64xbf16, #tpu.memory_space<vmem>>, %arg13: memref<1x1xf32, #tpu.memory_space<vmem>>, %arg14: memref<1x16xf32, #tpu.memory_space<vmem>>) attributes {dimension_semantics = [#tpu.dimension_semantics<parallel>], iteration_bounds = array<i64: 1>, scalar_prefetch = 0 : i64, scratch_operands = 0 : i64, tpu.core_type = #tpu.core_type<tc>, window_params = [{transform_indices = @transform_0, window_bounds = array<i64: 16, 784>}, {pipeline_mode = #tpu.pipeline_mode<synchronous>, transform_indices = @transform_1, window_bounds = array<i64: 784, 1024>}, {pipeline_mode = #tpu.pipeline_mode<synchronous>, transform_indices = @transform_2, window_bounds = array<i64: 1, 1024>}, {pipeline_mode = #tpu.pipeline_mode<synchronous>, transform_indices = @transform_3, window_bounds = array<i64: 1024, 512>}, {pipeline_mode = #tpu.pipeline_mode<synchronous>, transform_indices = @transform_4, window_bounds = array<i64: 1, 512>}, {pipeline_mode = #tpu.pipeline_mode<synchronous>, transform_indices = @transform_5, window_bounds = array<i64: 512, 384>}, {pipeline_mode = #tpu.pipeline_mode<synchronous>, transform_indices = @transform_6, window_bounds = array<i64: 1, 384>}, {pipeline_mode = #tpu.pipeline_mode<synchronous>, transform_indices = @transform_7, window_bounds = array<i64: 384, 128>}, {pipeline_mode = #tpu.pipeline_mode<synchronous>, transform_indices = @transform_8, window_bounds = array<i64: 1, 128>}, {pipeline_mode = #tpu.pipeline_mode<synchronous>, transform_indices = @transform_9, window_bounds = array<i64: 128, 64>}, {pipeline_mode = #tpu.pipeline_mode<synchronous>, transform_indices = @transform_10, window_bounds = array<i64: 1, 64>}, {pipeline_mode = #tpu.pipeline_mode<synchronous>, transform_indices = @transform_11, window_bounds = array<i64: 1, 64>}, {pipeline_mode = #tpu.pipeline_mode<synchronous>, transform_indices = @transform_12, window_bounds = array<i64: 1, 1>}, {transform_indices = @transform_13, window_bounds = array<i64: 1, 16>}]} {
    %c0 = arith.constant 0 : index
    %c0_0 = arith.constant 0 : index
    %0 = vector.load %arg1[%c0, %c0_0] : memref<16x784xf32, #tpu.memory_space<vmem>>, vector<16x784xf32>
    %1 = arith.truncf %0 : vector<16x784xf32> to vector<16x784xbf16>
    %c0_1 = arith.constant 0 : index
    %c0_2 = arith.constant 0 : index
    %2 = vector.load %arg2[%c0_1, %c0_2] : memref<784x1024xbf16, #tpu.memory_space<vmem>>, vector<784x1024xbf16>
    %cst = arith.constant dense<0.000000e+00> : vector<16x1024xf32>
    %3 = tpu.matmul %1, %2, %cst {dimension_numbers = #tpu.dot_dimension_numbers<[1], [0], [0], [1], [0, 0, 1, 1], [], []>} : vector<16x784xbf16>, vector<784x1024xbf16>, vector<16x1024xf32> -> vector<16x1024xf32>
    %c0_3 = arith.constant 0 : index
    %c0_4 = arith.constant 0 : index
    %4 = vector.load %arg3[%c0_3, %c0_4] : memref<1x1024xf32, #tpu.memory_space<vmem>>, vector<1x1024xf32>
    %5 = vector.broadcast %4 : vector<1x1024xf32> to vector<16x1024xf32>
    %6 = arith.addf %3, %5 : vector<16x1024xf32>
    %cst_5 = arith.constant 2.000000e-01 : f32
    %7 = vector.broadcast %cst_5 : f32 to vector<16x1024xf32>
    %8 = arith.mulf %7, %6 : vector<16x1024xf32>
    %9 = arith.maximumf %6, %8 : vector<16x1024xf32>
    %10 = arith.truncf %9 : vector<16x1024xf32> to vector<16x1024xbf16>
    %c0_6 = arith.constant 0 : index
    %c0_7 = arith.constant 0 : index
    %11 = vector.load %arg4[%c0_6, %c0_7] : memref<1024x512xbf16, #tpu.memory_space<vmem>>, vector<1024x512xbf16>
    %cst_8 = arith.constant dense<0.000000e+00> : vector<16x512xf32>
    %12 = tpu.matmul %10, %11, %cst_8 {dimension_numbers = #tpu.dot_dimension_numbers<[1], [0], [0], [1], [0, 0, 1, 1], [], []>} : vector<16x1024xbf16>, vector<1024x512xbf16>, vector<16x512xf32> -> vector<16x512xf32>
    %c0_9 = arith.constant 0 : index
    %c0_10 = arith.constant 0 : index
    %13 = vector.load %arg5[%c0_9, %c0_10] : memref<1x512xf32, #tpu.memory_space<vmem>>, vector<1x512xf32>
    %14 = vector.broadcast %13 : vector<1x512xf32> to vector<16x512xf32>
    %15 = arith.addf %12, %14 : vector<16x512xf32>
    %cst_11 = arith.constant 2.000000e-01 : f32
    %16 = vector.broadcast %cst_11 : f32 to vector<16x512xf32>
    %17 = arith.mulf %16, %15 : vector<16x512xf32>
    %18 = arith.maximumf %15, %17 : vector<16x512xf32>
    %19 = arith.truncf %18 : vector<16x512xf32> to vector<16x512xbf16>
    %c0_12 = arith.constant 0 : index
    %c0_13 = arith.constant 0 : index
    %20 = vector.load %arg6[%c0_12, %c0_13] : memref<512x384xbf16, #tpu.memory_space<vmem>>, vector<512x384xbf16>
    %cst_14 = arith.constant dense<0.000000e+00> : vector<16x384xf32>
    %21 = tpu.matmul %19, %20, %cst_14 {dimension_numbers = #tpu.dot_dimension_numbers<[1], [0], [0], [1], [0, 0, 1, 1], [], []>} : vector<16x512xbf16>, vector<512x384xbf16>, vector<16x384xf32> -> vector<16x384xf32>
    %c0_15 = arith.constant 0 : index
    %c0_16 = arith.constant 0 : index
    %22 = vector.load %arg7[%c0_15, %c0_16] : memref<1x384xf32, #tpu.memory_space<vmem>>, vector<1x384xf32>
    %23 = vector.broadcast %22 : vector<1x384xf32> to vector<16x384xf32>
    %24 = arith.addf %21, %23 : vector<16x384xf32>
    %cst_17 = arith.constant 2.000000e-01 : f32
    %25 = vector.broadcast %cst_17 : f32 to vector<16x384xf32>
    %26 = arith.mulf %25, %24 : vector<16x384xf32>
    %27 = arith.maximumf %24, %26 : vector<16x384xf32>
    %28 = arith.truncf %27 : vector<16x384xf32> to vector<16x384xbf16>
    %c0_18 = arith.constant 0 : index
    %c0_19 = arith.constant 0 : index
    %29 = vector.load %arg8[%c0_18, %c0_19] : memref<384x128xbf16, #tpu.memory_space<vmem>>, vector<384x128xbf16>
    %cst_20 = arith.constant dense<0.000000e+00> : vector<16x128xf32>
    %30 = tpu.matmul %28, %29, %cst_20 {dimension_numbers = #tpu.dot_dimension_numbers<[1], [0], [0], [1], [0, 0, 1, 1], [], []>} : vector<16x384xbf16>, vector<384x128xbf16>, vector<16x128xf32> -> vector<16x128xf32>
    %c0_21 = arith.constant 0 : index
    %c0_22 = arith.constant 0 : index
    %31 = vector.load %arg9[%c0_21, %c0_22] : memref<1x128xf32, #tpu.memory_space<vmem>>, vector<1x128xf32>
    %32 = vector.broadcast %31 : vector<1x128xf32> to vector<16x128xf32>
    %33 = arith.addf %30, %32 : vector<16x128xf32>
    %cst_23 = arith.constant 2.000000e-01 : f32
    %34 = vector.broadcast %cst_23 : f32 to vector<16x128xf32>
    %35 = arith.mulf %34, %33 : vector<16x128xf32>
    %36 = arith.maximumf %33, %35 : vector<16x128xf32>
    %37 = arith.truncf %36 : vector<16x128xf32> to vector<16x128xbf16>
    %c0_24 = arith.constant 0 : index
    %c0_25 = arith.constant 0 : index
    %38 = vector.load %arg10[%c0_24, %c0_25] : memref<128x64xbf16, #tpu.memory_space<vmem>>, vector<128x64xbf16>
    %cst_26 = arith.constant dense<0.000000e+00> : vector<16x64xf32>
    %39 = tpu.matmul %37, %38, %cst_26 {dimension_numbers = #tpu.dot_dimension_numbers<[1], [0], [0], [1], [0, 0, 1, 1], [], []>} : vector<16x128xbf16>, vector<128x64xbf16>, vector<16x64xf32> -> vector<16x64xf32>
    %c0_27 = arith.constant 0 : index
    %c0_28 = arith.constant 0 : index
    %40 = vector.load %arg11[%c0_27, %c0_28] : memref<1x64xf32, #tpu.memory_space<vmem>>, vector<1x64xf32>
    %41 = vector.broadcast %40 : vector<1x64xf32> to vector<16x64xf32>
    %42 = arith.addf %39, %41 : vector<16x64xf32>
    %cst_29 = arith.constant 2.000000e-01 : f32
    %43 = vector.broadcast %cst_29 : f32 to vector<16x64xf32>
    %44 = arith.mulf %43, %42 : vector<16x64xf32>
    %45 = arith.maximumf %42, %44 : vector<16x64xf32>
    %c0_30 = arith.constant 0 : index
    %c0_31 = arith.constant 0 : index
    %46 = vector.load %arg12[%c0_30, %c0_31] : memref<1x64xbf16, #tpu.memory_space<vmem>>, vector<1x64xbf16>
    %47 = arith.extf %46 : vector<1x64xbf16> to vector<1x64xf32>
    %48 = vector.broadcast %47 : vector<1x64xf32> to vector<16x64xf32>
    %49 = arith.mulf %45, %48 : vector<16x64xf32>
    %cst_32 = arith.constant dense<0.000000e+00> : vector<16xf32>
    %50 = vector.multi_reduction <add>, %49, %cst_32 [1] : vector<16x64xf32> to vector<16xf32>
    %51 = vector.shape_cast %50 : vector<16xf32> to vector<16x1xf32>
    %c0_33 = arith.constant 0 : index
    %c0_34 = arith.constant 0 : index
    %52 = vector.load %arg13[%c0_33, %c0_34] : memref<1x1xf32, #tpu.memory_space<vmem>>, vector<1x1xf32>
    %53 = vector.broadcast %52 : vector<1x1xf32> to vector<16x1xf32>
    %54 = arith.addf %51, %53 : vector<16x1xf32>
    %55 = arith.negf %54 : vector<16x1xf32>
    %56 = math.exp %55 : vector<16x1xf32>
    %cst_35 = arith.constant 1.000000e+00 : f32
    %57 = vector.broadcast %cst_35 : f32 to vector<16x1xf32>
    %58 = arith.addf %57, %56 : vector<16x1xf32>
    %59 = arith.divf %57, %58 : vector<16x1xf32>
    %60 = vector.shape_cast %59 : vector<16x1xf32> to vector<1x16xf32>
    %c0_36 = arith.constant 0 : index
    %c0_37 = arith.constant 0 : index
    %61 = vector.load %arg14[%c0_36, %c0_37] : memref<1x16xf32, #tpu.memory_space<vmem>>, vector<1x16xf32>
    tpu.vector_store %arg14[%c0_36, %c0_37], %60 {strides = array<i32>} : memref<1x16xf32, #tpu.memory_space<vmem>>, vector<1x16xf32>,
    return
  }
  func.func @transform_0(%arg0: i32) -> (i32, i32) {
    %c0_i32 = arith.constant 0 : i32
    %c0_i32_0 = arith.constant 0 : i32
    return %arg0, %c0_i32 : i32, i32
  }
  func.func @transform_1(%arg0: i32) -> (i32, i32) {
    %c0_i32 = arith.constant 0 : i32
    %c0_i32_0 = arith.constant 0 : i32
    %c0_i32_1 = arith.constant 0 : i32
    return %c0_i32, %c0_i32_0 : i32, i32
  }
  func.func @transform_2(%arg0: i32) -> (i32, i32) {
    %c0_i32 = arith.constant 0 : i32
    %c0_i32_0 = arith.constant 0 : i32
    %c0_i32_1 = arith.constant 0 : i32
    return %c0_i32, %c0_i32_0 : i32, i32
  }
  func.func @transform_3(%arg0: i32) -> (i32, i32) {
    %c0_i32 = arith.constant 0 : i32
    %c0_i32_0 = arith.constant 0 : i32
    %c0_i32_1 = arith.constant 0 : i32
    return %c0_i32, %c0_i32_0 : i32, i32
  }
  func.func @transform_4(%arg0: i32) -> (i32, i32) {
    %c0_i32 = arith.constant 0 : i32
    %c0_i32_0 = arith.constant 0 : i32
    %c0_i32_1 = arith.constant 0 : i32
    return %c0_i32, %c0_i32_0 : i32, i32
  }
  func.func @transform_5(%arg0: i32) -> (i32, i32) {
    %c0_i32 = arith.constant 0 : i32
    %c0_i32_0 = arith.constant 0 : i32
    %c0_i32_1 = arith.constant 0 : i32
    return %c0_i32, %c0_i32_0 : i32, i32
  }
  func.func @transform_6(%arg0: i32) -> (i32, i32) {
    %c0_i32 = arith.constant 0 : i32
    %c0_i32_0 = arith.constant 0 : i32
    %c0_i32_1 = arith.constant 0 : i32
    return %c0_i32, %c0_i32_0 : i32, i32
  }
  func.func @transform_7(%arg0: i32) -> (i32, i32) {
    %c0_i32 = arith.constant 0 : i32
    %c0_i32_0 = arith.constant 0 : i32
    %c0_i32_1 = arith.constant 0 : i32
    return %c0_i32, %c0_i32_0 : i32, i32
  }
  func.func @transform_8(%arg0: i32) -> (i32, i32) {
    %c0_i32 = arith.constant 0 : i32
    %c0_i32_0 = arith.constant 0 : i32
    %c0_i32_1 = arith.constant 0 : i32
    return %c0_i32, %c0_i32_0 : i32, i32
  }
  func.func @transform_9(%arg0: i32) -> (i32, i32) {
    %c0_i32 = arith.constant 0 : i32
    %c0_i32_0 = arith.constant 0 : i32
    %c0_i32_1 = arith.constant 0 : i32
    return %c0_i32, %c0_i32_0 : i32, i32
  }
  func.func @transform_10(%arg0: i32) -> (i32, i32) {
    %c0_i32 = arith.constant 0 : i32
    %c0_i32_0 = arith.constant 0 : i32
    %c0_i32_1 = arith.constant 0 : i32
    return %c0_i32, %c0_i32_0 : i32, i32
  }
  func.func @transform_11(%arg0: i32) -> (i32, i32) {
    %c0_i32 = arith.constant 0 : i32
    %c0_i32_0 = arith.constant 0 : i32
    %c0_i32_1 = arith.constant 0 : i32
    return %c0_i32, %c0_i32_0 : i32, i32
  }
  func.func @transform_12(%arg0: i32) -> (i32, i32) {
    %c0_i32 = arith.constant 0 : i32
    %c0_i32_0 = arith.constant 0 : i32
    %c0_i32_1 = arith.constant 0 : i32
    return %c0_i32, %c0_i32_0 : i32, i32
  }
  func.func @transform_13(%arg0: i32) -> (i32, i32) {
    %c0_i32 = arith.constant 0 : i32
    %c0_i32_0 = arith.constant 0 : i32
    return %arg0, %c0_i32 : i32, i32
  }
}

</mosaic_0001>

<bundles_post_ra>
// kernel: tpu_custom_call.1
= control target key start
LH: loop header
LB: loop body
LE: loop exit
PB: predicated region body
PF: predicated region fallthrough
CT: control target
= control target key end

     0   :  { %s11509_s0 = inlined_call_operand.hbm [shape: f32[16,784], index: 0, kind: input, shape index: {}]   ;;  %s11510_s1 = inlined_call_operand.hbm [shape: bf16[784,1024], index: 1, kind: input, shape index: {}]   ;;  %s11511_s2 = inlined_call_operand.hbm [shape: f32[1,1024], index: 2, kind: input, shape index: {}]   ;;  %s11512_s3 = inlined_call_operand.hbm [shape: bf16[1024,512], index: 3, kind: input, shape index: {}]   ;;  %s11513_s4 = inlined_call_operand.hbm [shape: f32[1,512], index: 4, kind: input, shape index: {}]   ;;  %s11514_s5 = inlined_call_operand.hbm [shape: bf16[512,384], index: 5, kind: input, shape index: {}]   ;;  %s11515_s6 = inlined_call_operand.hbm [shape: f32[1,384], index: 6, kind: input, shape index: {}]   ;;  %s11516_s7 = inlined_call_operand.hbm [shape: bf16[384,128], index: 7, kind: input, shape index: {}]   ;;  %s11517_s8 = inlined_call_operand.hbm [shape: f32[1,128], index: 8, kind: input, shape index: {}]   ;;  %s11518_s9 = inlined_call_operand.vmem [shape: bf16[128,64], index: 9, kind: input, shape index: {}]   ;;  %s11519_s10 = inlined_call_operand.hbm [shape: f32[1,64], index: 10, kind: input, shape index: {}]   ;;  %s11520_s11 = inlined_call_operand.hbm [shape: bf16[1,64], index: 11, kind: input, shape index: {}]   ;;  %s11521_s12 = inlined_call_operand.<no memory space> [shape: f32[1,1], index: 12, kind: input, shape index: {}]   ;;  %s11522_s13 = inlined_call_operand.hbm [shape: f32[1,16], index: 13, kind: output, shape index: {}]  }
   0x1   :  { %v18_v0 = vstv %s11521_s12 }
   0x2   :  { %19 = vst [vmem:[#allocation2] sm:$0x1] %v18_v0 }
   0x3   :  { %20 = vsyncpa [#allocation4], 0 }
   0x4   :  { %21 = vsyncpa [#allocation7], 0 }
   0x5   :  { %22 = vsyncpa [#allocation10], 0 }
   0x6   :  { %23 = vsyncpa [#allocation13], 0 }
   0x7   :  { %24 = vsyncpa [#allocation16], 0 }
   0x8   :  { %25 = vsyncpa [#allocation19], 0  ;;  %s44_s29 = sshll.u32 %s11510_s1, 4  ;;  %s45_s29 = int_to_ptr.hbm [resolvable:$true] %s44_s29 }
   0x9   :  { %26 = vsyncpa [#allocation5], 0  ;;  %s10926_s30 = smov [#allocation6]   ;;  %s68_s12 = sshll.u32 %s11512_s3, 4  ;;  %s69_s12 = int_to_ptr.hbm [resolvable:$true] %s68_s12 }
   0xa   :  { %s46_s14 = sshll.u32 %s10926_s30, 4  ;;  %s10927_s17 = smov 512   ;;  %s47_s14 = int_to_ptr.vmem [resolvable:$true] %s46_s14 }
   0xb   :  { %s10928_s18 = smov 32   ;;  %s10929_s19 = smov [#allocation9]  }
   0xc   :  { %52 = dma.hbm_to_vmem [thread:$0]  %s45_s29, 50176, %s47_s14, [#allocation7], %s10927_s17, %s10927_s17, %s10928_s18  }
   0xd   :  { %s70_s20 = sshll.u32 %s10929_s19, 4  ;;  %s10930_s21 = smov 256   ;;  %s71_s20 = int_to_ptr.vmem [resolvable:$true] %s70_s20 }
   0xe   :  { %s10931_s22 = smov 16   ;;  %s92_s24 = sshll.u32 %s11514_s5, 4  ;;  %s93_s24 = int_to_ptr.hbm [resolvable:$true] %s92_s24 }
   0xf   :  { %76 = dma.hbm_to_vmem [thread:$0]  %s69_s12, 32768, %s71_s20, [#allocation10], %s10930_s21, %s10930_s21, %s10931_s22  }
  0x10   :  { %s10932_s25 = smov [#allocation12]   ;;  %s116_s28 = sshll.u32 %s11516_s7, 4  ;;  %s117_s28 = int_to_ptr.hbm [resolvable:$true] %s116_s28 }
  0x11   :  { %s94_s26 = sshll.u32 %s10932_s25, 4  ;;  %s10933_s29 = smov 192   ;;  %s95_s26 = int_to_ptr.vmem [resolvable:$true] %s94_s26 }
  0x12   :  { %s10934_s30 = smov 12   ;;  %s10935_s14 = smov [#allocation15]  }
  0x13   :  { %100 = dma.hbm_to_vmem [thread:$0]  %s93_s24, 12288, %s95_s26, [#allocation13], %s10933_s29, %s10933_s29, %s10934_s30  }
  0x14   :  { %s118_s15 = sshll.u32 %s10935_s14, 4  ;;  %s10936_s16 = smov 64   ;;  %s119_s15 = int_to_ptr.vmem [resolvable:$true] %s118_s15 }
  0x15   :  { %s10937_s12 = smov 4   ;;  %s143_s18 = sshll.u32 %s11519_s10, 4  ;;  %s144_s18 = int_to_ptr.hbm [resolvable:$true] %s143_s18 }
  0x16   :  { %124 = dma.hbm_to_vmem [thread:$0]  %s117_s28, 3072, %s119_s15, [#allocation16], %s10936_s16, %s10936_s16, %s10937_s12  }
  0x17   :  { %s10938_s19 = smov [#allocation18]   ;;  %s31_s22 = sshll.u32 %s11509_s0, 4  ;;  %s32_s22 = int_to_ptr.hbm [resolvable:$true] %s31_s22 }
  0x18   :  { %s145_s20 = sshll.u32 %s10938_s19, 4  ;;  %s10939_s1 = smov [#allocation3]   ;;  %s146_s20 = int_to_ptr.vmem [resolvable:$true] %s145_s20 }
  0x19   :  { %148 = dma.hbm_to_vmem [thread:$0]  %s144_s18, 16, %s146_s20, [#allocation19]  }
  0x1a   :  { %s33_s23 = sshll.u32 %s10939_s1, 4  ;;  %s10940_s24 = smov 896   ;;  %s34_s23 = int_to_ptr.vmem [resolvable:$true] %s33_s23 }
  0x1b   :  { %s10941_s25 = smov 56   ;;  %s58_s10 = sshll.u32 %s11511_s2, 4  ;;  %s59_s10 = int_to_ptr.hbm [resolvable:$true] %s58_s10 }
  0x1c   :  { %39 = dma.hbm_to_vmem [thread:$0]  %s32_s22, 1792, %s34_s23, [#allocation4], %s10940_s24, %s10940_s24, %s10941_s25  }
  0x1d   :  { %s10942_s3 = smov [#allocation8]   ;;  %s82_s0 = sshll.u32 %s11513_s4, 4  ;;  %s83_s0 = int_to_ptr.hbm [resolvable:$true] %s82_s0 }
  0x1e   :  { %s60_s28 = sshll.u32 %s10942_s3, 4  ;;  %s10943_s14 = smov [#allocation11]   ;;  %s61_s28 = int_to_ptr.vmem [resolvable:$true] %s60_s28 }
  0x1f   :  { %63 = dma.hbm_to_vmem [thread:$0]  %s59_s10, 128, %s61_s28, [#allocation7]  }
  0x20   :  { %s84_s15 = sshll.u32 %s10943_s14, 4  ;;  %s106_s17 = sshll.u32 %s11515_s6, 4  ;;  %s85_s15 = int_to_ptr.vmem [resolvable:$true] %s84_s15  ;;  %s107_s17 = int_to_ptr.hbm [resolvable:$true] %s106_s17 }
  0x21   :  { %87 = dma.hbm_to_vmem [thread:$0]  %s83_s0, 64, %s85_s15, [#allocation10]  }
  0x22   :  { %s130_s18 = sshll.u32 %s11517_s8, 4  ;;  %s10944_s19 = smov [#allocation14]   ;;  %s131_s18 = int_to_ptr.hbm [resolvable:$true] %s130_s18 }
  0x23   :  { %s108_s20 = sshll.u32 %s10944_s19, 4  ;;  %s10945_s4 = smov [#allocation17]   ;;  %s109_s20 = int_to_ptr.vmem [resolvable:$true] %s108_s20 }
  0x24   :  { %111 = dma.hbm_to_vmem [thread:$0]  %s107_s17, 48, %s109_s20, [#allocation13]  }
  0x25   :  { %s132_s21 = sshll.u32 %s10945_s4, 4  ;;  %s154_s1 = sshll.u32 %s11520_s11, 4  ;;  %s133_s21 = int_to_ptr.vmem [resolvable:$true] %s132_s21  ;;  %s155_s1 = int_to_ptr.hbm [resolvable:$true] %s154_s1 }
  0x26   :  { %135 = dma.hbm_to_vmem [thread:$0]  %s131_s18, 16, %s133_s21, [#allocation16]  }
  0x27   :  { %s10946_s6 = smov [#allocation20]  }
  0x28   :  { %s156_s23 = sshll.u32 %s10946_s6, 4  ;;  %s157_s23 = int_to_ptr.vmem [resolvable:$true] %s156_s23 }
  0x29   :  { %159 = dma.hbm_to_vmem [thread:$0]  %s155_s1, 16, %s157_s23, [#allocation19]  }
  0x2a   :  { %10912 = dma.done.wait [#allocation4], 1792  }
  0x2b   :  { %10913 = vsyncadd [#allocation4], 4294965504 }
  0x2c   :  { %10914 = dma.done.wait [#allocation7], 50304  }
  0x2d   :  { %10915 = vsyncadd [#allocation7], 4294916992 }
  0x2e   :  { %10916 = dma.done.wait [#allocation10], 32832  }
  0x2f   :  { %10917 = vsyncadd [#allocation10], 4294934464 }
  0x30   :  { %10918 = dma.done.wait [#allocation13], 12336  }
  0x31   :  { %10919 = vsyncadd [#allocation13], 4294954960 }
  0x32   :  { %10920 = dma.done.wait [#allocation16], 3088  }
  0x33   :  { %10921 = vsyncadd [#allocation16], 4294964208 }
  0x34   :  { %10922 = dma.done.wait [#allocation19], 32  }
  0x35   :  { %10923 = vsyncadd [#allocation19], 4294967264  ;;  %v6922_v1 = vld [vmem:[#allocation6 + $0x1c0] sm:$0xf]  ;;  %vm2598_vm0 = vcmask 130048   ;;  %vm6605_vm1 = vcmask 523264  }
  0x36   :  { %v9870_v2 = vld [vmem:[#allocation6 + $0x1dc] sm:$0xf0]  ;;  %s6681_s18 = sshll.u32 %s11522_s13, 4  ;;  %vm6669_vm10 = vcmask 130112   ;;  %vm6672_vm11 = vcmask 122880   ;;  %s6682_s18 = int_to_ptr.hbm [resolvable:$true] %s6681_s18 }
  0x37   :  { %v7178_v3 = vld [vmem:[#allocation6 + $0x3c0] sm:$0xf]  ;;  %v6923_v4 = vor.u32 %v9870_v2, %v6922_v1 }
  0x38   :  { %v9934_v5 = vld [vmem:[#allocation6 + $0x3dc] sm:$0xf0] }
  0x39   :  { %v7434_v6 = vld [vmem:[#allocation6 + $0x5c0] sm:$0xf]  ;;  %v7179_v8 = vor.u32 %v9934_v5, %v7178_v3  ;;  %2602 = vmatpush.bf16.msra.mxu0 %v6923_v4 }
  0x3a   :  { %v9998_v7 = vld [vmem:[#allocation6 + $0x5dc] sm:$0xf0] }
  0x3b   :  { %v7435_v9 = vor.u32 %v9998_v7, %v7434_v6  ;;  %v7690_v10 = vld [vmem:[#allocation6 + $0x7c0] sm:$0xf]  ;;  %2616 = vmatpush.bf16.msra.mxu1 %v7179_v8 }
  0x3c   :  { %v10062_v11 = vld [vmem:[#allocation6 + $0x7dc] sm:$0xf0] }
  0x3d   :  { %v6890_v12 = vld [vmem:[#allocation6 + $0x180] sm:$0xf]  ;;  %v7691_v13 = vor.u32 %v10062_v11, %v7690_v10  ;;  %2630 = vmatpush.bf16.msra.mxu2 %v7435_v9 }
  0x3e   :  { %v9862_v14 = vld [vmem:[#allocation6 + $0x19c] sm:$0xf0] }
  0x3f   :  { %v7146_v15 = vld [vmem:[#allocation6 + $0x380] sm:$0xf]  ;;  %v6891_v17 = vor.u32 %v9862_v14, %v6890_v12  ;;  %2644 = vmatpush.bf16.msra.mxu3 %v7691_v13 }
  0x40   :  { %v9926_v16 = vld [vmem:[#allocation6 + $0x39c] sm:$0xf0] }
  0x41   :  { %v7147_v18 = vor.u32 %v9926_v16, %v7146_v15  ;;  %v7402_v19 = vld [vmem:[#allocation6 + $0x580] sm:$0xf]  ;;  %2603 = vmatpush.bf16.msra.mxu0 %v6891_v17 }
  0x42   :  { %v9990_v20 = vld [vmem:[#allocation6 + $0x59c] sm:$0xf0] }
  0x43   :  { %v7658_v21 = vld [vmem:[#allocation6 + $0x780] sm:$0xf]  ;;  %v7403_v22 = vor.u32 %v9990_v20, %v7402_v19  ;;  %2617 = vmatpush.bf16.msra.mxu1 %v7147_v18 }
  0x44   :  { %v10054_v23 = vld [vmem:[#allocation6 + $0x79c] sm:$0xf0] }
  0x45   :  { %v6858_v24 = vld [vmem:[#allocation6 + $0x140] sm:$0xf]  ;;  %v7659_v26 = vor.u32 %v10054_v23, %v7658_v21  ;;  %2631 = vmatpush.bf16.msra.mxu2 %v7403_v22 }
  0x46   :  { %v9854_v25 = vld [vmem:[#allocation6 + $0x15c] sm:$0xf0] }
  0x47   :  { %v7114_v27 = vld [vmem:[#allocation6 + $0x340] sm:$0xf]  ;;  %v6859_v30 = vor.u32 %v9854_v25, %v6858_v24  ;;  %2645 = vmatpush.bf16.msra.mxu3 %v7659_v26 }
  0x48   :  { %v9918_v28 = vld [vmem:[#allocation6 + $0x35c] sm:$0xf0] }
  0x49   :  { %v7370_v29 = vld [vmem:[#allocation6 + $0x540] sm:$0xf]  ;;  %v7115_v34 = vor.u32 %v9918_v28, %v7114_v27  ;;  %2604 = vmatpush.bf16.msra.mxu0 %v6859_v30 }
  0x4a   :  { %v9982_v31 = vld [vmem:[#allocation6 + $0x55c] sm:$0xf0] }
  0x4b   :  { %v7626_v32 = vld [vmem:[#allocation6 + $0x740] sm:$0xf]  ;;  %v7371_v35 = vor.u32 %v9982_v31, %v7370_v29  ;;  %2618 = vmatpush.bf16.msra.mxu1 %v7115_v34  ;;  %v6924_v34 = vld [vmem:[#allocation6 + $0x1e0] sm:$0xf0] }
  0x4c   :  { %v10046_v33 = vld [vmem:[#allocation6 + $0x75c] sm:$0xf0] }
  0x4d   :  { %v6826_v36 = vld [vmem:[#allocation6 + $0x100] sm:$0xf]  ;;  %v7627_v39 = vor.u32 %v10046_v33, %v7626_v32  ;;  %2632 = vmatpush.bf16.msra.mxu2 %v7371_v35  ;;  %v9866_v33 = vld [vmem:[#allocation6 + $0x1c4] sm:$0xf] }
  0x4e   :  { %v9846_v37 = vld [vmem:[#allocation6 + $0x11c] sm:$0xf0] }
  0x4f   :  { %v7082_v38 = vld [vmem:[#allocation6 + $0x300] sm:$0xf]  ;;  %v6827_v45 = vor.u32 %v9846_v37, %v6826_v36  ;;  %2646 = vmatpush.bf16.msra.mxu3 %v7627_v39  ;;  %v216_v37 = vld [vmem:[#allocation3 + $0x48] sm:$0xff] }
  0x50   :  { %v9910_v40 = vld [vmem:[#allocation6 + $0x31c] sm:$0xf0] }
  0x51   :  { %v7338_v41 = vld [vmem:[#allocation6 + $0x500] sm:$0xf]  ;;  %v7083_v46 = vor.u32 %v9910_v40, %v7082_v38  ;;  %2605 = vmatpush.bf16.msra.mxu0 %v6827_v45 }
  0x52   :  { %v9974_v42 = vld [vmem:[#allocation6 + $0x51c] sm:$0xf0] }
  0x53   :  { %v7594_v43 = vld [vmem:[#allocation6 + $0x700] sm:$0xf]  ;;  %v7339_v47 = vor.u32 %v9974_v42, %v7338_v41  ;;  %2619 = vmatpush.bf16.msra.mxu1 %v7083_v46  ;;  %v9930_v42 = vld [vmem:[#allocation6 + $0x3c4] sm:$0xf] }
  0x54   :  { %v10038_v44 = vld [vmem:[#allocation6 + $0x71c] sm:$0xf0] }
  0x55   :  { %v6794_v48 = vld [vmem:[#allocation6 + $0xc0] sm:$0xf]  ;;  %v7595_v51 = vor.u32 %v10038_v44, %v7594_v43  ;;  %2633 = vmatpush.bf16.msra.mxu2 %v7339_v47  ;;  %v207_v43 = vld [vmem:[#allocation3] sm:$0xff]  ;;  %v214_v44 = vld [vmem:[#allocation3 + $0x38] sm:$0xff] }
  0x56   :  { %v9838_v49 = vld [vmem:[#allocation6 + $0xdc] sm:$0xf0]  ;;  %v7180_v47 = vld [vmem:[#allocation6 + $0x3e0] sm:$0xf0] }
  0x57   :  { %v7050_v50 = vld [vmem:[#allocation6 + $0x2c0] sm:$0xf]  ;;  %v6795_v57 = vor.u32 %v9838_v49, %v6794_v48  ;;  %2647 = vmatpush.bf16.msra.mxu3 %v7595_v51  ;;  %v210_v48 = vld [vmem:[#allocation3 + $0x18] sm:$0xff]  ;;  %v6927_v51 = vor.u32 %v9866_v33, %v6924_v34 }
  0x58   :  { %v9902_v52 = vld [vmem:[#allocation6 + $0x2dc] sm:$0xf0] }
  0x59   :  { %v7306_v53 = vld [vmem:[#allocation6 + $0x4c0] sm:$0xf]  ;;  %v7051_v58 = vor.u32 %v9902_v52, %v7050_v50  ;;  %2606 = vmatpush.bf16.msra.mxu0 %v6795_v57 }
  0x5a   :  { %v9966_v54 = vld [vmem:[#allocation6 + $0x4dc] sm:$0xf0] }
  0x5b   :  { %v7562_v55 = vld [vmem:[#allocation6 + $0x6c0] sm:$0xf]  ;;  %v7307_v59 = vor.u32 %v9966_v54, %v7306_v53  ;;  %2620 = vmatpush.bf16.msra.mxu1 %v7051_v58  ;;  %v9858_v58 = vld [vmem:[#allocation6 + $0x184] sm:$0xf] }
  0x5c   :  { %v10030_v56 = vld [vmem:[#allocation6 + $0x6dc] sm:$0xf0] }
  0x5d   :  { %v6762_v60 = vld [vmem:[#allocation6 + $0x80] sm:$0xf]  ;;  %v7563_v63 = vor.u32 %v10030_v56, %v7562_v55  ;;  %2634 = vmatpush.bf16.msra.mxu2 %v7307_v59  ;;  %v11057_v56 = vpack.c.bf16 %v214_v44, %v207_v43  ;;  %v6892_v59 = vld [vmem:[#allocation6 + $0x1a0] sm:$0xf0] }
  0x5e   :  { %v9830_v61 = vld [vmem:[#allocation6 + $0x9c] sm:$0xf0] }
  0x5f   :  { %v7018_v62 = vld [vmem:[#allocation6 + $0x280] sm:$0xf]  ;;  %v6763_v5 = vor.u32 %v9830_v61, %v6762_v60  ;;  %2648 = vmatpush.bf16.msra.mxu3 %v7563_v63  ;;  %v215_v63 = vld [vmem:[#allocation3 + $0x40] sm:$0xff] }
  0x60   :  { %v9894_v0 = vld [vmem:[#allocation6 + $0x29c] sm:$0xf0] }
  0x61   :  { %v7274_v1 = vld [vmem:[#allocation6 + $0x480] sm:$0xf]  ;;  %v7019_v7 = vor.u32 %v9894_v0, %v7018_v62  ;;  %2607 = vmatpush.bf16.msra.mxu0 %v6763_v5  ;;  %v208_v62 = vld [vmem:[#allocation3 + $0x8] sm:$0xff]  ;;  %v7183_v0 = vor.u32 %v9930_v42, %v7180_v47  ;;  %v6895_v5 = vor.u32 %v9858_v58, %v6892_v59  ;;  %v7052_v42 = vld [vmem:[#allocation6 + $0x2e0] sm:$0xf0] }
  0x62   :  { %v9958_v2 = vld [vmem:[#allocation6 + $0x49c] sm:$0xf0] }
  0x63   :  { %v7530_v3 = vld [vmem:[#allocation6 + $0x680] sm:$0xf]  ;;  %v7275_v8 = vor.u32 %v9958_v2, %v7274_v1  ;;  %2621 = vmatpush.bf16.msra.mxu1 %v7019_v7  ;;  %v9922_v2 = vld [vmem:[#allocation6 + $0x384] sm:$0xf] }
  0x64   :  { %v10022_v4 = vld [vmem:[#allocation6 + $0x69c] sm:$0xf0] }
  0x65   :  { %v6730_v6 = vld [vmem:[#allocation6 + $0x40] sm:$0xf]  ;;  %v7531_v12 = vor.u32 %v10022_v4, %v7530_v3  ;;  %2635 = vmatpush.bf16.msra.mxu2 %v7275_v8  ;;  %v7148_v3 = vld [vmem:[#allocation6 + $0x3a0] sm:$0xf0] }
  0x66   :  { %v9822_v9 = vld [vmem:[#allocation6 + $0x5c] sm:$0xf0] }
  0x67   :  { %v6986_v10 = vld [vmem:[#allocation6 + $0x240] sm:$0xf]  ;;  %v6731_v19 = vor.u32 %v9822_v9, %v6730_v6  ;;  %2649 = vmatpush.bf16.msra.mxu3 %v7531_v12  ;;  %v11063_v9 = vpack.c.bf16 %v215_v63, %v208_v62  ;;  %v6860_v12 = vld [vmem:[#allocation6 + $0x160] sm:$0xf0] }
  0x68   :  { %v9886_v11 = vld [vmem:[#allocation6 + $0x25c] sm:$0xf0] }
  0x69   :  { %v7242_v13 = vld [vmem:[#allocation6 + $0x440] sm:$0xf]  ;;  %v6987_v24 = vor.u32 %v9886_v11, %v6986_v10  ;;  %2608 = vmatpush.bf16.msra.mxu0 %v6731_v19  ;;  %v9850_v11 = vld [vmem:[#allocation6 + $0x144] sm:$0xf] }
  0x6a   :  { %v9950_v14 = vld [vmem:[#allocation6 + $0x45c] sm:$0xf0] }
  0x6b   :  { %v7498_v15 = vld [vmem:[#allocation6 + $0x640] sm:$0xf]  ;;  %v7243_v25 = vor.u32 %v9950_v14, %v7242_v13  ;;  %2622 = vmatpush.bf16.msra.mxu1 %v6987_v24  ;;  %v7151_v13 = vor.u32 %v9922_v2, %v7148_v3  ;;  %v6828_v24 = vld [vmem:[#allocation6 + $0x120] sm:$0xf0] }
  0x6c   :  { %v10014_v16 = vld [vmem:[#allocation6 + $0x65c] sm:$0xf0]  ;;  %v6732_v2 = vld [vmem:[#allocation6 + $0x60] sm:$0xf0] }
  0x6d   :  { %v6698_v17 = vld [vmem:[#allocation6] sm:$0xf]  ;;  %v7499_v29 = vor.u32 %v10014_v16, %v7498_v15  ;;  %2636 = vmatpush.bf16.msra.mxu2 %v7243_v25  ;;  %v9914_v15 = vld [vmem:[#allocation6 + $0x344] sm:$0xf] }
  0x6e   :  { %v9814_v18 = vld [vmem:[#allocation6 + $0x1c] sm:$0xf0]  ;;  %v7116_v16 = vld [vmem:[#allocation6 + $0x360] sm:$0xf0] }
  0x6f   :  { %v6954_v20 = vld [vmem:[#allocation6 + $0x200] sm:$0xf]  ;;  %v6699_v36 = vor.u32 %v9814_v18, %v6698_v17  ;;  %2650 = vmatpush.bf16.msra.mxu3 %v7499_v29  ;;  %v6863_v18 = vor.u32 %v9850_v11, %v6860_v12  ;;  %v7119_v25 = vor.u32 %v9914_v15, %v7116_v16  ;;  %v9882_v3 = vld [vmem:[#allocation6 + $0x244] sm:$0xf] }
  0x70   :  { %v9878_v21 = vld [vmem:[#allocation6 + $0x21c] sm:$0xf0]  ;;  %v6700_v15 = vld [vmem:[#allocation6 + $0x20] sm:$0xf0] }
  0x71   :  { %v7210_v22 = vld [vmem:[#allocation6 + $0x400] sm:$0xf]  ;;  %v6955_v40 = vor.u32 %v9878_v21, %v6954_v20  ;;  %2609 = vmatpush.bf16.msra.mxu0 %v6699_v36  ;;  %v6796_v36 = vld [vmem:[#allocation6 + $0xe0] sm:$0xf0] }
  0x72   :  { %v9942_v23 = vld [vmem:[#allocation6 + $0x41c] sm:$0xf0]  ;;  %v9994_v16 = vld [vmem:[#allocation6 + $0x5c4] sm:$0xf] }
  0x73   :  { %v7466_v26 = vld [vmem:[#allocation6 + $0x600] sm:$0xf]  ;;  %v7211_v41 = vor.u32 %v9942_v23, %v7210_v22  ;;  %2623 = vmatpush.bf16.msra.mxu1 %v6955_v40  ;;  %v9842_v23 = vld [vmem:[#allocation6 + $0x104] sm:$0xf] }
  0x74   :  { %v10006_v27 = vld [vmem:[#allocation6 + $0x61c] sm:$0xf0]  ;;  %2610 = vmatmul.bf16.vlgmr.msra.gmra.mxu0 %v11057_v56 }
  0x75   :  { %v7946_v28 = vld [vmem:[#allocation6 + $0x9c0] sm:$0xf]  ;;  %v7467_v45 = vor.u32 %v10006_v27, %v7466_v26  ;;  %2637 = vmatpush.bf16.msra.mxu2 %v7211_v41  ;;  %v9906_v27 = vld [vmem:[#allocation6 + $0x304] sm:$0xf] }
  0x76   :  { %v10126_v30 = vld [vmem:[#allocation6 + $0x9dc] sm:$0xf0]  ;;  %2624 = vmatmul.bf16.vlgmr.msra.gmra.mxu1 %v11063_v9  ;;  %v9898_v41 = vld [vmem:[#allocation6 + $0x2c4] sm:$0xf] }
  0x77   :  { %v8202_v31 = vld [vmem:[#allocation6 + $0xbc0] sm:$0xf]  ;;  %v7947_v46 = vor.u32 %v10126_v30, %v7946_v28  ;;  %2651 = vmatpush.bf16.msra.mxu3 %v7467_v45  ;;  %v7084_v28 = vld [vmem:[#allocation6 + $0x320] sm:$0xf0]  ;;  %v6831_v30 = vor.u32 %v9842_v23, %v6828_v24  ;;  %v211_v24 = vld [vmem:[#allocation3 + $0x20] sm:$0xff] }
  0x78   :  { %v10190_v32 = vld [vmem:[#allocation6 + $0xbdc] sm:$0xf0] }
  0x79   :  { %v209_v35 = vld [vmem:[#allocation3 + $0x10] sm:$0xff]  ;;  %v8203_v50 = vor.u32 %v10190_v32, %v8202_v31  ;;  %2658 = vmatpush.bf16.msrb.mxu0 %v7947_v46 }
  0x7a   :  { %v8234_v38 = vld [vmem:[#allocation6 + $0xc00] sm:$0xf]  ;;  %v11055_v55 = vpack.c.bf16 %v216_v37, %v209_v35  ;;  %v9834_v35 = vld [vmem:[#allocation6 + $0xc4] sm:$0xf] }
  0x7b   :  { %v10198_v39 = vld [vmem:[#allocation6 + $0xc1c] sm:$0xf0]  ;;  %2672 = vmatpush.bf16.msrb.mxu1 %v8203_v50  ;;  %2700 = vmatpush.bf16.msrb.mxu3 %v6927_v51  ;;  %v6799_v44 = vor.u32 %v9834_v35, %v6796_v36  ;;  %v6764_v50 = vld [vmem:[#allocation6 + $0xa0] sm:$0xf0] }
  0x7c   :  { %v217_v49 = vld [vmem:[#allocation3 + $0x50] sm:$0xff]  ;;  %v8235_v60 = vor.u32 %v10198_v39, %v8234_v38  ;;  %2638 = vmatmul.bf16.vlgmr.msra.gmra.mxu2 %v11055_v55  ;;  %v220_v38 = vld [vmem:[#allocation3 + $0x68] sm:$0xff]  ;;  %v7087_v39 = vor.u32 %v9906_v27, %v7084_v28 }
  0x7d   :  { %v7914_v52 = vld [vmem:[#allocation6 + $0x980] sm:$0xf]  ;;  %v11059_v61 = vpack.c.bf16 %v217_v49, %v210_v48  ;;  %v9826_v49 = vld [vmem:[#allocation6 + $0x84] sm:$0xf] }
  0x7e   :  { %v10118_v53 = vld [vmem:[#allocation6 + $0x99c] sm:$0xf0]  ;;  %2693 = vmatpush.bf16.msrb.mxu2 %v8235_v60  ;;  %v6767_v59 = vor.u32 %v9826_v49, %v6764_v50  ;;  %v8204_v35 = vld [vmem:[#allocation6 + $0xbe0] sm:$0xf0] }
  0x7f   :  { %v8170_v54 = vld [vmem:[#allocation6 + $0xb80] sm:$0xf]  ;;  %v7915_v1 = vor.u32 %v10118_v53, %v7914_v52  ;;  %2652 = vmatmul.bf16.vlgmr.msra.gmra.mxu3 %v11059_v61  ;;  %v7055_v52 = vor.u32 %v9898_v41, %v7052_v42  ;;  %v9986_v36 = vld [vmem:[#allocation6 + $0x584] sm:$0xf] }
  0x80   :  { %v10182_v57 = vld [vmem:[#allocation6 + $0xb9c] sm:$0xf0]  ;;  %2701 = vmatpush.bf16.msrb.mxu3 %v6895_v5  ;;  %v7660_v41 = vld [vmem:[#allocation6 + $0x7a0] sm:$0xf0] }
  0x81   :  { %v8171_v4 = vor.u32 %v10182_v57, %v8170_v54  ;;  %v7882_v6 = vld [vmem:[#allocation6 + $0x940] sm:$0xf]  ;;  %2659 = vmatpush.bf16.msrb.mxu0 %v7915_v1  ;;  %v9890_v54 = vld [vmem:[#allocation6 + $0x284] sm:$0xf] }
  0x82   :  { %v10110_v7 = vld [vmem:[#allocation6 + $0x95c] sm:$0xf0]  ;;  %2714 = vmatpush.bf16.msra.mxu2 %v7183_v0  ;;  %v7020_v57 = vld [vmem:[#allocation6 + $0x2a0] sm:$0xf0] }
  0x83   :  { %v8138_v8 = vld [vmem:[#allocation6 + $0xb40] sm:$0xf]  ;;  %v7883_v14 = vor.u32 %v10110_v7, %v7882_v6  ;;  %2673 = vmatpush.bf16.msrb.mxu1 %v8171_v4  ;;  %v9818_v1 = vld [vmem:[#allocation6 + $0x44] sm:$0xf]  ;;  %v7023_v5 = vor.u32 %v9890_v54, %v7020_v57 }
  0x84   :  { %v10174_v10 = vld [vmem:[#allocation6 + $0xb5c] sm:$0xf0]  ;;  %2702 = vmatpush.bf16.msrb.mxu3 %v6863_v18  ;;  %v6988_v4 = vld [vmem:[#allocation6 + $0x260] sm:$0xf0]  ;;  %v6735_v12 = vor.u32 %v9818_v1, %v6732_v2 }
  0x85   :  { %v8139_v17 = vor.u32 %v10174_v10, %v8138_v8  ;;  %v7850_v19 = vld [vmem:[#allocation6 + $0x900] sm:$0xf]  ;;  %2660 = vmatpush.bf16.msrb.mxu0 %v7883_v14  ;;  %v9810_v14 = vld [vmem:[#allocation6 + $0x4] sm:$0xf] }
  0x86   :  { %v10102_v20 = vld [vmem:[#allocation6 + $0x91c] sm:$0xf0]  ;;  %2715 = vmatpush.bf16.msra.mxu2 %v7151_v13  ;;  %v10058_v18 = vld [vmem:[#allocation6 + $0x7c4] sm:$0xf]  ;;  %v6703_v28 = vor.u32 %v9810_v14, %v6700_v15 }
  0x87   :  { %v8106_v21 = vld [vmem:[#allocation6 + $0xb00] sm:$0xf]  ;;  %v7851_v26 = vor.u32 %v10102_v20, %v7850_v19  ;;  %2674 = vmatpush.bf16.msrb.mxu1 %v8139_v17  ;;  %v7436_v17 = vld [vmem:[#allocation6 + $0x5e0] sm:$0xf0] }
  0x88   :  { %v10166_v22 = vld [vmem:[#allocation6 + $0xb1c] sm:$0xf0]  ;;  %2703 = vmatpush.bf16.msrb.mxu3 %v6831_v30  ;;  %v7692_v19 = vld [vmem:[#allocation6 + $0x7e0] sm:$0xf0]  ;;  %v212_v30 = vld [vmem:[#allocation3 + $0x28] sm:$0xff] }
  0x89   :  { %v8107_v29 = vor.u32 %v10166_v22, %v8106_v21  ;;  %v7818_v31 = vld [vmem:[#allocation6 + $0x8c0] sm:$0xf]  ;;  %2661 = vmatpush.bf16.msrb.mxu0 %v7851_v26  ;;  %v10122_v20 = vld [vmem:[#allocation6 + $0x9c4] sm:$0xf]  ;;  %v6991_v22 = vor.u32 %v9882_v3, %v6988_v4 }
  0x8a   :  { %v10094_v32 = vld [vmem:[#allocation6 + $0x8dc] sm:$0xf0]  ;;  %2716 = vmatpush.bf16.msra.mxu2 %v7119_v25  ;;  %v7948_v21 = vld [vmem:[#allocation6 + $0x9e0] sm:$0xf0]  ;;  %v218_v25 = vld [vmem:[#allocation3 + $0x58] sm:$0xff] }
  0x8b   :  { %v8074_v33 = vld [vmem:[#allocation6 + $0xac0] sm:$0xf]  ;;  %v7819_v40 = vor.u32 %v10094_v32, %v7818_v31  ;;  %2675 = vmatpush.bf16.msrb.mxu1 %v8107_v29  ;;  %v9874_v26 = vld [vmem:[#allocation6 + $0x204] sm:$0xf]  ;;  %v219_v31 = vld [vmem:[#allocation3 + $0x60] sm:$0xff]  ;;  %v7439_v32 = vor.u32 %v9994_v16, %v7436_v17 }
  0x8c   :  { %v10158_v34 = vld [vmem:[#allocation6 + $0xadc] sm:$0xf0]  ;;  %2704 = vmatpush.bf16.msrb.mxu3 %v6799_v44  ;;  %v6956_v29 = vld [vmem:[#allocation6 + $0x220] sm:$0xf0] }
  0x8d   :  { %v213_v37 = vld [vmem:[#allocation3 + $0x30] sm:$0xff]  ;;  %v8075_v43 = vor.u32 %v10158_v34, %v8074_v33  ;;  %2662 = vmatpush.bf16.msrb.mxu0 %v7819_v40  ;;  %v7695_v33 = vor.u32 %v10058_v18, %v7692_v19  ;;  %v6959_v42 = vor.u32 %v9874_v26, %v6956_v29 }
  0x8e   :  { %v7786_v45 = vld [vmem:[#allocation6 + $0x880] sm:$0xf]  ;;  %v11067_v51 = vpack.c.bf16 %v220_v38, %v213_v37  ;;  %2717 = vmatpush.bf16.msra.mxu2 %v7087_v39  ;;  %v10186_v34 = vld [vmem:[#allocation6 + $0xbc4] sm:$0xf]  ;;  %v7951_v37 = vor.u32 %v10122_v20, %v7948_v21  ;;  %v11071_v38 = vpack.c.bf16 %v218_v25, %v211_v24 }
  0x8f   :  { %v10086_v46 = vld [vmem:[#allocation6 + $0x89c] sm:$0xf0]  ;;  %2676 = vmatpush.bf16.msrb.mxu1 %v8075_v43  ;;  %v7404_v39 = vld [vmem:[#allocation6 + $0x5a0] sm:$0xf0]  ;;  %v11073_v43 = vpack.c.bf16 %v219_v31, %v212_v30 }
  0x90   :  { %v8042_v47 = vld [vmem:[#allocation6 + $0xa80] sm:$0xf]  ;;  %11527 = vst [vmem:[#allocation29_spill] sm:$0xff] %v11067_v51  ;;  %v7787_v53 = vor.u32 %v10086_v46, %v7786_v45  ;;  %8264 = vmatmul.msk.bf16.vlgmr.msrb.gmra.mxu2 %vm2598_vm0, %v11067_v51  ;;  %2705 = vmatpush.bf16.msrb.mxu3 %v6767_v59  ;;  %v10050_v40 = vld [vmem:[#allocation6 + $0x784] sm:$0xf]  ;;  %v8207_v46 = vor.u32 %v10186_v34, %v8204_v35 }
  0x91   :  { %v10150_v48 = vld [vmem:[#allocation6 + $0xa9c] sm:$0xf0]  ;;  %v10114_v44 = vld [vmem:[#allocation6 + $0x984] sm:$0xf] }
  0x92   :  { %v8043_v58 = vor.u32 %v10150_v48, %v8042_v47  ;;  %v7754_v60 = vld [vmem:[#allocation6 + $0x840] sm:$0xf]  ;;  %2718 = vmatpush.bf16.msra.mxu2 %v7055_v52  ;;  %2663 = vmatpush.bf16.msrb.mxu0 %v7787_v53  ;;  %v7916_v45 = vld [vmem:[#allocation6 + $0x9a0] sm:$0xf0]  ;;  %v7407_v47 = vor.u32 %v9986_v36, %v7404_v39  ;;  %v7663_v48 = vor.u32 %v10050_v40, %v7660_v41 }
  0x93   :  { %v10078_v62 = vld [vmem:[#allocation6 + $0x85c] sm:$0xf0]  ;;  %v10178_v49 = vld [vmem:[#allocation6 + $0xb84] sm:$0xf]  ;;  %v7919_v53 = vor.u32 %v10114_v44, %v7916_v45 }
  0x94   :  { %v8010_v63 = vld [vmem:[#allocation6 + $0xa40] sm:$0xf]  ;;  %v7755_v6 = vor.u32 %v10078_v62, %v7754_v60  ;;  %2677 = vmatpush.bf16.msrb.mxu1 %v8043_v58  ;;  %2706 = vmatpush.bf16.msrb.mxu3 %v6735_v12  ;;  %v8172_v50 = vld [vmem:[#allocation6 + $0xba0] sm:$0xf0] }
  0x95   :  { %v10142_v0 = vld [vmem:[#allocation6 + $0xa5c] sm:$0xf0]  ;;  %v9978_v52 = vld [vmem:[#allocation6 + $0x544] sm:$0xf]  ;;  %v8175_v62 = vor.u32 %v10178_v49, %v8172_v50 }
  0x96   :  { %v7722_v7 = vld [vmem:[#allocation6 + $0x800] sm:$0xf]  ;;  %v8011_v11 = vor.u32 %v10142_v0, %v8010_v63  ;;  %2719 = vmatpush.bf16.msra.mxu2 %v7023_v5  ;;  %2664 = vmatpush.bf16.msrb.mxu0 %v7755_v6  ;;  %v7372_v54 = vld [vmem:[#allocation6 + $0x560] sm:$0xf0] }
  0x97   :  { %v10070_v8 = vld [vmem:[#allocation6 + $0x81c] sm:$0xf0]  ;;  %v10042_v57 = vld [vmem:[#allocation6 + $0x744] sm:$0xf]  ;;  %v7375_v63 = vor.u32 %v9978_v52, %v7372_v54 }
  0x98   :  { %v7978_v10 = vld [vmem:[#allocation6 + $0xa00] sm:$0xf]  ;;  %v7723_v23 = vor.u32 %v10070_v8, %v7722_v7  ;;  %2678 = vmatpush.bf16.msrb.mxu1 %v8011_v11  ;;  %2707 = vmatpush.bf16.msrb.mxu3 %v6703_v28  ;;  %v7628_v58 = vld [vmem:[#allocation6 + $0x760] sm:$0xf0] }
  0x99   :  { %v10134_v13 = vld [vmem:[#allocation6 + $0xa1c] sm:$0xf0]  ;;  %v10106_v59 = vld [vmem:[#allocation6 + $0x944] sm:$0xf]  ;;  %v7631_v0 = vor.u32 %v10042_v57, %v7628_v58 }
  0x9a   :  { %v7979_v27 = vor.u32 %v10134_v13, %v7978_v10  ;;  %2720 = vmatpush.bf16.msra.mxu2 %v6991_v22  ;;  %2665 = vmatpush.bf16.msrb.mxu0 %v7723_v23  ;;  %v7884_v60 = vld [vmem:[#allocation6 + $0x960] sm:$0xf0] }
  0x9b   :  { %2708 = vmatmul.bf16.vlgmr.msrb.gmra.mxu3 %v11057_v56  ;;  %v10170_v1 = vld [vmem:[#allocation6 + $0xb44] sm:$0xf]  ;;  %v7887_v4 = vor.u32 %v10106_v59, %v7884_v60 }
  0x9c   :  { %2679 = vmatpush.bf16.msrb.mxu1 %v7979_v27  ;;  %2756 = vmatpush.bf16.msra.mxu3 %v7951_v37  ;;  %v8140_v2 = vld [vmem:[#allocation6 + $0xb60] sm:$0xf0] }
  0x9d   :  { %2666 = vmatmul.bf16.vlgmr.msrb.gmra.mxu0 %v11071_v38  ;;  %v9970_v3 = vld [vmem:[#allocation6 + $0x504] sm:$0xf]  ;;  %v8143_v11 = vor.u32 %v10170_v1, %v8140_v2  ;;  %v6930_v1 = vld [vmem:[#allocation6 + $0x1c8] sm:$0xf] }
  0x9e   :  { %2728 = vmatpush.bf16.msra.mxu0 %v7439_v32  ;;  %2721 = vmatpush.bf16.msra.mxu2 %v6959_v42  ;;  %v7340_v5 = vld [vmem:[#allocation6 + $0x520] sm:$0xf0]  ;;  %v9871_v2 = vld [vmem:[#allocation6 + $0x1e4] sm:$0xf0] }
  0x9f   :  { %2680 = vmatmul.bf16.vlgmr.msrb.gmra.mxu1 %v11073_v43  ;;  %v10034_v6 = vld [vmem:[#allocation6 + $0x704] sm:$0xf]  ;;  %v7343_v12 = vor.u32 %v9970_v3, %v7340_v5  ;;  %v7442_v3 = vld [vmem:[#allocation6 + $0x5c8] sm:$0xf] }
  0xa0   :  { %2742 = vmatpush.bf16.msra.mxu1 %v7695_v33  ;;  %2757 = vmatpush.bf16.msra.mxu3 %v7919_v53  ;;  %v7596_v7 = vld [vmem:[#allocation6 + $0x720] sm:$0xf0]  ;;  %v9999_v5 = vld [vmem:[#allocation6 + $0x5e4] sm:$0xf0] }
  0xa1   :  { %2722 = vmatmul.bf16.vlgmr.msra.gmra.mxu2 %v11063_v9  ;;  %v10098_v8 = vld [vmem:[#allocation6 + $0x904] sm:$0xf]  ;;  %v7599_v13 = vor.u32 %v10034_v6, %v7596_v7 }
  0xa2   :  { %2770 = vmatpush.bf16.msrb.mxu2 %v8207_v46  ;;  %2729 = vmatpush.bf16.msra.mxu0 %v7407_v47  ;;  %v7852_v10 = vld [vmem:[#allocation6 + $0x920] sm:$0xf0] }
  0xa3   :  { %v10162_v14 = vld [vmem:[#allocation6 + $0xb04] sm:$0xf]  ;;  %v7855_v17 = vor.u32 %v10098_v8, %v7852_v10 }
  0xa4   :  { %2743 = vmatpush.bf16.msra.mxu1 %v7663_v48  ;;  %v8108_v15 = vld [vmem:[#allocation6 + $0xb20] sm:$0xf0]  ;;  %2758 = vmatpush.bf16.msra.mxu3 %v7887_v4 }
  0xa5   :  { %v9962_v16 = vld [vmem:[#allocation6 + $0x4c4] sm:$0xf]  ;;  %v8111_v23 = vor.u32 %v10162_v14, %v8108_v15  ;;  %v6931_v14 = vor.u32 %v9871_v2, %v6930_v1  ;;  %v7698_v15 = vld [vmem:[#allocation6 + $0x7c8] sm:$0xf] }
  0xa6   :  { %2771 = vmatpush.bf16.msrb.mxu2 %v8175_v62  ;;  %2730 = vmatpush.bf16.msra.mxu0 %v7375_v63  ;;  %v7308_v18 = vld [vmem:[#allocation6 + $0x4e0] sm:$0xf0]  ;;  %v9839_v1 = vld [vmem:[#allocation6 + $0xe4] sm:$0xf0] }
  0xa7   :  { %v10026_v19 = vld [vmem:[#allocation6 + $0x6c4] sm:$0xf]  ;;  %v7311_v24 = vor.u32 %v9962_v16, %v7308_v18  ;;  %v10063_v16 = vld [vmem:[#allocation6 + $0x7e4] sm:$0xf0] }
  0xa8   :  { %2744 = vmatpush.bf16.msra.mxu1 %v7631_v0  ;;  %v7564_v20 = vld [vmem:[#allocation6 + $0x6e0] sm:$0xf0]  ;;  %2759 = vmatpush.bf16.msra.mxu3 %v7855_v17  ;;  %v7443_v17 = vor.u32 %v9999_v5, %v7442_v3  ;;  %v7314_v2 = vld [vmem:[#allocation6 + $0x4c8] sm:$0xf] }
  0xa9   :  { %v10090_v21 = vld [vmem:[#allocation6 + $0x8c4] sm:$0xf]  ;;  %v7567_v25 = vor.u32 %v10026_v19, %v7564_v20  ;;  %v7186_v19 = vld [vmem:[#allocation6 + $0x3c8] sm:$0xf] }
  0xaa   :  { %v7820_v22 = vld [vmem:[#allocation6 + $0x8e0] sm:$0xf0]  ;;  %2772 = vmatpush.bf16.msrb.mxu2 %v8143_v11  ;;  %2731 = vmatpush.bf16.msra.mxu0 %v7343_v12  ;;  %v9935_v20 = vld [vmem:[#allocation6 + $0x3e4] sm:$0xf0] }
  0xab   :  { %v10154_v26 = vld [vmem:[#allocation6 + $0xac4] sm:$0xf]  ;;  %v7823_v29 = vor.u32 %v10090_v21, %v7820_v22  ;;  %v6898_v21 = vld [vmem:[#allocation6 + $0x188] sm:$0xf] }
  0xac   :  { %2745 = vmatpush.bf16.msra.mxu1 %v7599_v13  ;;  %v8076_v27 = vld [vmem:[#allocation6 + $0xae0] sm:$0xf0]  ;;  %v9967_v3 = vld [vmem:[#allocation6 + $0x4e4] sm:$0xf0] }
  0xad   :  { %v9954_v28 = vld [vmem:[#allocation6 + $0x484] sm:$0xf]  ;;  %v8079_v35 = vor.u32 %v10154_v26, %v8076_v27  ;;  %2760 = vmatpush.bf16.msra.mxu3 %v7823_v29  ;;  %v7699_v26 = vor.u32 %v10063_v16, %v7698_v15  ;;  %v7187_v27 = vor.u32 %v9935_v20, %v7186_v19  ;;  %v10055_v29 = vld [vmem:[#allocation6 + $0x7a4] sm:$0xf0] }
  0xae   :  { %v7276_v30 = vld [vmem:[#allocation6 + $0x4a0] sm:$0xf0]  ;;  %2773 = vmatpush.bf16.msrb.mxu2 %v8111_v23  ;;  %2732 = vmatpush.bf16.msra.mxu0 %v7311_v24  ;;  %v9863_v23 = vld [vmem:[#allocation6 + $0x1a4] sm:$0xf0] }
  0xaf   :  { %v10018_v31 = vld [vmem:[#allocation6 + $0x684] sm:$0xf]  ;;  %v7279_v36 = vor.u32 %v9954_v28, %v7276_v30  ;;  %v7410_v24 = vld [vmem:[#allocation6 + $0x588] sm:$0xf]  ;;  %v6899_v30 = vor.u32 %v9863_v23, %v6898_v21 }
  0xb0   :  { %v7532_v32 = vld [vmem:[#allocation6 + $0x6a0] sm:$0xf0]  ;;  %2746 = vmatpush.bf16.msra.mxu1 %v7567_v25  ;;  %v9991_v25 = vld [vmem:[#allocation6 + $0x5a4] sm:$0xf0] }
  0xb1   :  { %v10082_v33 = vld [vmem:[#allocation6 + $0x884] sm:$0xf]  ;;  %v7535_v37 = vor.u32 %v10018_v31, %v7532_v32  ;;  %v7666_v28 = vld [vmem:[#allocation6 + $0x788] sm:$0xf]  ;;  %v7411_v31 = vor.u32 %v9991_v25, %v7410_v24 }
  0xb2   :  { %v7788_v34 = vld [vmem:[#allocation6 + $0x8a0] sm:$0xf0]  ;;  %2774 = vmatpush.bf16.msrb.mxu2 %v8079_v35  ;;  %2733 = vmatpush.bf16.msra.mxu0 %v7279_v36  ;;  %v7154_v32 = vld [vmem:[#allocation6 + $0x388] sm:$0xf] }
  0xb3   :  { %v10146_v39 = vld [vmem:[#allocation6 + $0xa84] sm:$0xf]  ;;  %v7791_v42 = vor.u32 %v10082_v33, %v7788_v34  ;;  %v9927_v33 = vld [vmem:[#allocation6 + $0x3a4] sm:$0xf0] }
  0xb4   :  { %v8044_v40 = vld [vmem:[#allocation6 + $0xaa0] sm:$0xf0]  ;;  %2747 = vmatpush.bf16.msra.mxu1 %v7535_v37  ;;  %v6866_v34 = vld [vmem:[#allocation6 + $0x148] sm:$0xf] }
  0xb5   :  { %v9946_v41 = vld [vmem:[#allocation6 + $0x444] sm:$0xf]  ;;  %v8047_v49 = vor.u32 %v10146_v39, %v8044_v40  ;;  %2761 = vmatpush.bf16.msra.mxu3 %v7791_v42  ;;  %v9855_v35 = vld [vmem:[#allocation6 + $0x164] sm:$0xf0]  ;;  %v7667_v39 = vor.u32 %v10055_v29, %v7666_v28  ;;  %v7155_v40 = vor.u32 %v9927_v33, %v7154_v32 }
  0xb6   :  { %v7244_v44 = vld [vmem:[#allocation6 + $0x460] sm:$0xf0]  ;;  %v7378_v36 = vld [vmem:[#allocation6 + $0x548] sm:$0xf] }
  0xb7   :  { %v10010_v45 = vld [vmem:[#allocation6 + $0x644] sm:$0xf]  ;;  %v7247_v53 = vor.u32 %v9946_v41, %v7244_v44  ;;  %2775 = vmatpush.bf16.msrb.mxu2 %v8047_v49  ;;  %v9983_v37 = vld [vmem:[#allocation6 + $0x564] sm:$0xf0] }
  0xb8   :  { %v7500_v46 = vld [vmem:[#allocation6 + $0x660] sm:$0xf0]  ;;  %v7122_v41 = vld [vmem:[#allocation6 + $0x348] sm:$0xf] }
  0xb9   :  { %v10074_v47 = vld [vmem:[#allocation6 + $0x844] sm:$0xf]  ;;  %v7503_v54 = vor.u32 %v10010_v45, %v7500_v46  ;;  %2734 = vmatpush.bf16.msra.mxu0 %v7247_v53  ;;  %v7634_v42 = vld [vmem:[#allocation6 + $0x748] sm:$0xf]  ;;  %v6867_v45 = vor.u32 %v9855_v35, %v6866_v34  ;;  %v7379_v46 = vor.u32 %v9983_v37, %v7378_v36 }
  0xba   :  { %v7756_v48 = vld [vmem:[#allocation6 + $0x860] sm:$0xf0]  ;;  %v10047_v44 = vld [vmem:[#allocation6 + $0x764] sm:$0xf0] }
  0xbb   :  { %v10138_v50 = vld [vmem:[#allocation6 + $0xa44] sm:$0xf]  ;;  %v7759_v60 = vor.u32 %v10074_v47, %v7756_v48  ;;  %2748 = vmatpush.bf16.msra.mxu1 %v7503_v54  ;;  %v9919_v47 = vld [vmem:[#allocation6 + $0x364] sm:$0xf0]  ;;  %v7635_v53 = vor.u32 %v10047_v44, %v7634_v42 }
  0xbc   :  { %v8012_v52 = vld [vmem:[#allocation6 + $0xa60] sm:$0xf0]  ;;  %v6834_v48 = vld [vmem:[#allocation6 + $0x108] sm:$0xf] }
  0xbd   :  { %v9938_v57 = vld [vmem:[#allocation6 + $0x404] sm:$0xf]  ;;  %v8015_v4 = vor.u32 %v10138_v50, %v8012_v52  ;;  %2762 = vmatpush.bf16.msra.mxu3 %v7759_v60  ;;  %v9847_v49 = vld [vmem:[#allocation6 + $0x124] sm:$0xf0] }
  0xbe   :  { %v7212_v58 = vld [vmem:[#allocation6 + $0x420] sm:$0xf0]  ;;  %v7346_v50 = vld [vmem:[#allocation6 + $0x508] sm:$0xf] }
  0xbf   :  { %v10002_v59 = vld [vmem:[#allocation6 + $0x604] sm:$0xf]  ;;  %v7215_v8 = vor.u32 %v9938_v57, %v7212_v58  ;;  %2776 = vmatpush.bf16.msrb.mxu2 %v8015_v4  ;;  %v9975_v52 = vld [vmem:[#allocation6 + $0x524] sm:$0xf0]  ;;  %v7123_v57 = vor.u32 %v9919_v47, %v7122_v41 }
  0xc0   :  { %v7468_v62 = vld [vmem:[#allocation6 + $0x620] sm:$0xf0]  ;;  %v7090_v54 = vld [vmem:[#allocation6 + $0x308] sm:$0xf] }
  0xc1   :  { %v10066_v63 = vld [vmem:[#allocation6 + $0x804] sm:$0xf]  ;;  %v7471_v10 = vor.u32 %v10002_v59, %v7468_v62  ;;  %2735 = vmatpush.bf16.msra.mxu0 %v7215_v8  ;;  %v9911_v58 = vld [vmem:[#allocation6 + $0x324] sm:$0xf0]  ;;  %v6835_v62 = vor.u32 %v9847_v49, %v6834_v48 }
  0xc2   :  { %v7724_v0 = vld [vmem:[#allocation6 + $0x820] sm:$0xf0]  ;;  %v7602_v59 = vld [vmem:[#allocation6 + $0x708] sm:$0xf]  ;;  %v7091_v5 = vor.u32 %v9911_v58, %v7090_v54 }
  0xc3   :  { %v10194_v6 = vld [vmem:[#allocation6 + $0xc04] sm:$0xf]  ;;  %v7727_v13 = vor.u32 %v10066_v63, %v7724_v0  ;;  %2749 = vmatpush.bf16.msra.mxu1 %v7471_v10  ;;  %v10039_v60 = vld [vmem:[#allocation6 + $0x724] sm:$0xf0]  ;;  %v7347_v63 = vor.u32 %v9975_v52, %v7346_v50  ;;  %v7315_v10 = vor.u32 %v9967_v3, %v7314_v2  ;;  %v7188_v3 = vld [vmem:[#allocation6 + $0x3e8] sm:$0xf0] }
  0xc4   :  { %v8236_v7 = vld [vmem:[#allocation6 + $0xc20] sm:$0xf0]  ;;  %2736 = vmatmul.bf16.vlgmr.msra.gmra.mxu0 %v11055_v55  ;;  %v6802_v0 = vld [vmem:[#allocation6 + $0xc8] sm:$0xf]  ;;  %v7603_v4 = vor.u32 %v10039_v60, %v7602_v59 }
  0xc5   :  { %v10130_v11 = vld [vmem:[#allocation6 + $0xa04] sm:$0xf]  ;;  %v8239_v18 = vor.u32 %v10194_v6, %v8236_v7  ;;  %2763 = vmatpush.bf16.msra.mxu3 %v7727_v13  ;;  %2826 = vmatpush.bf16.msrb.mxu0 %v7443_v17  ;;  %v7570_v6 = vld [vmem:[#allocation6 + $0x6c8] sm:$0xf]  ;;  %v6803_v8 = vor.u32 %v9839_v1, %v6802_v0  ;;  %v6932_v0 = vld [vmem:[#allocation6 + $0x1e8] sm:$0xf0] }
  0xc6   :  { %v7980_v12 = vld [vmem:[#allocation6 + $0xa20] sm:$0xf0]  ;;  %2750 = vmatmul.bf16.vlgmr.msra.gmra.mxu1 %v11059_v61  ;;  %v10031_v7 = vld [vmem:[#allocation6 + $0x6e4] sm:$0xf0]  ;;  %v9931_v1 = vld [vmem:[#allocation6 + $0x3cc] sm:$0xf] }
  0xc7   :  { %v7983_v22 = vor.u32 %v10130_v11, %v7980_v12  ;;  %2798 = vmatpush.bf16.msrb.mxu1 %v6931_v14  ;;  %v7058_v11 = vld [vmem:[#allocation6 + $0x2c8] sm:$0xf]  ;;  %v7571_v17 = vor.u32 %v10031_v7, %v7570_v6 }
  0xc8   :  { %2764 = vmatmul.bf16.vlgmr.msra.gmra.mxu3 %v11071_v38  ;;  %v9903_v12 = vld [vmem:[#allocation6 + $0x2e4] sm:$0xf0] }
  0xc9   :  { %2791 = vmatpush.bf16.msrb.mxu3 %v8239_v18  ;;  %2777 = vmatpush.bf16.msrb.mxu2 %v7983_v22  ;;  %v6770_v13 = vld [vmem:[#allocation6 + $0x88] sm:$0xf]  ;;  %v7059_v18 = vor.u32 %v9903_v12, %v7058_v11  ;;  %v7191_v12 = vor.u32 %v9931_v1, %v7188_v3 }
  0xca   :  { %2827 = vmatpush.bf16.msrb.mxu0 %v7411_v31  ;;  %v9831_v14 = vld [vmem:[#allocation6 + $0xa4] sm:$0xf0] }
  0xcb   :  { %2799 = vmatpush.bf16.msrb.mxu1 %v6899_v30  ;;  %v7282_v15 = vld [vmem:[#allocation6 + $0x488] sm:$0xf]  ;;  %v6771_v21 = vor.u32 %v9831_v14, %v6770_v13  ;;  %v9859_v14 = vld [vmem:[#allocation6 + $0x18c] sm:$0xf] }
  0xcc   :  { %2778 = vmatmul.bf16.vlgmr.msrb.gmra.mxu2 %v11073_v43  ;;  %v9959_v16 = vld [vmem:[#allocation6 + $0x4a4] sm:$0xf0] }
  0xcd   :  { %2840 = vmatpush.bf16.msra.mxu2 %v7699_v26  ;;  %2812 = vmatpush.bf16.msra.mxu3 %v7187_v27  ;;  %v7538_v19 = vld [vmem:[#allocation6 + $0x688] sm:$0xf]  ;;  %v7283_v22 = vor.u32 %v9959_v16, %v7282_v15  ;;  %v6900_v15 = vld [vmem:[#allocation6 + $0x1a8] sm:$0xf0] }
  0xce   :  { %2828 = vmatpush.bf16.msrb.mxu0 %v7379_v46  ;;  %v10023_v20 = vld [vmem:[#allocation6 + $0x6a4] sm:$0xf0]  ;;  %v9923_v16 = vld [vmem:[#allocation6 + $0x38c] sm:$0xf] }
  0xcf   :  { %2800 = vmatpush.bf16.msrb.mxu1 %v6867_v45  ;;  %v7026_v23 = vld [vmem:[#allocation6 + $0x288] sm:$0xf]  ;;  %v7539_v29 = vor.u32 %v10023_v20, %v7538_v19 }
  0xd0   :  { %v9895_v24 = vld [vmem:[#allocation6 + $0x2a4] sm:$0xf0] }
  0xd1   :  { %2841 = vmatpush.bf16.msra.mxu2 %v7667_v39  ;;  %2813 = vmatpush.bf16.msra.mxu3 %v7155_v40  ;;  %v6738_v25 = vld [vmem:[#allocation6 + $0x48] sm:$0xf]  ;;  %v7027_v30 = vor.u32 %v9895_v24, %v7026_v23 }
  0xd2   :  { %2829 = vmatpush.bf16.msrb.mxu0 %v7347_v63  ;;  %v9823_v26 = vld [vmem:[#allocation6 + $0x64] sm:$0xf0]  ;;  %v9867_v63 = vld [vmem:[#allocation6 + $0x1cc] sm:$0xf] }
  0xd3   :  { %2801 = vmatpush.bf16.msrb.mxu1 %v6835_v62  ;;  %v7250_v27 = vld [vmem:[#allocation6 + $0x448] sm:$0xf]  ;;  %v6739_v34 = vor.u32 %v9823_v26, %v6738_v25  ;;  %v9851_v26 = vld [vmem:[#allocation6 + $0x14c] sm:$0xf] }
  0xd4   :  { %v9951_v28 = vld [vmem:[#allocation6 + $0x464] sm:$0xf0] }
  0xd5   :  { %2842 = vmatpush.bf16.msra.mxu2 %v7635_v53  ;;  %2814 = vmatpush.bf16.msra.mxu3 %v7123_v57  ;;  %v6994_v31 = vld [vmem:[#allocation6 + $0x248] sm:$0xf]  ;;  %v7251_v35 = vor.u32 %v9951_v28, %v7250_v27  ;;  %v6868_v27 = vld [vmem:[#allocation6 + $0x168] sm:$0xf0] }
  0xd6   :  { %2830 = vmatpush.bf16.msrb.mxu0 %v7315_v10  ;;  %v7506_v32 = vld [vmem:[#allocation6 + $0x648] sm:$0xf]  ;;  %v9915_v28 = vld [vmem:[#allocation6 + $0x34c] sm:$0xf] }
  0xd7   :  { %2802 = vmatpush.bf16.msrb.mxu1 %v6803_v8  ;;  %v10015_v33 = vld [vmem:[#allocation6 + $0x664] sm:$0xf0]  ;;  %v6935_v8 = vor.u32 %v9867_v63, %v6932_v0 }
  0xd8   :  { %8265 = vmatmul.msk.bf16.vlgmr.msrb.gmra.mxu3 %vm2598_vm0, %v11067_v51  ;;  %v9887_v36 = vld [vmem:[#allocation6 + $0x264] sm:$0xf0]  ;;  %v7507_v44 = vor.u32 %v10015_v33, %v7506_v32  ;;  %v6871_v33 = vor.u32 %v9851_v26, %v6868_v27 }
  0xd9   :  { %2843 = vmatpush.bf16.msra.mxu2 %v7603_v4  ;;  %2815 = vmatpush.bf16.msra.mxu3 %v7091_v5  ;;  %v6706_v37 = vld [vmem:[#allocation6 + $0x8] sm:$0xf]  ;;  %v6995_v48 = vor.u32 %v9887_v36, %v6994_v31 }
  0xda   :  { %2831 = vmatpush.bf16.msrb.mxu0 %v7283_v22  ;;  %v9815_v39 = vld [vmem:[#allocation6 + $0x24] sm:$0xf0] }
  0xdb   :  { %2803 = vmatpush.bf16.msrb.mxu1 %v6771_v21  ;;  %v7218_v40 = vld [vmem:[#allocation6 + $0x408] sm:$0xf]  ;;  %v6707_v53 = vor.u32 %v9815_v39, %v6706_v37  ;;  %v6903_v21 = vor.u32 %v9859_v14, %v6900_v15  ;;  %v9843_v39 = vld [vmem:[#allocation6 + $0x10c] sm:$0xf] }
  0xdc   :  { %v9943_v41 = vld [vmem:[#allocation6 + $0x424] sm:$0xf0] }
  0xdd   :  { %2844 = vmatpush.bf16.msra.mxu2 %v7571_v17  ;;  %2816 = vmatpush.bf16.msra.mxu3 %v7059_v18  ;;  %v7954_v42 = vld [vmem:[#allocation6 + $0x9c8] sm:$0xf]  ;;  %v7219_v54 = vor.u32 %v9943_v41, %v7218_v40  ;;  %v7156_v17 = vld [vmem:[#allocation6 + $0x3a8] sm:$0xf0] }
  0xde   :  { %v10127_v45 = vld [vmem:[#allocation6 + $0x9e4] sm:$0xf0]  ;;  %2832 = vmatpush.bf16.msrb.mxu0 %v7251_v35  ;;  %v7159_v24 = vor.u32 %v9923_v16, %v7156_v17  ;;  %v6836_v40 = vld [vmem:[#allocation6 + $0x128] sm:$0xf0] }
  0xdf   :  { %v8242_v46 = vld [vmem:[#allocation6 + $0xc08] sm:$0xf]  ;;  %2804 = vmatpush.bf16.msrb.mxu1 %v6739_v34  ;;  %v7955_v60 = vor.u32 %v10127_v45, %v7954_v42  ;;  %v9907_v41 = vld [vmem:[#allocation6 + $0x30c] sm:$0xf] }
  0xe0   :  { %v10199_v47 = vld [vmem:[#allocation6 + $0xc24] sm:$0xf0]  ;;  %v7092_v42 = vld [vmem:[#allocation6 + $0x328] sm:$0xf0] }
  0xe1   :  { %2845 = vmatpush.bf16.msra.mxu2 %v7539_v29  ;;  %2817 = vmatpush.bf16.msra.mxu3 %v7027_v30  ;;  %v6962_v49 = vld [vmem:[#allocation6 + $0x208] sm:$0xf]  ;;  %v8243_v62 = vor.u32 %v10199_v47, %v8242_v46  ;;  %v7124_v29 = vld [vmem:[#allocation6 + $0x368] sm:$0xf0]  ;;  %v6839_v47 = vor.u32 %v9843_v39, %v6836_v40 }
  0xe2   :  { %v7474_v50 = vld [vmem:[#allocation6 + $0x608] sm:$0xf]  ;;  %2833 = vmatpush.bf16.msrb.mxu0 %v7219_v54  ;;  %v7127_v36 = vor.u32 %v9915_v28, %v7124_v29  ;;  %v6804_v54 = vld [vmem:[#allocation6 + $0xe8] sm:$0xf0] }
  0xe3   :  { %v10007_v52 = vld [vmem:[#allocation6 + $0x624] sm:$0xf0]  ;;  %2805 = vmatpush.bf16.msrb.mxu1 %v6707_v53  ;;  %v9835_v53 = vld [vmem:[#allocation6 + $0xcc] sm:$0xf] }
  0xe4   :  { %v9879_v57 = vld [vmem:[#allocation6 + $0x224] sm:$0xf0]  ;;  %v7475_v2 = vor.u32 %v10007_v52, %v7474_v50  ;;  %v7095_v50 = vor.u32 %v9907_v41, %v7092_v42  ;;  %v6807_v63 = vor.u32 %v9835_v53, %v6804_v54  ;;  %v9819_v17 = vld [vmem:[#allocation6 + $0x4c] sm:$0xf] }
  0xe5   :  { %v8210_v58 = vld [vmem:[#allocation6 + $0xbc8] sm:$0xf]  ;;  %2846 = vmatpush.bf16.msra.mxu2 %v7507_v44  ;;  %2818 = vmatpush.bf16.msra.mxu3 %v6995_v48  ;;  %v6963_v6 = vor.u32 %v9879_v57, %v6962_v49  ;;  %v9899_v57 = vld [vmem:[#allocation6 + $0x2cc] sm:$0xf] }
  0xe6   :  { %v10191_v59 = vld [vmem:[#allocation6 + $0xbe4] sm:$0xf0]  ;;  %2889 = vmatpush.bf16.msra.mxu0 %v8243_v62  ;;  %2806 = vmatmul.bf16.vlgmr.msrb.gmra.mxu1 %v11057_v56  ;;  %v10123_v39 = vld [vmem:[#allocation6 + $0x9cc] sm:$0xf] }
  0xe7   :  { %v7922_v4 = vld [vmem:[#allocation6 + $0x988] sm:$0xf]  ;;  %v8211_v7 = vor.u32 %v10191_v59, %v8210_v58  ;;  %2854 = vmatpush.bf16.msra.mxu1 %v7955_v60  ;;  %2834 = vmatmul.bf16.vlgmr.msrb.gmra.mxu0 %v11055_v55  ;;  %v7060_v58 = vld [vmem:[#allocation6 + $0x2e8] sm:$0xf0] }
  0xe8   :  { %v10119_v5 = vld [vmem:[#allocation6 + $0x9a4] sm:$0xf0]  ;;  %v7956_v40 = vld [vmem:[#allocation6 + $0x9e8] sm:$0xf0] }
  0xe9   :  { %v8178_v10 = vld [vmem:[#allocation6 + $0xb88] sm:$0xf]  ;;  %v7923_v13 = vor.u32 %v10119_v5, %v7922_v4  ;;  %2847 = vmatpush.bf16.msra.mxu2 %v7475_v2  ;;  %2819 = vmatpush.bf16.msra.mxu3 %v6963_v6  ;;  %v7063_v2 = vor.u32 %v9899_v57, %v7060_v58  ;;  %v9827_v4 = vld [vmem:[#allocation6 + $0x8c] sm:$0xf] }
  0xea   :  { %v10183_v11 = vld [vmem:[#allocation6 + $0xba4] sm:$0xf0]  ;;  %2910 = vmatpush.bf16.msrb.mxu0 %v7191_v12  ;;  %v6772_v5 = vld [vmem:[#allocation6 + $0xa8] sm:$0xf0] }
  0xeb   :  { %v7890_v18 = vld [vmem:[#allocation6 + $0x948] sm:$0xf]  ;;  %v8179_v20 = vor.u32 %v10183_v11, %v8178_v10  ;;  %2855 = vmatpush.bf16.msra.mxu1 %v7923_v13  ;;  %v9891_v6 = vld [vmem:[#allocation6 + $0x28c] sm:$0xf]  ;;  %v6775_v12 = vor.u32 %v9827_v4, %v6772_v5 }
  0xec   :  { %v10111_v19 = vld [vmem:[#allocation6 + $0x964] sm:$0xf0]  ;;  %2820 = vmatmul.bf16.vlgmr.msra.gmra.mxu3 %v11063_v9  ;;  %2848 = vmatmul.bf16.vlgmr.msra.gmra.mxu2 %v11059_v61  ;;  %v10187_v41 = vld [vmem:[#allocation6 + $0xbcc] sm:$0xf] }
  0xed   :  { %2868 = vmatpush.bf16.msrb.mxu3 %v8211_v7  ;;  %2896 = vmatpush.bf16.msrb.mxu2 %v6935_v8  ;;  %v8146_v22 = vld [vmem:[#allocation6 + $0xb48] sm:$0xf]  ;;  %v7891_v25 = vor.u32 %v10111_v19, %v7890_v18  ;;  %v7028_v7 = vld [vmem:[#allocation6 + $0x2a8] sm:$0xf0] }
  0xee   :  { %v10175_v23 = vld [vmem:[#allocation6 + $0xb64] sm:$0xf0]  ;;  %2911 = vmatpush.bf16.msrb.mxu0 %v7159_v24  ;;  %v7031_v15 = vor.u32 %v9891_v6, %v7028_v7  ;;  %v6740_v18 = vld [vmem:[#allocation6 + $0x68] sm:$0xf0] }
  0xef   :  { %v7858_v30 = vld [vmem:[#allocation6 + $0x908] sm:$0xf]  ;;  %v8147_v32 = vor.u32 %v10175_v23, %v8146_v22  ;;  %2856 = vmatpush.bf16.msra.mxu1 %v7891_v25  ;;  %v9883_v19 = vld [vmem:[#allocation6 + $0x24c] sm:$0xf]  ;;  %v6743_v26 = vor.u32 %v9819_v17, %v6740_v18 }
  0xf0   :  { %v10103_v31 = vld [vmem:[#allocation6 + $0x924] sm:$0xf0]  ;;  %v9995_v23 = vld [vmem:[#allocation6 + $0x5cc] sm:$0xf] }
  0xf1   :  { %2869 = vmatpush.bf16.msrb.mxu3 %v8179_v20  ;;  %2897 = vmatpush.bf16.msrb.mxu2 %v6903_v21  ;;  %v8114_v34 = vld [vmem:[#allocation6 + $0xb08] sm:$0xf]  ;;  %v7859_v37 = vor.u32 %v10103_v31, %v7858_v30  ;;  %v6996_v20 = vld [vmem:[#allocation6 + $0x268] sm:$0xf0] }
  0xf2   :  { %v10167_v35 = vld [vmem:[#allocation6 + $0xb24] sm:$0xf0]  ;;  %2912 = vmatpush.bf16.msrb.mxu0 %v7127_v36  ;;  %v7444_v24 = vld [vmem:[#allocation6 + $0x5e8] sm:$0xf0]  ;;  %v6999_v29 = vor.u32 %v9883_v19, %v6996_v20 }
  0xf3   :  { %v7826_v44 = vld [vmem:[#allocation6 + $0x8c8] sm:$0xf]  ;;  %v8115_v46 = vor.u32 %v10167_v35, %v8114_v34  ;;  %2857 = vmatpush.bf16.msra.mxu1 %v7859_v37  ;;  %v9811_v31 = vld [vmem:[#allocation6 + $0xc] sm:$0xf]  ;;  %v7447_v34 = vor.u32 %v9995_v23, %v7444_v24 }
  0xf4   :  { %v10095_v45 = vld [vmem:[#allocation6 + $0x8e4] sm:$0xf0]  ;;  %v6964_v35 = vld [vmem:[#allocation6 + $0x228] sm:$0xf0] }
  0xf5   :  { %2870 = vmatpush.bf16.msrb.mxu3 %v8147_v32  ;;  %2898 = vmatpush.bf16.msrb.mxu2 %v6871_v33  ;;  %v8082_v48 = vld [vmem:[#allocation6 + $0xac8] sm:$0xf]  ;;  %v7827_v52 = vor.u32 %v10095_v45, %v7826_v44  ;;  %v6708_v32 = vld [vmem:[#allocation6 + $0x28] sm:$0xf0] }
  0xf6   :  { %v10159_v49 = vld [vmem:[#allocation6 + $0xae4] sm:$0xf0]  ;;  %2913 = vmatpush.bf16.msrb.mxu0 %v7095_v50  ;;  %v9875_v33 = vld [vmem:[#allocation6 + $0x20c] sm:$0xf]  ;;  %v7959_v50 = vor.u32 %v10123_v39, %v7956_v40 }
  0xf7   :  { %v7794_v59 = vld [vmem:[#allocation6 + $0x888] sm:$0xf]  ;;  %v8083_v62 = vor.u32 %v10159_v49, %v8082_v48  ;;  %2858 = vmatpush.bf16.msra.mxu1 %v7827_v52  ;;  %8266 = vmatmul.msk.bf16.vlgmr.msra.gmra.mxu0 %vm2598_vm0, %v11067_v51  ;;  %v10059_v36 = vld [vmem:[#allocation6 + $0x7cc] sm:$0xf]  ;;  %v6967_v48 = vor.u32 %v9875_v33, %v6964_v35 }
  0xf8   :  { %v10087_v60 = vld [vmem:[#allocation6 + $0x8a4] sm:$0xf0]  ;;  %v7700_v37 = vld [vmem:[#allocation6 + $0x7e8] sm:$0xf0] }
  0xf9   :  { %2871 = vmatpush.bf16.msrb.mxu3 %v8115_v46  ;;  %2899 = vmatpush.bf16.msrb.mxu2 %v6839_v47  ;;  %v8050_v0 = vld [vmem:[#allocation6 + $0xa88] sm:$0xf]  ;;  %v7795_v3 = vor.u32 %v10087_v60, %v7794_v59  ;;  %v8212_v44 = vld [vmem:[#allocation6 + $0xbe8] sm:$0xf0]  ;;  %v6711_v47 = vor.u32 %v9811_v31, %v6708_v32  ;;  %v7703_v49 = vor.u32 %v10059_v36, %v7700_v37 }
  0xfa   :  { %v10151_v1 = vld [vmem:[#allocation6 + $0xaa4] sm:$0xf0]  ;;  %2914 = vmatpush.bf16.msrb.mxu0 %v7063_v2  ;;  %v9987_v45 = vld [vmem:[#allocation6 + $0x58c] sm:$0xf]  ;;  %v8215_v54 = vor.u32 %v10187_v41, %v8212_v44 }
  0xfb   :  { %v7762_v8 = vld [vmem:[#allocation6 + $0x848] sm:$0xf]  ;;  %v8051_v11 = vor.u32 %v10151_v1, %v8050_v0  ;;  %2859 = vmatpush.bf16.msra.mxu1 %v7795_v3  ;;  %v7412_v46 = vld [vmem:[#allocation6 + $0x5a8] sm:$0xf0]  ;;  %v11092_v1 = vld [vmem:[#allocation8] sm:$0xff] }
  0xfc   :  { %v10079_v10 = vld [vmem:[#allocation6 + $0x864] sm:$0xf0]  ;;  %v10051_v52 = vld [vmem:[#allocation6 + $0x78c] sm:$0xf]  ;;  %v7415_v57 = vor.u32 %v9987_v45, %v7412_v46 }
  0xfd   :  { %2872 = vmatpush.bf16.msrb.mxu3 %v8083_v62  ;;  %2900 = vmatpush.bf16.msrb.mxu2 %v6807_v63  ;;  %v8018_v13 = vld [vmem:[#allocation6 + $0xa48] sm:$0xf]  ;;  %v7763_v16 = vor.u32 %v10079_v10, %v7762_v8  ;;  %v7668_v53 = vld [vmem:[#allocation6 + $0x7a8] sm:$0xf0] }
  0xfe   :  { %v10143_v14 = vld [vmem:[#allocation6 + $0xa64] sm:$0xf0]  ;;  %2915 = vmatpush.bf16.msrb.mxu0 %v7031_v15  ;;  %v10115_v58 = vld [vmem:[#allocation6 + $0x98c] sm:$0xf]  ;;  %v7671_v2 = vor.u32 %v10051_v52, %v7668_v53  ;;  %v11524_v15 = vperm.slane %v11092_v1, 0 }
  0xff   :  { %v7730_v21 = vld [vmem:[#allocation6 + $0x808] sm:$0xf]  ;;  %v8019_v25 = vor.u32 %v10143_v14, %v8018_v13  ;;  %2860 = vmatpush.bf16.msra.mxu1 %v7763_v16  ;;  %v7924_v59 = vld [vmem:[#allocation6 + $0x9a8] sm:$0xf0]  ;;  %v2639_v46 = vpop.f32.mrf.mxu2 }
 0x100   :  { %v10071_v22 = vld [vmem:[#allocation6 + $0x824] sm:$0xf0]  ;;  %v10179_v60 = vld [vmem:[#allocation6 + $0xb8c] sm:$0xf]  ;;  %v7927_v3 = vor.u32 %v10115_v58, %v7924_v59 }
 0x101   :  { %2873 = vmatpush.bf16.msrb.mxu3 %v8051_v11  ;;  %2901 = vmatpush.bf16.msrb.mxu2 %v6775_v12  ;;  %v7986_v27 = vld [vmem:[#allocation6 + $0xa08] sm:$0xf]  ;;  %v7731_v30 = vor.u32 %v10071_v22, %v7730_v21  ;;  %v8180_v62 = vld [vmem:[#allocation6 + $0xba8] sm:$0xf0]  ;;  %v2611_v22 = vpop.f32.mrf.mxu0 }
 0x102   :  { %v10135_v28 = vld [vmem:[#allocation6 + $0xa24] sm:$0xf0]  ;;  %2916 = vmatpush.bf16.msrb.mxu0 %v6999_v29  ;;  %v9979_v63 = vld [vmem:[#allocation6 + $0x54c] sm:$0xf]  ;;  %v8183_v7 = vor.u32 %v10179_v60, %v8180_v62  ;;  %v2653_v53 = vpop.f32.mrf.mxu3 }
 0x103   :  { %v7987_v42 = vor.u32 %v10135_v28, %v7986_v27  ;;  %2861 = vmatpush.bf16.msra.mxu1 %v7731_v30  ;;  %v7380_v0 = vld [vmem:[#allocation6 + $0x568] sm:$0xf0] }
 0x104   :  { %v10043_v4 = vld [vmem:[#allocation6 + $0x74c] sm:$0xf]  ;;  %v7383_v8 = vor.u32 %v9979_v63, %v7380_v0 }
 0x105   :  { %2874 = vmatpush.bf16.msrb.mxu3 %v8019_v25  ;;  %2902 = vmatpush.bf16.msrb.mxu2 %v6743_v26  ;;  %v7636_v5 = vld [vmem:[#allocation6 + $0x768] sm:$0xf0]  ;;  %v2612_v26 = vadd.f32 %v2611_v22, %v11524_v15  ;;  %v10053_v15 = vld [vmem:[#allocation6 + $0x79c] sm:$0xf] }
 0x106   :  { %2862 = vmatmul.bf16.vlgmr.msra.gmra.mxu1 %v11071_v38  ;;  %2917 = vmatpush.bf16.msrb.mxu0 %v6967_v48  ;;  %v10107_v6 = vld [vmem:[#allocation6 + $0x94c] sm:$0xf]  ;;  %v7639_v16 = vor.u32 %v10043_v4, %v7636_v5 }
 0x107   :  { %2924 = vmatpush.bf16.msrb.mxu1 %v7447_v34  ;;  %v7892_v10 = vld [vmem:[#allocation6 + $0x968] sm:$0xf0]  ;;  %v2625_v34 = vpop.f32.mrf.mxu1 }
 0x108   :  { %v10171_v11 = vld [vmem:[#allocation6 + $0xb4c] sm:$0xf]  ;;  %v7895_v17 = vor.u32 %v10107_v6, %v7892_v10  ;;  %v2626_v41 = vadd.f32 %v2625_v34, %v2612_v26  ;;  %v9936_v34 = vld [vmem:[#allocation6 + $0x3ec] sm:$0xf0] }
 0x109   :  { %2875 = vmatpush.bf16.msrb.mxu3 %v7987_v42  ;;  %2903 = vmatpush.bf16.msrb.mxu2 %v6711_v47  ;;  %v8148_v12 = vld [vmem:[#allocation6 + $0xb68] sm:$0xf0] }
 0x10a   :  { %2966 = vmatpush.bf16.msra.mxu0 %v8215_v54  ;;  %v9971_v13 = vld [vmem:[#allocation6 + $0x50c] sm:$0xf]  ;;  %v8151_v20 = vor.u32 %v10171_v11, %v8148_v12  ;;  %v2640_v47 = vadd.f32 %v2639_v46, %v2626_v41 }
 0x10b   :  { %2925 = vmatpush.bf16.msrb.mxu1 %v7415_v57  ;;  %v7348_v14 = vld [vmem:[#allocation6 + $0x528] sm:$0xf0]  ;;  %2918 = vmatmul.bf16.vlgmr.msrb.gmra.mxu0 %v11063_v9 }
 0x10c   :  { %2876 = vmatmul.bf16.vlgmr.msrb.gmra.mxu3 %v11073_v43  ;;  %2904 = vmatmul.bf16.vlgmr.msrb.gmra.mxu2 %v11057_v56  ;;  %v10035_v18 = vld [vmem:[#allocation6 + $0x70c] sm:$0xf]  ;;  %v7351_v21 = vor.u32 %v9971_v13, %v7348_v14  ;;  %v11100_v62 = vadd.f32 %v2653_v53, %v2640_v47  ;;  %v6906_v47 = vld [vmem:[#allocation6 + $0x190] sm:$0xf] }
 0x10d   :  { %2938 = vmatpush.bf16.msra.mxu3 %v7703_v49  ;;  %2952 = vmatpush.bf16.msra.mxu2 %v7959_v50  ;;  %v7604_v19 = vld [vmem:[#allocation6 + $0x728] sm:$0xf0]  ;;  %v7162_v53 = vld [vmem:[#allocation6 + $0x390] sm:$0xf] }
 0x10e   :  { %2967 = vmatpush.bf16.msra.mxu0 %v8183_v7  ;;  %v10099_v23 = vld [vmem:[#allocation6 + $0x90c] sm:$0xf]  ;;  %v7607_v30 = vor.u32 %v10035_v18, %v7604_v19 }
 0x10f   :  { %2926 = vmatpush.bf16.msrb.mxu1 %v7383_v8  ;;  %v7860_v24 = vld [vmem:[#allocation6 + $0x928] sm:$0xf0] }
 0x110   :  { %v10163_v25 = vld [vmem:[#allocation6 + $0xb0c] sm:$0xf]  ;;  %v7863_v31 = vor.u32 %v10099_v23, %v7860_v24 }
 0x111   :  { %2939 = vmatpush.bf16.msra.mxu3 %v7671_v2  ;;  %2953 = vmatpush.bf16.msra.mxu2 %v7927_v3  ;;  %v8116_v27 = vld [vmem:[#allocation6 + $0xb28] sm:$0xf0] }
 0x112   :  { %v9963_v28 = vld [vmem:[#allocation6 + $0x4cc] sm:$0xf]  ;;  %2968 = vmatpush.bf16.msra.mxu0 %v8151_v20  ;;  %v8119_v35 = vor.u32 %v10163_v25, %v8116_v27 }
 0x113   :  { %v7316_v29 = vld [vmem:[#allocation6 + $0x4e8] sm:$0xf0]  ;;  %2927 = vmatpush.bf16.msrb.mxu1 %v7351_v21 }
 0x114   :  { %v10027_v32 = vld [vmem:[#allocation6 + $0x6cc] sm:$0xf]  ;;  %v7319_v36 = vor.u32 %v9963_v28, %v7316_v29 }
 0x115   :  { %2940 = vmatpush.bf16.msra.mxu3 %v7639_v16  ;;  %2954 = vmatpush.bf16.msra.mxu2 %v7895_v17  ;;  %v7572_v33 = vld [vmem:[#allocation6 + $0x6e8] sm:$0xf0]  ;;  %v11102_v17 = vpop.f32.mrf.mxu2 }
 0x116   :  { %v10091_v37 = vld [vmem:[#allocation6 + $0x8cc] sm:$0xf]  ;;  %v7575_v48 = vor.u32 %v10027_v32, %v7572_v33  ;;  %2969 = vmatpush.bf16.msra.mxu0 %v8119_v35  ;;  %v9872_v32 = vld [vmem:[#allocation6 + $0x1ec] sm:$0xf0] }
 0x117   :  { %v7828_v39 = vld [vmem:[#allocation6 + $0x8e8] sm:$0xf0]  ;;  %2928 = vmatpush.bf16.msrb.mxu1 %v7319_v36  ;;  %v7194_v33 = vld [vmem:[#allocation6 + $0x3d0] sm:$0xf] }
 0x118   :  { %v10155_v40 = vld [vmem:[#allocation6 + $0xacc] sm:$0xf]  ;;  %v7831_v49 = vor.u32 %v10091_v37, %v7828_v39  ;;  %v7450_v35 = vld [vmem:[#allocation6 + $0x5d0] sm:$0xf]  ;;  %v7195_v46 = vor.u32 %v9936_v34, %v7194_v33 }
 0x119   :  { %v8084_v42 = vld [vmem:[#allocation6 + $0xae8] sm:$0xf0]  ;;  %2941 = vmatpush.bf16.msra.mxu3 %v7607_v30  ;;  %2955 = vmatpush.bf16.msra.mxu2 %v7863_v31  ;;  %v6938_v31 = vld [vmem:[#allocation6 + $0x1d0] sm:$0xf] }
 0x11a   :  { %v9955_v44 = vld [vmem:[#allocation6 + $0x48c] sm:$0xf]  ;;  %v8087_v54 = vor.u32 %v10155_v40, %v8084_v42  ;;  %v10000_v37 = vld [vmem:[#allocation6 + $0x5ec] sm:$0xf0] }
 0x11b   :  { %v7284_v45 = vld [vmem:[#allocation6 + $0x4a8] sm:$0xf0]  ;;  %v7706_v39 = vld [vmem:[#allocation6 + $0x7d0] sm:$0xf] }
 0x11c   :  { %v10019_v50 = vld [vmem:[#allocation6 + $0x68c] sm:$0xf]  ;;  %v7287_v57 = vor.u32 %v9955_v44, %v7284_v45  ;;  %2970 = vmatpush.bf16.msra.mxu0 %v8087_v54  ;;  %v10064_v40 = vld [vmem:[#allocation6 + $0x7ec] sm:$0xf0]  ;;  %v11104_v44 = vpop.f32.mrf.mxu0  ;;  %v6939_v45 = vor.u32 %v9872_v32, %v6938_v31 }
 0x11d   :  { %v7540_v52 = vld [vmem:[#allocation6 + $0x6a8] sm:$0xf0]  ;;  %2942 = vmatpush.bf16.msra.mxu3 %v7575_v48  ;;  %2956 = vmatpush.bf16.msra.mxu2 %v7831_v49  ;;  %v9864_v48 = vld [vmem:[#allocation6 + $0x1ac] sm:$0xf0]  ;;  %v11106_v49 = vpop.f32.mrf.mxu1 }
 0x11e   :  { %v10083_v58 = vld [vmem:[#allocation6 + $0x88c] sm:$0xf]  ;;  %v7543_v3 = vor.u32 %v10019_v50, %v7540_v52  ;;  %2929 = vmatpush.bf16.msrb.mxu1 %v7287_v57  ;;  %v7451_v50 = vor.u32 %v10000_v37, %v7450_v35  ;;  %v7707_v52 = vor.u32 %v10064_v40, %v7706_v39  ;;  %v9928_v54 = vld [vmem:[#allocation6 + $0x3ac] sm:$0xf0] }
 0x11f   :  { %v7796_v59 = vld [vmem:[#allocation6 + $0x8a8] sm:$0xf0]  ;;  %v7418_v57 = vld [vmem:[#allocation6 + $0x590] sm:$0xf] }
 0x120   :  { %v10147_v60 = vld [vmem:[#allocation6 + $0xa8c] sm:$0xf]  ;;  %v7799_v4 = vor.u32 %v10083_v58, %v7796_v59  ;;  %v2695_v58 = vpop.f32.mrf.mxu2  ;;  %v9992_v59 = vld [vmem:[#allocation6 + $0x5ac] sm:$0xf0] }
 0x121   :  { %v8052_v63 = vld [vmem:[#allocation6 + $0xaa8] sm:$0xf0]  ;;  %2943 = vmatpush.bf16.msra.mxu3 %v7543_v3  ;;  %v6874_v3 = vld [vmem:[#allocation6 + $0x150] sm:$0xf] }
 0x122   :  { %v9947_v0 = vld [vmem:[#allocation6 + $0x44c] sm:$0xf]  ;;  %v8055_v7 = vor.u32 %v10147_v60, %v8052_v63  ;;  %2957 = vmatpush.bf16.msra.mxu2 %v7799_v4  ;;  %v7674_v60 = vld [vmem:[#allocation6 + $0x790] sm:$0xf] }
 0x123   :  { %v7252_v2 = vld [vmem:[#allocation6 + $0x468] sm:$0xf0]  ;;  %v10056_v63 = vld [vmem:[#allocation6 + $0x7ac] sm:$0xf0] }
 0x124   :  { %v10011_v5 = vld [vmem:[#allocation6 + $0x64c] sm:$0xf]  ;;  %v7255_v8 = vor.u32 %v9947_v0, %v7252_v2  ;;  %2971 = vmatpush.bf16.msra.mxu0 %v8055_v7  ;;  %v6907_v0 = vor.u32 %v9864_v48, %v6906_v47  ;;  %v7163_v2 = vor.u32 %v9928_v54, %v7162_v53  ;;  %v9856_v4 = vld [vmem:[#allocation6 + $0x16c] sm:$0xf0] }
 0x125   :  { %v7508_v6 = vld [vmem:[#allocation6 + $0x668] sm:$0xf0]  ;;  %v7130_v7 = vld [vmem:[#allocation6 + $0x350] sm:$0xf] }
 0x126   :  { %v10075_v10 = vld [vmem:[#allocation6 + $0x84c] sm:$0xf]  ;;  %v7511_v20 = vor.u32 %v10011_v5, %v7508_v6  ;;  %2930 = vmatpush.bf16.msrb.mxu1 %v7255_v8  ;;  %v7419_v5 = vor.u32 %v9992_v59, %v7418_v57  ;;  %v7675_v6 = vor.u32 %v10056_v63, %v7674_v60  ;;  %v9920_v8 = vld [vmem:[#allocation6 + $0x36c] sm:$0xf0] }
 0x127   :  { %v7764_v11 = vld [vmem:[#allocation6 + $0x868] sm:$0xf0]  ;;  %v7610_v31 = vld [vmem:[#allocation6 + $0x710] sm:$0xf] }
 0x128   :  { %v10139_v12 = vld [vmem:[#allocation6 + $0xa4c] sm:$0xf]  ;;  %v7767_v21 = vor.u32 %v10075_v10, %v7764_v11  ;;  %2944 = vmatpush.bf16.msra.mxu3 %v7511_v20  ;;  %v7386_v10 = vld [vmem:[#allocation6 + $0x550] sm:$0xf] }
 0x129   :  { %v8020_v13 = vld [vmem:[#allocation6 + $0xa68] sm:$0xf0]  ;;  %v9984_v11 = vld [vmem:[#allocation6 + $0x56c] sm:$0xf0] }
 0x12a   :  { %v9939_v14 = vld [vmem:[#allocation6 + $0x40c] sm:$0xf]  ;;  %v8023_v24 = vor.u32 %v10139_v12, %v8020_v13  ;;  %2958 = vmatpush.bf16.msra.mxu2 %v7767_v21  ;;  %v7642_v12 = vld [vmem:[#allocation6 + $0x750] sm:$0xf] }
 0x12b   :  { %v7220_v16 = vld [vmem:[#allocation6 + $0x428] sm:$0xf0]  ;;  %v10048_v13 = vld [vmem:[#allocation6 + $0x76c] sm:$0xf0] }
 0x12c   :  { %v10195_v18 = vld [vmem:[#allocation6 + $0xc0c] sm:$0xf]  ;;  %v7223_v25 = vor.u32 %v9939_v14, %v7220_v16  ;;  %2972 = vmatpush.bf16.msra.mxu0 %v8023_v24  ;;  %v11112_v14 = vpop.f32.mrf.mxu3  ;;  %v2667_v16 = vpop.f32.mrf.mxu0  ;;  %v6842_v20 = vld [vmem:[#allocation6 + $0x110] sm:$0xf]  ;;  %v7643_v24 = vor.u32 %v10048_v13, %v7642_v12 }
 0x12d   :  { %v8244_v19 = vld [vmem:[#allocation6 + $0xc28] sm:$0xf0]  ;;  %v9848_v21 = vld [vmem:[#allocation6 + $0x12c] sm:$0xf0] }
 0x12e   :  { %v10003_v22 = vld [vmem:[#allocation6 + $0x60c] sm:$0xf]  ;;  %v8247_v30 = vor.u32 %v10195_v18, %v8244_v19  ;;  %2931 = vmatpush.bf16.msrb.mxu1 %v7223_v25  ;;  %v6875_v18 = vor.u32 %v9856_v4, %v6874_v3  ;;  %v7131_v19 = vor.u32 %v9920_v8, %v7130_v7  ;;  %v2681_v25 = vpop.f32.mrf.mxu1  ;;  %v10040_v32 = vld [vmem:[#allocation6 + $0x72c] sm:$0xf0]  ;;  %v6843_v34 = vor.u32 %v9848_v21, %v6842_v20 }
 0x12f   :  { %v7476_v23 = vld [vmem:[#allocation6 + $0x628] sm:$0xf0]  ;;  %v9840_v37 = vld [vmem:[#allocation6 + $0xec] sm:$0xf0] }
 0x130   :  { %v10067_v26 = vld [vmem:[#allocation6 + $0x80c] sm:$0xf]  ;;  %v7479_v36 = vor.u32 %v10003_v22, %v7476_v23  ;;  %v2668_v22 = vadd.f32 %v2667_v16, %v11100_v62  ;;  %v7387_v23 = vor.u32 %v9984_v11, %v7386_v10  ;;  %v7066_v39 = vld [vmem:[#allocation6 + $0x2d0] sm:$0xf] }
 0x131   :  { %v7732_v27 = vld [vmem:[#allocation6 + $0x828] sm:$0xf0]  ;;  %2932 = vmatmul.bf16.vlgmr.msrb.gmra.mxu1 %v11055_v55  ;;  %v9968_v47 = vld [vmem:[#allocation6 + $0x4ec] sm:$0xf0] }
 0x132   :  { %v10131_v28 = vld [vmem:[#allocation6 + $0xa0c] sm:$0xf]  ;;  %v7735_v41 = vor.u32 %v10067_v26, %v7732_v27  ;;  %2987 = vmatpush.bf16.msra.mxu1 %v8247_v30  ;;  %2945 = vmatpush.bf16.msra.mxu3 %v7479_v36  ;;  %v7098_v26 = vld [vmem:[#allocation6 + $0x310] sm:$0xf]  ;;  %v2682_v33 = vadd.f32 %v2681_v25, %v2668_v22 }
 0x133   :  { %v7988_v29 = vld [vmem:[#allocation6 + $0xa28] sm:$0xf0]  ;;  %v9912_v27 = vld [vmem:[#allocation6 + $0x32c] sm:$0xf0] }
 0x134   :  { %v7991_v42 = vor.u32 %v10131_v28, %v7988_v29  ;;  %2959 = vmatpush.bf16.msra.mxu2 %v7735_v41  ;;  %v7354_v28 = vld [vmem:[#allocation6 + $0x510] sm:$0xf]  ;;  %v11115_v29 = vpop.f32.mrf.mxu2  ;;  %v7099_v35 = vor.u32 %v9912_v27, %v7098_v26  ;;  %v11117_v62 = vadd.f32 %v2695_v58, %v2682_v33  ;;  %v7611_v41 = vor.u32 %v10040_v32, %v7610_v31  ;;  %v2709_v59 = vpop.f32.mrf.mxu3 }
 0x135   :  { %2946 = vmatmul.bf16.vlgmr.msra.gmra.mxu3 %v11059_v61  ;;  %v9976_v30 = vld [vmem:[#allocation6 + $0x52c] sm:$0xf0] }
 0x136   :  { %2973 = vmatpush.bf16.msra.mxu0 %v7991_v42  ;;  %2994 = vmatpush.bf16.msrb.mxu3 %v6939_v45  ;;  %v6810_v36 = vld [vmem:[#allocation6 + $0xd0] sm:$0xf]  ;;  %v7355_v40 = vor.u32 %v9976_v30, %v7354_v28 }
 0x137   :  { %3008 = vmatpush.bf16.msrb.mxu1 %v7195_v46  ;;  %2960 = vmatmul.bf16.vlgmr.msra.gmra.mxu2 %v11071_v38  ;;  %v9904_v42 = vld [vmem:[#allocation6 + $0x2ec] sm:$0xf0]  ;;  %v11523_v46 = vperm.slane %v11092_v1, 1 }
 0x138   :  { %3022 = vmatpush.bf16.msrb.mxu2 %v7451_v50  ;;  %v7322_v45 = vld [vmem:[#allocation6 + $0x4d0] sm:$0xf]  ;;  %v7067_v53 = vor.u32 %v9904_v42, %v7066_v39 }
 0x139   :  { %2974 = vmatmul.bf16.vlgmr.msra.gmra.mxu0 %v11073_v43  ;;  %v7578_v48 = vld [vmem:[#allocation6 + $0x6d0] sm:$0xf]  ;;  %v7323_v58 = vor.u32 %v9968_v47, %v7322_v45  ;;  %v2710_v3 = vadd.f32 %v2709_v59, %v11523_v46 }
 0x13a   :  { %3036 = vmatpush.bf16.msrb.mxu0 %v7707_v52  ;;  %2995 = vmatpush.bf16.msrb.mxu3 %v6907_v0  ;;  %v10032_v50 = vld [vmem:[#allocation6 + $0x6ec] sm:$0xf0]  ;;  %v6811_v52 = vor.u32 %v9840_v37, %v6810_v36 }
 0x13b   :  { %3009 = vmatpush.bf16.msrb.mxu1 %v7163_v2  ;;  %v6778_v54 = vld [vmem:[#allocation6 + $0x90] sm:$0xf]  ;;  %v7579_v60 = vor.u32 %v10032_v50, %v7578_v48  ;;  %v9868_v48 = vld [vmem:[#allocation6 + $0x1d4] sm:$0xf] }
 0x13c   :  { %3023 = vmatpush.bf16.msrb.mxu2 %v7419_v5  ;;  %v9832_v57 = vld [vmem:[#allocation6 + $0xac] sm:$0xf0]  ;;  %v2723_v7 = vpop.f32.mrf.mxu2  ;;  %v6940_v50 = vld [vmem:[#allocation6 + $0x1f0] sm:$0xf0] }
 0x13d   :  { %v7034_v63 = vld [vmem:[#allocation6 + $0x290] sm:$0xf]  ;;  %v11124_v8 = vadd.f32 %v2723_v7, %v2710_v3  ;;  %v6779_v10 = vor.u32 %v9832_v57, %v6778_v54  ;;  %v11126_v57 = vpop.f32.mrf.mxu0 }
 0x13e   :  { %3037 = vmatpush.bf16.msrb.mxu0 %v7675_v6  ;;  %2996 = vmatpush.bf16.msrb.mxu3 %v6875_v18  ;;  %v9896_v0 = vld [vmem:[#allocation6 + $0x2ac] sm:$0xf0] }
 0x13f   :  { %3010 = vmatpush.bf16.msrb.mxu1 %v7131_v19  ;;  %v7290_v2 = vld [vmem:[#allocation6 + $0x490] sm:$0xf]  ;;  %v7035_v11 = vor.u32 %v9896_v0, %v7034_v63  ;;  %v9932_v63 = vld [vmem:[#allocation6 + $0x3d4] sm:$0xf] }
 0x140   :  { %3024 = vmatpush.bf16.msrb.mxu2 %v7387_v23  ;;  %v9960_v4 = vld [vmem:[#allocation6 + $0x4ac] sm:$0xf0]  ;;  %v7196_v0 = vld [vmem:[#allocation6 + $0x3f0] sm:$0xf0] }
 0x141   :  { %8267 = vmatmul.msk.bf16.vlgmr.msra.gmra.mxu1 %vm2598_vm0, %v11067_v51  ;;  %v7546_v5 = vld [vmem:[#allocation6 + $0x690] sm:$0xf]  ;;  %v7291_v16 = vor.u32 %v9960_v4, %v7290_v2  ;;  %v6943_v2 = vor.u32 %v9868_v48, %v6940_v50  ;;  %v9844_v48 = vld [vmem:[#allocation6 + $0x114] sm:$0xf] }
 0x142   :  { %3038 = vmatpush.bf16.msrb.mxu0 %v7643_v24  ;;  %2997 = vmatpush.bf16.msrb.mxu3 %v6843_v34  ;;  %v10024_v6 = vld [vmem:[#allocation6 + $0x6ac] sm:$0xf0]  ;;  %v6844_v50 = vld [vmem:[#allocation6 + $0x130] sm:$0xf0] }
 0x143   :  { %3011 = vmatpush.bf16.msrb.mxu1 %v7099_v35  ;;  %v6746_v12 = vld [vmem:[#allocation6 + $0x50] sm:$0xf]  ;;  %v7547_v18 = vor.u32 %v10024_v6, %v7546_v5  ;;  %v11128_v6 = vpop.f32.mrf.mxu1 }
 0x144   :  { %3025 = vmatpush.bf16.msrb.mxu2 %v7355_v40  ;;  %v9824_v13 = vld [vmem:[#allocation6 + $0x6c] sm:$0xf0] }
 0x145   :  { %v7002_v19 = vld [vmem:[#allocation6 + $0x250] sm:$0xf]  ;;  %v6747_v25 = vor.u32 %v9824_v13, %v6746_v12  ;;  %v7199_v13 = vor.u32 %v9932_v63, %v7196_v0 }
 0x146   :  { %3039 = vmatpush.bf16.msrb.mxu0 %v7611_v41  ;;  %2998 = vmatpush.bf16.msrb.mxu3 %v6811_v52  ;;  %v9888_v20 = vld [vmem:[#allocation6 + $0x26c] sm:$0xf0] }
 0x147   :  { %3012 = vmatpush.bf16.msrb.mxu1 %v7067_v53  ;;  %v7258_v21 = vld [vmem:[#allocation6 + $0x450] sm:$0xf]  ;;  %v7003_v26 = vor.u32 %v9888_v20, %v7002_v19  ;;  %v7164_v19 = vld [vmem:[#allocation6 + $0x3b0] sm:$0xf0] }
 0x148   :  { %3026 = vmatpush.bf16.msrb.mxu2 %v7323_v58  ;;  %v9952_v22 = vld [vmem:[#allocation6 + $0x46c] sm:$0xf0] }
 0x149   :  { %v7514_v23 = vld [vmem:[#allocation6 + $0x650] sm:$0xf]  ;;  %v7259_v31 = vor.u32 %v9952_v22, %v7258_v21 }
 0x14a   :  { %3040 = vmatpush.bf16.msrb.mxu0 %v7579_v60  ;;  %v10016_v24 = vld [vmem:[#allocation6 + $0x66c] sm:$0xf0]  ;;  %2999 = vmatpush.bf16.msrb.mxu3 %v6779_v10  ;;  %v9860_v10 = vld [vmem:[#allocation6 + $0x194] sm:$0xf] }
 0x14b   :  { %3013 = vmatpush.bf16.msrb.mxu1 %v7035_v11  ;;  %v6714_v27 = vld [vmem:[#allocation6 + $0x10] sm:$0xf]  ;;  %v7515_v32 = vor.u32 %v10016_v24, %v7514_v23  ;;  %v6908_v11 = vld [vmem:[#allocation6 + $0x1b0] sm:$0xf0] }
 0x14c   :  { %v9816_v28 = vld [vmem:[#allocation6 + $0x2c] sm:$0xf0]  ;;  %3027 = vmatpush.bf16.msrb.mxu2 %v7291_v16  ;;  %v6911_v21 = vor.u32 %v9860_v10, %v6908_v11 }
 0x14d   :  { %v6970_v30 = vld [vmem:[#allocation6 + $0x210] sm:$0xf]  ;;  %v6715_v45 = vor.u32 %v9816_v28, %v6714_v27  ;;  %v6876_v27 = vld [vmem:[#allocation6 + $0x170] sm:$0xf0]  ;;  %v11133_v28 = vpop.f32.mrf.mxu3 }
 0x14e   :  { %3041 = vmatpush.bf16.msrb.mxu0 %v7547_v18  ;;  %v9880_v33 = vld [vmem:[#allocation6 + $0x22c] sm:$0xf0]  ;;  %3000 = vmatpush.bf16.msrb.mxu3 %v6747_v25  ;;  %v9924_v18 = vld [vmem:[#allocation6 + $0x394] sm:$0xf] }
 0x14f   :  { %v7226_v34 = vld [vmem:[#allocation6 + $0x410] sm:$0xf]  ;;  %3014 = vmatpush.bf16.msrb.mxu1 %v7003_v26  ;;  %v6971_v47 = vor.u32 %v9880_v33, %v6970_v30  ;;  %v9852_v26 = vld [vmem:[#allocation6 + $0x154] sm:$0xf]  ;;  %v7167_v30 = vor.u32 %v9924_v18, %v7164_v19 }
 0x150   :  { %v9944_v35 = vld [vmem:[#allocation6 + $0x42c] sm:$0xf0]  ;;  %3028 = vmatpush.bf16.msrb.mxu2 %v7259_v31  ;;  %v2737_v31 = vpop.f32.mrf.mxu0  ;;  %v9916_v33 = vld [vmem:[#allocation6 + $0x354] sm:$0xf] }
 0x151   :  { %v7482_v36 = vld [vmem:[#allocation6 + $0x610] sm:$0xf]  ;;  %v7227_v52 = vor.u32 %v9944_v35, %v7226_v34  ;;  %v7132_v34 = vld [vmem:[#allocation6 + $0x370] sm:$0xf0]  ;;  %v2738_v35 = vadd.f32 %v2737_v31, %v11124_v8 }
 0x152   :  { %v10008_v37 = vld [vmem:[#allocation6 + $0x62c] sm:$0xf0]  ;;  %3042 = vmatpush.bf16.msrb.mxu0 %v7515_v32  ;;  %3001 = vmatpush.bf16.msrb.mxu3 %v6715_v45  ;;  %v2751_v45 = vpop.f32.mrf.mxu1 }
 0x153   :  { %v7962_v39 = vld [vmem:[#allocation6 + $0x9d0] sm:$0xf]  ;;  %v7483_v53 = vor.u32 %v10008_v37, %v7482_v36  ;;  %3015 = vmatpush.bf16.msrb.mxu1 %v6971_v47  ;;  %v6879_v37 = vor.u32 %v9852_v26, %v6876_v27  ;;  %v6780_v26 = vld [vmem:[#allocation6 + $0xb0] sm:$0xf0] }
 0x154   :  { %v10128_v40 = vld [vmem:[#allocation6 + $0x9ec] sm:$0xf0]  ;;  %3029 = vmatpush.bf16.msrb.mxu2 %v7227_v52  ;;  %v2752_v52 = vadd.f32 %v2751_v45, %v2738_v35  ;;  %v6748_v45 = vld [vmem:[#allocation6 + $0x70] sm:$0xf0] }
 0x155   :  { %v8218_v41 = vld [vmem:[#allocation6 + $0xbd0] sm:$0xf]  ;;  %v7963_v59 = vor.u32 %v10128_v40, %v7962_v39  ;;  %3002 = vmatmul.bf16.vlgmr.msrb.gmra.mxu3 %v11057_v56 }
 0x156   :  { %v10192_v42 = vld [vmem:[#allocation6 + $0xbec] sm:$0xf0]  ;;  %3043 = vmatpush.bf16.msrb.mxu0 %v7483_v53  ;;  %3016 = vmatmul.bf16.vlgmr.msrb.gmra.mxu1 %v11063_v9  ;;  %v7135_v53 = vor.u32 %v9916_v33, %v7132_v34  ;;  %v7036_v33 = vld [vmem:[#allocation6 + $0x2b0] sm:$0xf0] }
 0x157   :  { %v8250_v54 = vld [vmem:[#allocation6 + $0xc10] sm:$0xf]  ;;  %v8219_v58 = vor.u32 %v10192_v42, %v8218_v41  ;;  %3050 = vmatpush.bf16.msra.mxu3 %v7963_v59  ;;  %3030 = vmatmul.bf16.vlgmr.msrb.gmra.mxu2 %v11055_v55  ;;  %v11137_v42 = vpop.f32.mrf.mxu2  ;;  %v9908_v59 = vld [vmem:[#allocation6 + $0x314] sm:$0xf] }
 0x158   :  { %v10200_v60 = vld [vmem:[#allocation6 + $0xc2c] sm:$0xf0] }
 0x159   :  { %v7930_v3 = vld [vmem:[#allocation6 + $0x990] sm:$0xf]  ;;  %v8251_v12 = vor.u32 %v10200_v60, %v8250_v54  ;;  %3064 = vmatpush.bf16.msra.mxu1 %v8219_v58  ;;  %3044 = vmatmul.bf16.vlgmr.msrb.gmra.mxu0 %v11059_v61  ;;  %v7100_v58 = vld [vmem:[#allocation6 + $0x330] sm:$0xf0]  ;;  %v6847_v60 = vor.u32 %v9844_v48, %v6844_v50 }
 0x15a   :  { %v10120_v4 = vld [vmem:[#allocation6 + $0x9ac] sm:$0xf0]  ;;  %3092 = vmatpush.bf16.msra.mxu0 %v6943_v2  ;;  %v7103_v11 = vor.u32 %v9908_v59, %v7100_v58 }
 0x15b   :  { %v8186_v5 = vld [vmem:[#allocation6 + $0xb90] sm:$0xf]  ;;  %v7931_v16 = vor.u32 %v10120_v4, %v7930_v3  ;;  %3085 = vmatpush.bf16.msra.mxu2 %v8251_v12  ;;  %v9836_v4 = vld [vmem:[#allocation6 + $0xd4] sm:$0xf] }
 0x15c   :  { %v10184_v7 = vld [vmem:[#allocation6 + $0xbac] sm:$0xf0] }
 0x15d   :  { %v8187_v20 = vor.u32 %v10184_v7, %v8186_v5  ;;  %v7898_v22 = vld [vmem:[#allocation6 + $0x950] sm:$0xf]  ;;  %3051 = vmatpush.bf16.msra.mxu3 %v7931_v16  ;;  %v6812_v5 = vld [vmem:[#allocation6 + $0xf0] sm:$0xf0]  ;;  %v2765_v7 = vpop.f32.mrf.mxu3 }
 0x15e   :  { %v10112_v23 = vld [vmem:[#allocation6 + $0x96c] sm:$0xf0]  ;;  %3093 = vmatpush.bf16.msra.mxu0 %v6911_v21  ;;  %v2766_v10 = vadd.f32 %v2765_v7, %v2752_v52  ;;  %v7068_v16 = vld [vmem:[#allocation6 + $0x2f0] sm:$0xf0]  ;;  %v6815_v19 = vor.u32 %v9836_v4, %v6812_v5 }
 0x15f   :  { %v8154_v24 = vld [vmem:[#allocation6 + $0xb50] sm:$0xf]  ;;  %3106 = vmatpush.bf16.msrb.mxu2 %v7199_v13  ;;  %v7899_v32 = vor.u32 %v10112_v23, %v7898_v22  ;;  %3065 = vmatpush.bf16.msra.mxu1 %v8187_v20  ;;  %v9900_v13 = vld [vmem:[#allocation6 + $0x2d4] sm:$0xf]  ;;  %v2779_v23 = vpop.f32.mrf.mxu2 }
 0x160   :  { %v10176_v25 = vld [vmem:[#allocation6 + $0xb6c] sm:$0xf0]  ;;  %v11139_v27 = vadd.f32 %v2779_v23, %v2766_v10  ;;  %v9884_v52 = vld [vmem:[#allocation6 + $0x254] sm:$0xf] }
 0x161   :  { %v8155_v36 = vor.u32 %v10176_v25, %v8154_v24  ;;  %v7866_v39 = vld [vmem:[#allocation6 + $0x910] sm:$0xf]  ;;  %3052 = vmatpush.bf16.msra.mxu3 %v7899_v32  ;;  %v9828_v25 = vld [vmem:[#allocation6 + $0x94] sm:$0xf] }
 0x162   :  { %v10104_v40 = vld [vmem:[#allocation6 + $0x92c] sm:$0xf0]  ;;  %3094 = vmatpush.bf16.msra.mxu0 %v6879_v37  ;;  %v9892_v32 = vld [vmem:[#allocation6 + $0x294] sm:$0xf]  ;;  %v6783_v35 = vor.u32 %v9828_v25, %v6780_v26 }
 0x163   :  { %v8122_v41 = vld [vmem:[#allocation6 + $0xb10] sm:$0xf]  ;;  %3107 = vmatpush.bf16.msrb.mxu2 %v7167_v30  ;;  %v7867_v54 = vor.u32 %v10104_v40, %v7866_v39  ;;  %3066 = vmatpush.bf16.msra.mxu1 %v8155_v36  ;;  %v7071_v30 = vor.u32 %v9900_v13, %v7068_v16  ;;  %v7039_v48 = vor.u32 %v9892_v32, %v7036_v33  ;;  %v7452_v4 = vld [vmem:[#allocation6 + $0x5f0] sm:$0xf0] }
 0x164   :  { %v10168_v47 = vld [vmem:[#allocation6 + $0xb2c] sm:$0xf0]  ;;  %v10060_v5 = vld [vmem:[#allocation6 + $0x7d4] sm:$0xf] }
 0x165   :  { %v8123_v8 = vor.u32 %v10168_v47, %v8122_v41  ;;  %v7834_v63 = vld [vmem:[#allocation6 + $0x8d0] sm:$0xf]  ;;  %3053 = vmatpush.bf16.msra.mxu3 %v7867_v54  ;;  %v9820_v41 = vld [vmem:[#allocation6 + $0x54] sm:$0xf]  ;;  %v11143_v47 = vpop.f32.mrf.mxu3 }
 0x166   :  { %v10096_v0 = vld [vmem:[#allocation6 + $0x8ec] sm:$0xf0]  ;;  %3095 = vmatpush.bf16.msra.mxu0 %v6847_v60  ;;  %v6751_v58 = vor.u32 %v9820_v41, %v6748_v45  ;;  %v7708_v7 = vld [vmem:[#allocation6 + $0x7f0] sm:$0xf0] }
 0x167   :  { %v8090_v2 = vld [vmem:[#allocation6 + $0xad0] sm:$0xf]  ;;  %3108 = vmatpush.bf16.msrb.mxu2 %v7135_v53  ;;  %v7835_v12 = vor.u32 %v10096_v0, %v7834_v63  ;;  %3067 = vmatpush.bf16.msra.mxu1 %v8123_v8  ;;  %v7004_v53 = vld [vmem:[#allocation6 + $0x270] sm:$0xf0] }
 0x168   :  { %v10160_v3 = vld [vmem:[#allocation6 + $0xaec] sm:$0xf0]  ;;  %8268 = vmatmul.msk.bf16.vlgmr.msra.gmra.mxu2 %vm2598_vm0, %v11067_v51  ;;  %v9812_v0 = vld [vmem:[#allocation6 + $0x14] sm:$0xf]  ;;  %v7007_v10 = vor.u32 %v9884_v52, %v7004_v53 }
 0x169   :  { %v8091_v18 = vor.u32 %v10160_v3, %v8090_v2  ;;  %v7802_v20 = vld [vmem:[#allocation6 + $0x890] sm:$0xf]  ;;  %3054 = vmatpush.bf16.msra.mxu3 %v7835_v12  ;;  %v6716_v2 = vld [vmem:[#allocation6 + $0x30] sm:$0xf0] }
 0x16a   :  { %v10088_v21 = vld [vmem:[#allocation6 + $0x8ac] sm:$0xf0]  ;;  %3096 = vmatpush.bf16.msra.mxu0 %v6815_v19  ;;  %v9996_v3 = vld [vmem:[#allocation6 + $0x5d4] sm:$0xf] }
 0x16b   :  { %v8058_v22 = vld [vmem:[#allocation6 + $0xa90] sm:$0xf]  ;;  %3109 = vmatpush.bf16.msrb.mxu2 %v7103_v11  ;;  %v7803_v31 = vor.u32 %v10088_v21, %v7802_v20  ;;  %3068 = vmatpush.bf16.msra.mxu1 %v8091_v18  ;;  %v10124_v12 = vld [vmem:[#allocation6 + $0x9d4] sm:$0xf]  ;;  %v6719_v18 = vor.u32 %v9812_v0, %v6716_v2  ;;  %v7455_v21 = vor.u32 %v9996_v3, %v7452_v4 }
 0x16c   :  { %v10152_v24 = vld [vmem:[#allocation6 + $0xaac] sm:$0xf0]  ;;  %v7964_v13 = vld [vmem:[#allocation6 + $0x9f0] sm:$0xf0] }
 0x16d   :  { %v8059_v34 = vor.u32 %v10152_v24, %v8058_v22  ;;  %v7770_v36 = vld [vmem:[#allocation6 + $0x850] sm:$0xf]  ;;  %3055 = vmatpush.bf16.msra.mxu3 %v7803_v31  ;;  %v9876_v19 = vld [vmem:[#allocation6 + $0x214] sm:$0xf]  ;;  %v7711_v22 = vor.u32 %v10060_v5, %v7708_v7  ;;  %v7967_v26 = vor.u32 %v10124_v12, %v7964_v13 }
 0x16e   :  { %v10080_v37 = vld [vmem:[#allocation6 + $0x86c] sm:$0xf0]  ;;  %3097 = vmatpush.bf16.msra.mxu0 %v6783_v35  ;;  %v6972_v20 = vld [vmem:[#allocation6 + $0x230] sm:$0xf0] }
 0x16f   :  { %v8026_v39 = vld [vmem:[#allocation6 + $0xa50] sm:$0xf]  ;;  %3110 = vmatpush.bf16.msrb.mxu2 %v7071_v30  ;;  %v7771_v50 = vor.u32 %v10080_v37, %v7770_v36  ;;  %3069 = vmatpush.bf16.msra.mxu1 %v8059_v34  ;;  %v10188_v23 = vld [vmem:[#allocation6 + $0xbd4] sm:$0xf]  ;;  %v2793_v30 = vpop.f32.mrf.mxu3  ;;  %v6975_v35 = vor.u32 %v9876_v19, %v6972_v20 }
 0x170   :  { %v10144_v40 = vld [vmem:[#allocation6 + $0xa6c] sm:$0xf0]  ;;  %v8220_v24 = vld [vmem:[#allocation6 + $0xbf0] sm:$0xf0]  ;;  %v11146_v34 = vadd.f32 %v2793_v30, %v11139_v27 }
 0x171   :  { %v7738_v54 = vld [vmem:[#allocation6 + $0x810] sm:$0xf]  ;;  %v8027_v59 = vor.u32 %v10144_v40, %v8026_v39  ;;  %3056 = vmatpush.bf16.msra.mxu3 %v7771_v50  ;;  %v9988_v25 = vld [vmem:[#allocation6 + $0x594] sm:$0xf]  ;;  %v8223_v39 = vor.u32 %v10188_v23, %v8220_v24 }
 0x172   :  { %v10072_v8 = vld [vmem:[#allocation6 + $0x82c] sm:$0xf0]  ;;  %3098 = vmatpush.bf16.msra.mxu0 %v6751_v58  ;;  %v7420_v31 = vld [vmem:[#allocation6 + $0x5b0] sm:$0xf0]  ;;  %11528 = vst [vmem:[#allocation30_spill] sm:$0xff] %v11146_v34 }
 0x173   :  { %v7994_v60 = vld [vmem:[#allocation6 + $0xa10] sm:$0xf]  ;;  %3111 = vmatpush.bf16.msrb.mxu2 %v7039_v48  ;;  %v7739_v11 = vor.u32 %v10072_v8, %v7738_v54  ;;  %3070 = vmatpush.bf16.msra.mxu1 %v8027_v59  ;;  %v10052_v32 = vld [vmem:[#allocation6 + $0x794] sm:$0xf]  ;;  %v7423_v40 = vor.u32 %v9988_v25, %v7420_v31  ;;  %v7268_v34 = vld [vmem:[#allocation6 + $0x478] sm:$0xf0] }
 0x174   :  { %v10136_v63 = vld [vmem:[#allocation6 + $0xa2c] sm:$0xf0]  ;;  %v7676_v33 = vld [vmem:[#allocation6 + $0x7b0] sm:$0xf0] }
 0x175   :  { %v7995_v16 = vor.u32 %v10136_v63, %v7994_v60  ;;  %3057 = vmatpush.bf16.msra.mxu3 %v7739_v11  ;;  %v10116_v36 = vld [vmem:[#allocation6 + $0x994] sm:$0xf]  ;;  %v7679_v41 = vor.u32 %v10052_v32, %v7676_v33 }
 0x176   :  { %v7932_v37 = vld [vmem:[#allocation6 + $0x9b0] sm:$0xf0]  ;;  %3099 = vmatpush.bf16.msra.mxu0 %v6719_v18 }
 0x177   :  { %3112 = vmatpush.bf16.msrb.mxu2 %v7007_v10  ;;  %3071 = vmatpush.bf16.msra.mxu1 %v7995_v16  ;;  %v10180_v45 = vld [vmem:[#allocation6 + $0xb94] sm:$0xf]  ;;  %v7935_v52 = vor.u32 %v10116_v36, %v7932_v37 }
 0x178   :  { %v8188_v48 = vld [vmem:[#allocation6 + $0xbb0] sm:$0xf0]  ;;  %3058 = vmatmul.bf16.vlgmr.msra.gmra.mxu3 %v11071_v38 }
 0x179   :  { %3120 = vmatpush.bf16.msrb.mxu3 %v7455_v21  ;;  %v9980_v50 = vld [vmem:[#allocation6 + $0x554] sm:$0xf]  ;;  %v8191_v8 = vor.u32 %v10180_v45, %v8188_v48  ;;  %3100 = vmatmul.bf16.vlgmr.msra.gmra.mxu0 %v11057_v56 }
 0x17a   :  { %3148 = vmatpush.bf16.msrb.mxu0 %v7967_v26  ;;  %v7388_v53 = vld [vmem:[#allocation6 + $0x570] sm:$0xf0]  ;;  %3072 = vmatmul.bf16.vlgmr.msra.gmra.mxu1 %v11073_v43 }
 0x17b   :  { %3134 = vmatpush.bf16.msrb.mxu1 %v7711_v22  ;;  %v10044_v27 = vld [vmem:[#allocation6 + $0x754] sm:$0xf]  ;;  %3113 = vmatpush.bf16.msrb.mxu2 %v6975_v35  ;;  %v7391_v60 = vor.u32 %v9980_v50, %v7388_v53 }
 0x17c   :  { %v7644_v54 = vld [vmem:[#allocation6 + $0x770] sm:$0xf0] }
 0x17d   :  { %v10108_v59 = vld [vmem:[#allocation6 + $0x954] sm:$0xf]  ;;  %3121 = vmatpush.bf16.msrb.mxu3 %v7423_v40  ;;  %v7647_v63 = vor.u32 %v10044_v27, %v7644_v54 }
 0x17e   :  { %v7900_v58 = vld [vmem:[#allocation6 + $0x970] sm:$0xf0]  ;;  %3149 = vmatpush.bf16.msrb.mxu0 %v7935_v52  ;;  %3114 = vmatmul.bf16.vlgmr.msrb.gmra.mxu2 %v11063_v9 }
 0x17f   :  { %3162 = vmatpush.bf16.msra.mxu2 %v8223_v39  ;;  %3135 = vmatpush.bf16.msrb.mxu1 %v7679_v41  ;;  %v10172_v0 = vld [vmem:[#allocation6 + $0xb54] sm:$0xf]  ;;  %v7903_v4 = vor.u32 %v10108_v59, %v7900_v58 }
 0x180   :  { %v8156_v2 = vld [vmem:[#allocation6 + $0xb70] sm:$0xf0] }
 0x181   :  { %v9972_v3 = vld [vmem:[#allocation6 + $0x514] sm:$0xf]  ;;  %v8159_v13 = vor.u32 %v10172_v0, %v8156_v2  ;;  %3122 = vmatpush.bf16.msrb.mxu3 %v7391_v60 }
 0x182   :  { %v7356_v5 = vld [vmem:[#allocation6 + $0x530] sm:$0xf0]  ;;  %3150 = vmatpush.bf16.msrb.mxu0 %v7903_v4 }
 0x183   :  { %v10036_v7 = vld [vmem:[#allocation6 + $0x714] sm:$0xf]  ;;  %3163 = vmatpush.bf16.msra.mxu2 %v8191_v8  ;;  %3136 = vmatpush.bf16.msrb.mxu1 %v7647_v63  ;;  %v7359_v16 = vor.u32 %v9972_v3, %v7356_v5 }
 0x184   :  { %v7612_v10 = vld [vmem:[#allocation6 + $0x730] sm:$0xf0] }
 0x185   :  { %v10100_v11 = vld [vmem:[#allocation6 + $0x914] sm:$0xf]  ;;  %v7615_v18 = vor.u32 %v10036_v7, %v7612_v10  ;;  %3123 = vmatpush.bf16.msrb.mxu3 %v7359_v16 }
 0x186   :  { %v7868_v12 = vld [vmem:[#allocation6 + $0x930] sm:$0xf0] }
 0x187   :  { %v10164_v19 = vld [vmem:[#allocation6 + $0xb14] sm:$0xf]  ;;  %v7871_v22 = vor.u32 %v10100_v11, %v7868_v12  ;;  %3164 = vmatpush.bf16.msra.mxu2 %v8159_v13  ;;  %3137 = vmatpush.bf16.msrb.mxu1 %v7615_v18 }
 0x188   :  { %v8124_v20 = vld [vmem:[#allocation6 + $0xb30] sm:$0xf0] }
 0x189   :  { %v9964_v21 = vld [vmem:[#allocation6 + $0x4d4] sm:$0xf]  ;;  %v8127_v31 = vor.u32 %v10164_v19, %v8124_v20  ;;  %3151 = vmatpush.bf16.msrb.mxu0 %v7871_v22  ;;  %v6946_v22 = vld [vmem:[#allocation6 + $0x1d8] sm:$0xf] }
 0x18a   :  { %v7324_v23 = vld [vmem:[#allocation6 + $0x4f0] sm:$0xf0] }
 0x18b   :  { %v10028_v24 = vld [vmem:[#allocation6 + $0x6d4] sm:$0xf]  ;;  %v7327_v32 = vor.u32 %v9964_v21, %v7324_v23  ;;  %3165 = vmatpush.bf16.msra.mxu2 %v8127_v31  ;;  %v9873_v23 = vld [vmem:[#allocation6 + $0x1f4] sm:$0xf0] }
 0x18c   :  { %v7580_v25 = vld [vmem:[#allocation6 + $0x6f0] sm:$0xf0] }
 0x18d   :  { %v10092_v26 = vld [vmem:[#allocation6 + $0x8d4] sm:$0xf]  ;;  %v7583_v33 = vor.u32 %v10028_v24, %v7580_v25  ;;  %3124 = vmatpush.bf16.msrb.mxu3 %v7327_v32  ;;  %v7458_v24 = vld [vmem:[#allocation6 + $0x5d8] sm:$0xf] }
 0x18e   :  { %v7836_v30 = vld [vmem:[#allocation6 + $0x8f0] sm:$0xf0] }
 0x18f   :  { %v10156_v35 = vld [vmem:[#allocation6 + $0xad4] sm:$0xf]  ;;  %v7839_v39 = vor.u32 %v10092_v26, %v7836_v30  ;;  %3138 = vmatpush.bf16.msrb.mxu1 %v7583_v33  ;;  %v10001_v26 = vld [vmem:[#allocation6 + $0x5f4] sm:$0xf0] }
 0x190   :  { %v8092_v36 = vld [vmem:[#allocation6 + $0xaf0] sm:$0xf0] }
 0x191   :  { %v9956_v37 = vld [vmem:[#allocation6 + $0x494] sm:$0xf]  ;;  %v8095_v52 = vor.u32 %v10156_v35, %v8092_v36  ;;  %3152 = vmatpush.bf16.msrb.mxu0 %v7839_v39 }
 0x192   :  { %v7292_v40 = vld [vmem:[#allocation6 + $0x4b0] sm:$0xf0] }
 0x193   :  { %v10020_v41 = vld [vmem:[#allocation6 + $0x694] sm:$0xf]  ;;  %v7295_v53 = vor.u32 %v9956_v37, %v7292_v40  ;;  %3166 = vmatpush.bf16.msra.mxu2 %v8095_v52  ;;  %v7202_v37 = vld [vmem:[#allocation6 + $0x3d8] sm:$0xf]  ;;  %v6947_v40 = vor.u32 %v9873_v23, %v6946_v22 }
 0x194   :  { %v7548_v45 = vld [vmem:[#allocation6 + $0x6b0] sm:$0xf0]  ;;  %v10049_v22 = vld [vmem:[#allocation6 + $0x774] sm:$0xf0] }
 0x195   :  { %v10084_v48 = vld [vmem:[#allocation6 + $0x894] sm:$0xf]  ;;  %v7551_v27 = vor.u32 %v10020_v41, %v7548_v45  ;;  %3125 = vmatpush.bf16.msrb.mxu3 %v7295_v53  ;;  %v9937_v41 = vld [vmem:[#allocation6 + $0x3f4] sm:$0xf0] }
 0x196   :  { %v7804_v50 = vld [vmem:[#allocation6 + $0x8b0] sm:$0xf0]  ;;  %v7714_v45 = vld [vmem:[#allocation6 + $0x7d8] sm:$0xf] }
 0x197   :  { %v10148_v54 = vld [vmem:[#allocation6 + $0xa94] sm:$0xf]  ;;  %v7807_v8 = vor.u32 %v10084_v48, %v7804_v50  ;;  %3139 = vmatpush.bf16.msrb.mxu1 %v7551_v27  ;;  %v10065_v48 = vld [vmem:[#allocation6 + $0x7f4] sm:$0xf0]  ;;  %v7459_v50 = vor.u32 %v10001_v26, %v7458_v24 }
 0x198   :  { %v8060_v59 = vld [vmem:[#allocation6 + $0xab0] sm:$0xf0]  ;;  %v6914_v53 = vld [vmem:[#allocation6 + $0x198] sm:$0xf] }
 0x199   :  { %v9948_v58 = vld [vmem:[#allocation6 + $0x454] sm:$0xf]  ;;  %v8063_v4 = vor.u32 %v10148_v54, %v8060_v59  ;;  %3153 = vmatpush.bf16.msrb.mxu0 %v7807_v8  ;;  %v9865_v27 = vld [vmem:[#allocation6 + $0x1b4] sm:$0xf0]  ;;  %v7203_v8 = vor.u32 %v9937_v41, %v7202_v37 }
 0x19a   :  { %v7260_v60 = vld [vmem:[#allocation6 + $0x470] sm:$0xf0]  ;;  %v7426_v59 = vld [vmem:[#allocation6 + $0x598] sm:$0xf] }
 0x19b   :  { %v10012_v63 = vld [vmem:[#allocation6 + $0x654] sm:$0xf]  ;;  %v7263_v10 = vor.u32 %v9948_v58, %v7260_v60  ;;  %3167 = vmatpush.bf16.msra.mxu2 %v8063_v4  ;;  %v9993_v58 = vld [vmem:[#allocation6 + $0x5b4] sm:$0xf0]  ;;  %v7715_v60 = vor.u32 %v10065_v48, %v7714_v45 }
 0x19c   :  { %v7516_v0 = vld [vmem:[#allocation6 + $0x670] sm:$0xf0]  ;;  %v10057_v4 = vld [vmem:[#allocation6 + $0x7b4] sm:$0xf0] }
 0x19d   :  { %v10076_v2 = vld [vmem:[#allocation6 + $0x854] sm:$0xf]  ;;  %v7519_v11 = vor.u32 %v10012_v63, %v7516_v0  ;;  %3126 = vmatpush.bf16.msrb.mxu3 %v7263_v10  ;;  %v7170_v63 = vld [vmem:[#allocation6 + $0x398] sm:$0xf]  ;;  %v6915_v0 = vor.u32 %v9865_v27, %v6914_v53 }
 0x19e   :  { %v7772_v3 = vld [vmem:[#allocation6 + $0x870] sm:$0xf0]  ;;  %v9857_v10 = vld [vmem:[#allocation6 + $0x174] sm:$0xf0] }
 0x19f   :  { %v10140_v5 = vld [vmem:[#allocation6 + $0xa54] sm:$0xf]  ;;  %v7775_v18 = vor.u32 %v10076_v2, %v7772_v3  ;;  %3140 = vmatpush.bf16.msrb.mxu1 %v7519_v11  ;;  %v9929_v2 = vld [vmem:[#allocation6 + $0x3b4] sm:$0xf0] }
 0x1a0   :  { %v8028_v7 = vld [vmem:[#allocation6 + $0xa70] sm:$0xf0]  ;;  %v7682_v3 = vld [vmem:[#allocation6 + $0x798] sm:$0xf] }
 0x1a1   :  { %v9940_v12 = vld [vmem:[#allocation6 + $0x414] sm:$0xf]  ;;  %v8031_v25 = vor.u32 %v10140_v5, %v8028_v7  ;;  %3154 = vmatpush.bf16.msrb.mxu0 %v7775_v18  ;;  %v7427_v5 = vor.u32 %v9993_v58, %v7426_v59  ;;  %v6882_v7 = vld [vmem:[#allocation6 + $0x158] sm:$0xf] }
 0x1a2   :  { %v7228_v13 = vld [vmem:[#allocation6 + $0x430] sm:$0xf0]  ;;  %v7394_v11 = vld [vmem:[#allocation6 + $0x558] sm:$0xf] }
 0x1a3   :  { %v10004_v16 = vld [vmem:[#allocation6 + $0x614] sm:$0xf]  ;;  %v7231_v32 = vor.u32 %v9940_v12, %v7228_v13  ;;  %3168 = vmatpush.bf16.msra.mxu2 %v8031_v25  ;;  %v9985_v12 = vld [vmem:[#allocation6 + $0x574] sm:$0xf0]  ;;  %v7171_v13 = vor.u32 %v9929_v2, %v7170_v63 }
 0x1a4   :  { %v7484_v19 = vld [vmem:[#allocation6 + $0x630] sm:$0xf0]  ;;  %v7138_v18 = vld [vmem:[#allocation6 + $0x358] sm:$0xf]  ;;  %v7395_v23 = vor.u32 %v9985_v12, %v7394_v11 }
 0x1a5   :  { %v10068_v20 = vld [vmem:[#allocation6 + $0x814] sm:$0xf]  ;;  %v7487_v33 = vor.u32 %v10004_v16, %v7484_v19  ;;  %3127 = vmatpush.bf16.msrb.mxu3 %v7231_v32  ;;  %v7683_v16 = vor.u32 %v10057_v4, %v7682_v3  ;;  %v6883_v19 = vor.u32 %v9857_v10, %v6882_v7  ;;  %v6850_v24 = vld [vmem:[#allocation6 + $0x118] sm:$0xf] }
 0x1a6   :  { %v7740_v21 = vld [vmem:[#allocation6 + $0x830] sm:$0xf0]  ;;  %v9849_v25 = vld [vmem:[#allocation6 + $0x134] sm:$0xf0] }
 0x1a7   :  { %v10196_v30 = vld [vmem:[#allocation6 + $0xc14] sm:$0xf]  ;;  %v7743_v39 = vor.u32 %v10068_v20, %v7740_v21  ;;  %3141 = vmatpush.bf16.msrb.mxu1 %v7487_v33  ;;  %v9921_v20 = vld [vmem:[#allocation6 + $0x374] sm:$0xf0] }
 0x1a8   :  { %v8252_v31 = vld [vmem:[#allocation6 + $0xc30] sm:$0xf0]  ;;  %3128 = vmatmul.bf16.vlgmr.msrb.gmra.mxu3 %v11055_v55  ;;  %v7650_v21 = vld [vmem:[#allocation6 + $0x758] sm:$0xf] }
 0x1a9   :  { %v10132_v35 = vld [vmem:[#allocation6 + $0xa14] sm:$0xf]  ;;  %v8255_v52 = vor.u32 %v10196_v30, %v8252_v31  ;;  %3155 = vmatpush.bf16.msrb.mxu0 %v7743_v39  ;;  %v7362_v26 = vld [vmem:[#allocation6 + $0x518] sm:$0xf]  ;;  %v7139_v31 = vor.u32 %v9921_v20, %v7138_v18  ;;  %v7651_v32 = vor.u32 %v10049_v22, %v7650_v21 }
 0x1aa   :  { %v7996_v36 = vld [vmem:[#allocation6 + $0xa30] sm:$0xf0]  ;;  %3142 = vmatmul.bf16.vlgmr.msrb.gmra.mxu1 %v11059_v61  ;;  %v9977_v30 = vld [vmem:[#allocation6 + $0x534] sm:$0xf0] }
 0x1ab   :  { %v7999_v54 = vor.u32 %v10132_v35, %v7996_v36  ;;  %3190 = vmatpush.bf16.msra.mxu1 %v6947_v40  ;;  %3183 = vmatpush.bf16.msra.mxu3 %v8255_v52  ;;  %v7106_v33 = vld [vmem:[#allocation6 + $0x318] sm:$0xf]  ;;  %v6851_v35 = vor.u32 %v9849_v25, %v6850_v24  ;;  %v7363_v40 = vor.u32 %v9977_v30, %v7362_v26 }
 0x1ac   :  { %3156 = vmatmul.bf16.vlgmr.msrb.gmra.mxu0 %v11071_v38  ;;  %v9913_v36 = vld [vmem:[#allocation6 + $0x334] sm:$0xf0] }
 0x1ad   :  { %3218 = vmatpush.bf16.msra.mxu0 %v7459_v50  ;;  %3169 = vmatpush.bf16.msra.mxu2 %v7999_v54  ;;  %v7618_v37 = vld [vmem:[#allocation6 + $0x718] sm:$0xf]  ;;  %v7107_v52 = vor.u32 %v9913_v36, %v7106_v33 }
 0x1ae   :  { %v10041_v39 = vld [vmem:[#allocation6 + $0x734] sm:$0xf0] }
 0x1af   :  { %3204 = vmatpush.bf16.msrb.mxu3 %v7203_v8  ;;  %3191 = vmatpush.bf16.msra.mxu1 %v6915_v0  ;;  %v6818_v41 = vld [vmem:[#allocation6 + $0xd8] sm:$0xf]  ;;  %v7619_v53 = vor.u32 %v10041_v39, %v7618_v37 }
 0x1b0   :  { %3170 = vmatmul.bf16.vlgmr.msra.gmra.mxu2 %v11073_v43  ;;  %v9841_v45 = vld [vmem:[#allocation6 + $0xf4] sm:$0xf0] }
 0x1b1   :  { %3232 = vmatpush.bf16.msrb.mxu2 %v7715_v60  ;;  %3219 = vmatpush.bf16.msra.mxu0 %v7427_v5  ;;  %v7330_v48 = vld [vmem:[#allocation6 + $0x4d8] sm:$0xf]  ;;  %v6819_v54 = vor.u32 %v9841_v45, %v6818_v41 }
 0x1b2   :  { %v9969_v50 = vld [vmem:[#allocation6 + $0x4f4] sm:$0xf0] }
 0x1b3   :  { %3205 = vmatpush.bf16.msrb.mxu3 %v7171_v13  ;;  %3192 = vmatpush.bf16.msra.mxu1 %v6883_v19  ;;  %v7074_v27 = vld [vmem:[#allocation6 + $0x2d8] sm:$0xf]  ;;  %v7331_v60 = vor.u32 %v9969_v50, %v7330_v48  ;;  %v11162_v48 = vpop.f32.mrf.mxu2 }
 0x1b4   :  { %v9905_v59 = vld [vmem:[#allocation6 + $0x2f4] sm:$0xf0] }
 0x1b5   :  { %3233 = vmatpush.bf16.msrb.mxu2 %v7683_v16  ;;  %3220 = vmatpush.bf16.msra.mxu0 %v7395_v23  ;;  %v7586_v58 = vld [vmem:[#allocation6 + $0x6d8] sm:$0xf]  ;;  %v7075_v4 = vor.u32 %v9905_v59, %v7074_v27  ;;  %v11156_v16 = vpop.f32.mrf.mxu1  ;;  %v11160_v23 = vpop.f32.mrf.mxu0 }
 0x1b6   :  { %v10033_v8 = vld [vmem:[#allocation6 + $0x6f4] sm:$0xf0] }
 0x1b7   :  { %3206 = vmatpush.bf16.msrb.mxu3 %v7139_v31  ;;  %3193 = vmatpush.bf16.msra.mxu1 %v6851_v35  ;;  %v6786_v63 = vld [vmem:[#allocation6 + $0x98] sm:$0xf]  ;;  %v7587_v5 = vor.u32 %v10033_v8, %v7586_v58 }
 0x1b8   :  { %v9833_v0 = vld [vmem:[#allocation6 + $0xb4] sm:$0xf0]  ;;  %8269 = vmatmul.msk.bf16.vlgmr.msra.gmra.mxu3 %vm2598_vm0, %v11067_v51 }
 0x1b9   :  { %3234 = vmatpush.bf16.msrb.mxu2 %v7651_v32  ;;  %3221 = vmatpush.bf16.msra.mxu0 %v7363_v40  ;;  %v7298_v2 = vld [vmem:[#allocation6 + $0x498] sm:$0xf]  ;;  %v6787_v10 = vor.u32 %v9833_v0, %v6786_v63 }
 0x1ba   :  { %v9961_v3 = vld [vmem:[#allocation6 + $0x4b4] sm:$0xf0] }
 0x1bb   :  { %3207 = vmatpush.bf16.msrb.mxu3 %v7107_v52  ;;  %v7042_v7 = vld [vmem:[#allocation6 + $0x298] sm:$0xf]  ;;  %3194 = vmatpush.bf16.msra.mxu1 %v6819_v54  ;;  %v7299_v18 = vor.u32 %v9961_v3, %v7298_v2 }
 0x1bc   :  { %v9897_v11 = vld [vmem:[#allocation6 + $0x2b4] sm:$0xf0] }
 0x1bd   :  { %3235 = vmatpush.bf16.msrb.mxu2 %v7619_v53  ;;  %v7554_v12 = vld [vmem:[#allocation6 + $0x698] sm:$0xf]  ;;  %3222 = vmatpush.bf16.msra.mxu0 %v7331_v60  ;;  %v7043_v24 = vor.u32 %v9897_v11, %v7042_v7  ;;  %v11164_v63 = vpop.f32.mrf.mxu1  ;;  %v9933_v11 = vld [vmem:[#allocation6 + $0x3dc] sm:$0xf] }
 0x1be   :  { %v10025_v13 = vld [vmem:[#allocation6 + $0x6b4] sm:$0xf0] }
 0x1bf   :  { %v6754_v19 = vld [vmem:[#allocation6 + $0x58] sm:$0xf]  ;;  %3208 = vmatpush.bf16.msrb.mxu3 %v7075_v4  ;;  %v7555_v25 = vor.u32 %v10025_v13, %v7554_v12  ;;  %3195 = vmatpush.bf16.msra.mxu1 %v6787_v10  ;;  %v6948_v10 = vld [vmem:[#allocation6 + $0x1f8] sm:$0xf0]  ;;  %v11166_v13 = vpop.f32.mrf.mxu0 }
 0x1c0   :  { %v9825_v20 = vld [vmem:[#allocation6 + $0x74] sm:$0xf0]  ;;  %v7204_v12 = vld [vmem:[#allocation6 + $0x3f8] sm:$0xf0] }
 0x1c1   :  { %v7266_v21 = vld [vmem:[#allocation6 + $0x458] sm:$0xf]  ;;  %3236 = vmatpush.bf16.msrb.mxu2 %v7587_v5  ;;  %v6755_v30 = vor.u32 %v9825_v20, %v6754_v19  ;;  %3223 = vmatpush.bf16.msra.mxu0 %v7299_v18  ;;  %v9869_v5 = vld [vmem:[#allocation6 + $0x1dc] sm:$0xf] }
 0x1c2   :  { %v9953_v22 = vld [vmem:[#allocation6 + $0x474] sm:$0xf0] }
 0x1c3   :  { %v7010_v26 = vld [vmem:[#allocation6 + $0x258] sm:$0xf]  ;;  %v7267_v35 = vor.u32 %v9953_v22, %v7266_v21  ;;  %3209 = vmatpush.bf16.msrb.mxu3 %v7043_v24  ;;  %3196 = vmatpush.bf16.msra.mxu1 %v6755_v30  ;;  %v6951_v24 = vor.u32 %v9869_v5, %v6948_v10 }
 0x1c4   :  { %v9889_v31 = vld [vmem:[#allocation6 + $0x274] sm:$0xf0] }
 0x1c5   :  { %v7522_v32 = vld [vmem:[#allocation6 + $0x658] sm:$0xf]  ;;  %3237 = vmatpush.bf16.msrb.mxu2 %v7555_v25  ;;  %v7011_v50 = vor.u32 %v9889_v31, %v7010_v26  ;;  %3224 = vmatpush.bf16.msra.mxu0 %v7267_v35  ;;  %v7207_v25 = vor.u32 %v9933_v11, %v7204_v12  ;;  %v9861_v31 = vld [vmem:[#allocation6 + $0x19c] sm:$0xf] }
 0x1c6   :  { %v10017_v33 = vld [vmem:[#allocation6 + $0x674] sm:$0xf0]  ;;  %v9925_v35 = vld [vmem:[#allocation6 + $0x39c] sm:$0xf] }
 0x1c7   :  { %v6722_v36 = vld [vmem:[#allocation6 + $0x18] sm:$0xf]  ;;  %v7523_v52 = vor.u32 %v10017_v33, %v7522_v32  ;;  %3210 = vmatpush.bf16.msrb.mxu3 %v7011_v50  ;;  %v6916_v33 = vld [vmem:[#allocation6 + $0x1b8] sm:$0xf0]  ;;  %v11178_v5 = vpop.f32.mrf.mxu0 }
 0x1c8   :  { %v9817_v37 = vld [vmem:[#allocation6 + $0x34] sm:$0xf0]  ;;  %v6919_v50 = vor.u32 %v9861_v31, %v6916_v33 }
 0x1c9   :  { %v7234_v39 = vld [vmem:[#allocation6 + $0x418] sm:$0xf]  ;;  %v6723_v59 = vor.u32 %v9817_v37, %v6722_v36  ;;  %3238 = vmatpush.bf16.msrb.mxu2 %v7523_v52  ;;  %v7172_v36 = vld [vmem:[#allocation6 + $0x3b8] sm:$0xf0]  ;;  %v11168_v37 = vpop.f32.mrf.mxu2 }
 0x1ca   :  { %v9945_v40 = vld [vmem:[#allocation6 + $0x434] sm:$0xf0]  ;;  %11529 = vst [vmem:[#allocation31_spill] sm:$0xff] %v11168_v37  ;;  %v7175_v52 = vor.u32 %v9925_v35, %v7172_v36  ;;  %v9837_v36 = vld [vmem:[#allocation6 + $0xdc] sm:$0xf] }
 0x1cb   :  { %v7970_v41 = vld [vmem:[#allocation6 + $0x9d8] sm:$0xf]  ;;  %v7235_v0 = vor.u32 %v9945_v40, %v7234_v39  ;;  %3197 = vmatpush.bf16.msra.mxu1 %v6723_v59 }
 0x1cc   :  { %v10129_v45 = vld [vmem:[#allocation6 + $0x9f4] sm:$0xf0] }
 0x1cd   :  { %v6978_v53 = vld [vmem:[#allocation6 + $0x218] sm:$0xf]  ;;  %v7971_v2 = vor.u32 %v10129_v45, %v7970_v41  ;;  %3225 = vmatpush.bf16.msra.mxu0 %v7235_v0  ;;  %v11171_v45 = vpop.f32.mrf.mxu3  ;;  %v11174_v0 = vpop.f32.mrf.mxu1 }
 0x1ce   :  { %v8258_v27 = vld [vmem:[#allocation6 + $0xc18] sm:$0xf]  ;;  %11530 = vst [vmem:[#allocation32_spill] sm:$0xff] %v11171_v45  ;;  %3198 = vmatmul.bf16.vlgmr.msra.gmra.mxu1 %v11057_v56  ;;  %v8514_v45 = vld [vmem:[#allocation9 + $0x1e0] sm:$0xf] }
 0x1cf   :  { %v10201_v54 = vld [vmem:[#allocation6 + $0xc34] sm:$0xf0]  ;;  %3246 = vmatpush.bf16.msrb.mxu1 %v7971_v2 }
 0x1d0   :  { %v9881_v58 = vld [vmem:[#allocation6 + $0x234] sm:$0xf0]  ;;  %v8259_v7 = vor.u32 %v10201_v54, %v8258_v27  ;;  %3226 = vmatmul.bf16.vlgmr.msra.gmra.mxu0 %v11055_v55  ;;  %v9853_v54 = vld [vmem:[#allocation6 + $0x15c] sm:$0xf] }
 0x1d1   :  { %v7490_v8 = vld [vmem:[#allocation6 + $0x618] sm:$0xf]  ;;  %v6979_v18 = vor.u32 %v9881_v58, %v6978_v53  ;;  %v6884_v58 = vld [vmem:[#allocation6 + $0x178] sm:$0xf0] }
 0x1d2   :  { %v10009_v60 = vld [vmem:[#allocation6 + $0x634] sm:$0xf0]  ;;  %3281 = vmatpush.bf16.msrb.mxu0 %v8259_v7  ;;  %v6887_v7 = vor.u32 %v9853_v54, %v6884_v58  ;;  %v11186_v58 = vpop.f32.mrf.mxu0 }
 0x1d3   :  { %v8226_v3 = vld [vmem:[#allocation6 + $0xbd8] sm:$0xf]  ;;  %v7491_v19 = vor.u32 %v10009_v60, %v7490_v8  ;;  %3211 = vmatpush.bf16.msrb.mxu3 %v6979_v18  ;;  %v9917_v8 = vld [vmem:[#allocation6 + $0x35c] sm:$0xf]  ;;  %11532 = vst [vmem:[#allocation34_spill] sm:$0xff] %v11186_v58 }
 0x1d4   :  { %v10193_v4 = vld [vmem:[#allocation6 + $0xbf4] sm:$0xf0]  ;;  %v7140_v60 = vld [vmem:[#allocation6 + $0x378] sm:$0xf0] }
 0x1d5   :  { %v7938_v20 = vld [vmem:[#allocation6 + $0x998] sm:$0xf]  ;;  %v8227_v22 = vor.u32 %v10193_v4, %v8226_v3  ;;  %3239 = vmatpush.bf16.msrb.mxu2 %v7491_v19  ;;  %v7143_v10 = vor.u32 %v9917_v8, %v7140_v60  ;;  %v9845_v18 = vld [vmem:[#allocation6 + $0x11c] sm:$0xf] }
 0x1d6   :  { %v10121_v21 = vld [vmem:[#allocation6 + $0x9b4] sm:$0xf0]  ;;  %3302 = vmatpush.bf16.msra.mxu0 %v7207_v25  ;;  %3212 = vmatmul.bf16.vlgmr.msrb.gmra.mxu3 %v11063_v9  ;;  %v7684_v58 = vld [vmem:[#allocation6 + $0x7b8] sm:$0xf0] }
 0x1d7   :  { %v8194_v26 = vld [vmem:[#allocation6 + $0xb98] sm:$0xf]  ;;  %v7939_v32 = vor.u32 %v10121_v21, %v7938_v20  ;;  %3260 = vmatpush.bf16.msra.mxu3 %v8227_v22  ;;  %v6852_v20 = vld [vmem:[#allocation6 + $0x138] sm:$0xf0] }
 0x1d8   :  { %v10185_v30 = vld [vmem:[#allocation6 + $0xbb4] sm:$0xf0]  ;;  %3240 = vmatmul.bf16.vlgmr.msrb.gmra.mxu2 %v11059_v61  ;;  %v9909_v21 = vld [vmem:[#allocation6 + $0x31c] sm:$0xf]  ;;  %v6855_v31 = vor.u32 %v9845_v18, %v6852_v20 }
 0x1d9   :  { %v7906_v39 = vld [vmem:[#allocation6 + $0x958] sm:$0xf]  ;;  %v8195_v41 = vor.u32 %v10185_v30, %v8194_v26  ;;  %3288 = vmatpush.bf16.msra.mxu2 %v6951_v24  ;;  %3247 = vmatpush.bf16.msrb.mxu1 %v7939_v32  ;;  %v7108_v22 = vld [vmem:[#allocation6 + $0x338] sm:$0xf0]  ;;  %v11180_v30 = vpop.f32.mrf.mxu2 }
 0x1da   :  { %v10113_v40 = vld [vmem:[#allocation6 + $0x974] sm:$0xf0]  ;;  %3303 = vmatpush.bf16.msra.mxu0 %v7175_v52  ;;  %v7111_v32 = vor.u32 %v9909_v21, %v7108_v22  ;;  %v11182_v52 = vpop.f32.mrf.mxu3 }
 0x1db   :  { %v8162_v53 = vld [vmem:[#allocation6 + $0xb58] sm:$0xf]  ;;  %v7907_v59 = vor.u32 %v10113_v40, %v7906_v39  ;;  %3261 = vmatpush.bf16.msra.mxu3 %v8195_v41  ;;  %v6820_v40 = vld [vmem:[#allocation6 + $0xf8] sm:$0xf0] }
 0x1dc   :  { %v10177_v27 = vld [vmem:[#allocation6 + $0xb74] sm:$0xf0]  ;;  %v9901_v41 = vld [vmem:[#allocation6 + $0x2dc] sm:$0xf]  ;;  %v6823_v8 = vor.u32 %v9837_v36, %v6820_v40 }
 0x1dd   :  { %v7874_v2 = vld [vmem:[#allocation6 + $0x918] sm:$0xf]  ;;  %v8163_v4 = vor.u32 %v10177_v27, %v8162_v53  ;;  %3289 = vmatpush.bf16.msra.mxu2 %v6919_v50  ;;  %3248 = vmatpush.bf16.msrb.mxu1 %v7907_v59  ;;  %v7076_v50 = vld [vmem:[#allocation6 + $0x2f8] sm:$0xf0]  ;;  %v11184_v53 = vpop.f32.mrf.mxu1 }
 0x1de   :  { %v10105_v3 = vld [vmem:[#allocation6 + $0x934] sm:$0xf0]  ;;  %3304 = vmatpush.bf16.msra.mxu0 %v7143_v10  ;;  %11531 = vst [vmem:[#allocation33_spill] sm:$0xff] %v11184_v53  ;;  %v7079_v60 = vor.u32 %v9901_v41, %v7076_v50  ;;  %v6788_v10 = vld [vmem:[#allocation6 + $0xb8] sm:$0xf0] }
 0x1df   :  { %v8130_v11 = vld [vmem:[#allocation6 + $0xb18] sm:$0xf]  ;;  %v7875_v19 = vor.u32 %v10105_v3, %v7874_v2  ;;  %3262 = vmatpush.bf16.msra.mxu3 %v8163_v4  ;;  %v9829_v4 = vld [vmem:[#allocation6 + $0x9c] sm:$0xf] }
 0x1e0   :  { %v10169_v12 = vld [vmem:[#allocation6 + $0xb34] sm:$0xf0]  ;;  %8270 = vmatmul.msk.bf16.vlgmr.msrb.gmra.mxu0 %vm2598_vm0, %v11067_v51  ;;  %v6791_v22 = vor.u32 %v9829_v4, %v6788_v10  ;;  %v7012_v36 = vld [vmem:[#allocation6 + $0x278] sm:$0xf0] }
 0x1e1   :  { %v7842_v24 = vld [vmem:[#allocation6 + $0x8d8] sm:$0xf]  ;;  %v8131_v26 = vor.u32 %v10169_v12, %v8130_v11  ;;  %3290 = vmatpush.bf16.msra.mxu2 %v6887_v7  ;;  %3249 = vmatpush.bf16.msrb.mxu1 %v7875_v19  ;;  %v9893_v11 = vld [vmem:[#allocation6 + $0x29c] sm:$0xf]  ;;  %v11190_v21 = vpop.f32.mrf.mxu2 }
 0x1e2   :  { %v10097_v25 = vld [vmem:[#allocation6 + $0x8f4] sm:$0xf0]  ;;  %3305 = vmatpush.bf16.msra.mxu0 %v7111_v32  ;;  %v7044_v12 = vld [vmem:[#allocation6 + $0x2b8] sm:$0xf0] }
 0x1e3   :  { %v8098_v33 = vld [vmem:[#allocation6 + $0xad8] sm:$0xf]  ;;  %v7843_v39 = vor.u32 %v10097_v25, %v7842_v24  ;;  %3263 = vmatpush.bf16.msra.mxu3 %v8131_v26  ;;  %v7047_v24 = vor.u32 %v9893_v11, %v7044_v12  ;;  %v9997_v50 = vld [vmem:[#allocation6 + $0x5dc] sm:$0xf] }
 0x1e4   :  { %v10161_v35 = vld [vmem:[#allocation6 + $0xaf4] sm:$0xf0]  ;;  %v9813_v4 = vld [vmem:[#allocation6 + $0x1c] sm:$0xf] }
 0x1e5   :  { %v7810_v27 = vld [vmem:[#allocation6 + $0x898] sm:$0xf]  ;;  %v8099_v59 = vor.u32 %v10161_v35, %v8098_v33  ;;  %3291 = vmatpush.bf16.msra.mxu2 %v6855_v31  ;;  %3250 = vmatpush.bf16.msrb.mxu1 %v7843_v39  ;;  %v9821_v31 = vld [vmem:[#allocation6 + $0x5c] sm:$0xf] }
 0x1e6   :  { %v10089_v54 = vld [vmem:[#allocation6 + $0x8b4] sm:$0xf0]  ;;  %3306 = vmatpush.bf16.msra.mxu0 %v7079_v60  ;;  %v6756_v33 = vld [vmem:[#allocation6 + $0x78] sm:$0xf0] }
 0x1e7   :  { %v8066_v2 = vld [vmem:[#allocation6 + $0xa98] sm:$0xf]  ;;  %v7811_v7 = vor.u32 %v10089_v54, %v7810_v27  ;;  %3264 = vmatpush.bf16.msra.mxu3 %v8099_v59  ;;  %v9885_v35 = vld [vmem:[#allocation6 + $0x25c] sm:$0xf]  ;;  %v11192_v54 = vpop.f32.mrf.mxu3  ;;  %v11194_v59 = vpop.f32.mrf.mxu1 }
 0x1e8   :  { %v10153_v3 = vld [vmem:[#allocation6 + $0xab4] sm:$0xf0]  ;;  %v7460_v27 = vld [vmem:[#allocation6 + $0x5f8] sm:$0xf0]  ;;  %v7015_v60 = vor.u32 %v9885_v35, %v7012_v36 }
 0x1e9   :  { %v7778_v18 = vld [vmem:[#allocation6 + $0x858] sm:$0xf]  ;;  %v8067_v20 = vor.u32 %v10153_v3, %v8066_v2  ;;  %3292 = vmatpush.bf16.msra.mxu2 %v6823_v8  ;;  %3251 = vmatpush.bf16.msrb.mxu1 %v7811_v7  ;;  %v6759_v8 = vor.u32 %v9821_v31, %v6756_v33  ;;  %v6724_v10 = vld [vmem:[#allocation6 + $0x38] sm:$0xf0] }
 0x1ea   :  { %v10081_v19 = vld [vmem:[#allocation6 + $0x874] sm:$0xf0]  ;;  %3307 = vmatpush.bf16.msra.mxu0 %v7047_v24  ;;  %v9877_v11 = vld [vmem:[#allocation6 + $0x21c] sm:$0xf]  ;;  %v6727_v33 = vor.u32 %v9813_v4, %v6724_v10 }
 0x1eb   :  { %v8034_v25 = vld [vmem:[#allocation6 + $0xa58] sm:$0xf]  ;;  %v7779_v32 = vor.u32 %v10081_v19, %v7778_v18  ;;  %3265 = vmatpush.bf16.msra.mxu3 %v8067_v20  ;;  %v6980_v12 = vld [vmem:[#allocation6 + $0x238] sm:$0xf0]  ;;  %v11196_v18 = vpop.f32.mrf.mxu0  ;;  %v7463_v19 = vor.u32 %v9997_v50, %v7460_v27 }
 0x1ec   :  { %v10145_v26 = vld [vmem:[#allocation6 + $0xa74] sm:$0xf0]  ;;  %11533 = vst [vmem:[#allocation35_spill] sm:$0xff] %v11196_v18  ;;  %v10061_v20 = vld [vmem:[#allocation6 + $0x7dc] sm:$0xf]  ;;  %v6983_v36 = vor.u32 %v9877_v11, %v6980_v12  ;;  %v7687_v11 = vor.u32 %v10053_v15, %v7684_v58 }
 0x1ed   :  { %v7746_v39 = vld [vmem:[#allocation6 + $0x818] sm:$0xf]  ;;  %v8035_v41 = vor.u32 %v10145_v26, %v8034_v25  ;;  %3293 = vmatpush.bf16.msra.mxu2 %v6791_v22  ;;  %3252 = vmatpush.bf16.msrb.mxu1 %v7779_v32  ;;  %v7716_v25 = vld [vmem:[#allocation6 + $0x7f8] sm:$0xf0] }
 0x1ee   :  { %v10073_v40 = vld [vmem:[#allocation6 + $0x834] sm:$0xf0]  ;;  %v10125_v26 = vld [vmem:[#allocation6 + $0x9dc] sm:$0xf]  ;;  %3308 = vmatpush.bf16.msra.mxu0 %v7015_v60 }
 0x1ef   :  { %v8002_v2 = vld [vmem:[#allocation6 + $0xa18] sm:$0xf]  ;;  %v7747_v7 = vor.u32 %v10073_v40, %v7746_v39  ;;  %3266 = vmatpush.bf16.msra.mxu3 %v8035_v41  ;;  %v7972_v22 = vld [vmem:[#allocation6 + $0x9f8] sm:$0xf0]  ;;  %v7719_v39 = vor.u32 %v10061_v20, %v7716_v25  ;;  %v11198_v40 = vpop.f32.mrf.mxu2  ;;  %v11200_v60 = vpop.f32.mrf.mxu3 }
 0x1f0   :  { %v10137_v3 = vld [vmem:[#allocation6 + $0xa34] sm:$0xf0]  ;;  %v10189_v24 = vld [vmem:[#allocation6 + $0xbdc] sm:$0xf]  ;;  %v7975_v50 = vor.u32 %v10125_v26, %v7972_v22  ;;  %11534 = vst [vmem:[#allocation36_spill] sm:$0xff] %v11200_v60  ;;  %v11202_v4 = vpop.f32.mrf.mxu1 }
 0x1f1   :  { %v8003_v46 = vor.u32 %v10137_v3, %v8002_v2  ;;  %v8228_v31 = vld [vmem:[#allocation6 + $0xbf8] sm:$0xf0]  ;;  %3294 = vmatpush.bf16.msra.mxu2 %v6759_v8  ;;  %3253 = vmatpush.bf16.msrb.mxu1 %v7747_v7 }
 0x1f2   :  { %v9989_v35 = vld [vmem:[#allocation6 + $0x59c] sm:$0xf]  ;;  %v8231_v27 = vor.u32 %v10189_v24, %v8228_v31  ;;  %3309 = vmatpush.bf16.msra.mxu0 %v6983_v36 }
 0x1f3   :  { %v7428_v32 = vld [vmem:[#allocation6 + $0x5b8] sm:$0xf0]  ;;  %3267 = vmatpush.bf16.msra.mxu3 %v8003_v46  ;;  %v11205_v12 = vpop.f32.mrf.mxu0 }
 0x1f4   :  { %v10117_v41 = vld [vmem:[#allocation6 + $0x99c] sm:$0xf]  ;;  %v7431_v2 = vor.u32 %v9989_v35, %v7428_v32  ;;  %3254 = vmatmul.bf16.vlgmr.msrb.gmra.mxu1 %v11071_v38 }
 0x1f5   :  { %3316 = vmatpush.bf16.msra.mxu1 %v7463_v19  ;;  %v7940_v3 = vld [vmem:[#allocation6 + $0x9b8] sm:$0xf0]  ;;  %3295 = vmatpush.bf16.msra.mxu2 %v6727_v33 }
 0x1f6   :  { %v10181_v51 = vld [vmem:[#allocation6 + $0xb9c] sm:$0xf]  ;;  %3358 = vmatpush.bf16.msrb.mxu0 %v8231_v27  ;;  %v7943_v46 = vor.u32 %v10117_v41, %v7940_v3  ;;  %3268 = vmatmul.bf16.vlgmr.msra.gmra.mxu3 %v11073_v43 }
 0x1f7   :  { %v8196_v8 = vld [vmem:[#allocation6 + $0xbb8] sm:$0xf0]  ;;  %3330 = vmatpush.bf16.msrb.mxu3 %v7719_v39  ;;  %3310 = vmatmul.bf16.vlgmr.msra.gmra.mxu0 %v11063_v9 }
 0x1f8   :  { %v9981_v7 = vld [vmem:[#allocation6 + $0x55c] sm:$0xf]  ;;  %v8199_v19 = vor.u32 %v10181_v51, %v8196_v8  ;;  %3296 = vmatmul.bf16.vlgmr.msra.gmra.mxu2 %v11057_v56  ;;  %v11210_v8 = vpop.f32.mrf.mxu2 }
 0x1f9   :  { %v7396_v10 = vld [vmem:[#allocation6 + $0x578] sm:$0xf0]  ;;  %3344 = vmatpush.bf16.msrb.mxu2 %v7975_v50  ;;  %3317 = vmatpush.bf16.msra.mxu1 %v7431_v2  ;;  %11535 = vst [vmem:[#allocation37_spill] sm:$0xff] %v11210_v8 }
 0x1fa   :  { %v10045_v20 = vld [vmem:[#allocation6 + $0x75c] sm:$0xf]  ;;  %v7399_v22 = vor.u32 %v9981_v7, %v7396_v10  ;;  %3359 = vmatpush.bf16.msrb.mxu0 %v8199_v19  ;;  %v11212_v10 = vpop.f32.mrf.mxu3 }
 0x1fb   :  { %v7652_v25 = vld [vmem:[#allocation6 + $0x778] sm:$0xf0]  ;;  %3331 = vmatpush.bf16.msrb.mxu3 %v7687_v11  ;;  %v11214_v11 = vpop.f32.mrf.mxu1 }
 0x1fc   :  { %v10109_v26 = vld [vmem:[#allocation6 + $0x95c] sm:$0xf]  ;;  %v7655_v15 = vor.u32 %v10045_v20, %v7652_v25 }
 0x1fd   :  { %v7908_v24 = vld [vmem:[#allocation6 + $0x978] sm:$0xf0]  ;;  %3345 = vmatpush.bf16.msrb.mxu2 %v7943_v46  ;;  %3318 = vmatpush.bf16.msra.mxu1 %v7399_v22 }
 0x1fe   :  { %v10173_v31 = vld [vmem:[#allocation6 + $0xb5c] sm:$0xf]  ;;  %v7911_v51 = vor.u32 %v10109_v26, %v7908_v24 }
 0x1ff   :  { %v8164_v33 = vld [vmem:[#allocation6 + $0xb78] sm:$0xf0]  ;;  %3332 = vmatpush.bf16.msrb.mxu3 %v7655_v15 }
 0x200   :  { %v9973_v35 = vld [vmem:[#allocation6 + $0x51c] sm:$0xf]  ;;  %v8167_v58 = vor.u32 %v10173_v31, %v8164_v33 }
 0x201   :  { %v7364_v32 = vld [vmem:[#allocation6 + $0x538] sm:$0xf0]  ;;  %3346 = vmatpush.bf16.msrb.mxu2 %v7911_v51 }
 0x202   :  { %v10037_v36 = vld [vmem:[#allocation6 + $0x71c] sm:$0xf]  ;;  %v7367_v27 = vor.u32 %v9973_v35, %v7364_v32  ;;  %3360 = vmatpush.bf16.msrb.mxu0 %v8167_v58  ;;  %v11216_v35 = vpop.f32.mrf.mxu0 }
 0x203   :  { %v7620_v39 = vld [vmem:[#allocation6 + $0x738] sm:$0xf0] }
 0x204   :  { %v10101_v50 = vld [vmem:[#allocation6 + $0x91c] sm:$0xf]  ;;  %v7623_v9 = vor.u32 %v10037_v36, %v7620_v39  ;;  %3319 = vmatpush.bf16.msra.mxu1 %v7367_v27 }
 0x205   :  { %v7876_v41 = vld [vmem:[#allocation6 + $0x938] sm:$0xf0] }
 0x206   :  { %v10165_v2 = vld [vmem:[#allocation6 + $0xb1c] sm:$0xf]  ;;  %v7879_v46 = vor.u32 %v10101_v50, %v7876_v41  ;;  %3333 = vmatpush.bf16.msrb.mxu3 %v7623_v9 }
 0x207   :  { %v8132_v3 = vld [vmem:[#allocation6 + $0xb38] sm:$0xf0] }
 0x208   :  { %v9965_v7 = vld [vmem:[#allocation6 + $0x4dc] sm:$0xf]  ;;  %v8135_v19 = vor.u32 %v10165_v2, %v8132_v3  ;;  %3347 = vmatpush.bf16.msrb.mxu2 %v7879_v46  ;;  %v11221_v46 = vpop.f32.mrf.mxu3 }
 0x209   :  { %v7332_v56 = vld [vmem:[#allocation6 + $0x4f8] sm:$0xf0] }
 0x20a   :  { %v10029_v20 = vld [vmem:[#allocation6 + $0x6dc] sm:$0xf]  ;;  %v7335_v22 = vor.u32 %v9965_v7, %v7332_v56  ;;  %3361 = vmatpush.bf16.msrb.mxu0 %v8135_v19  ;;  %v11536_v56 = vperm.slane %v11092_v1, 0  ;;  %v11223_v19 = vpop.f32.mrf.mxu2 }
 0x20b   :  { %v7588_v25 = vld [vmem:[#allocation6 + $0x6f8] sm:$0xf0] }
 0x20c   :  { %v10093_v26 = vld [vmem:[#allocation6 + $0x8dc] sm:$0xf]  ;;  %v7591_v36 = vor.u32 %v10029_v20, %v7588_v25  ;;  %3320 = vmatpush.bf16.msra.mxu1 %v7335_v22  ;;  %v2614_v60 = vadd.f32 %v11104_v44, %v11536_v56  ;;  %v11228_v56 = vld [vmem:[#allocation8] sm:$0xff] }
 0x20d   :  { %v7844_v24 = vld [vmem:[#allocation6 + $0x8f8] sm:$0xf0] }
 0x20e   :  { %v10157_v31 = vld [vmem:[#allocation6 + $0xadc] sm:$0xf]  ;;  %v7847_v51 = vor.u32 %v10093_v26, %v7844_v24  ;;  %3334 = vmatpush.bf16.msrb.mxu3 %v7591_v36  ;;  %v11226_v36 = vpop.f32.mrf.mxu1 }
 0x20f   :  { %v8100_v33 = vld [vmem:[#allocation6 + $0xaf8] sm:$0xf0]  ;;  %11537 = vst [vmem:[#allocation38_spill] sm:$0xff] %v11226_v36 }
 0x210   :  { %v9957_v32 = vld [vmem:[#allocation6 + $0x49c] sm:$0xf]  ;;  %v8103_v58 = vor.u32 %v10157_v31, %v8100_v33  ;;  %3348 = vmatpush.bf16.msrb.mxu2 %v7847_v51 }
 0x211   :  { %v7300_v15 = vld [vmem:[#allocation6 + $0x4b8] sm:$0xf0] }
 0x212   :  { %v10021_v39 = vld [vmem:[#allocation6 + $0x69c] sm:$0xf]  ;;  %v7303_v2 = vor.u32 %v9957_v32, %v7300_v15  ;;  %3362 = vmatpush.bf16.msrb.mxu0 %v8103_v58  ;;  %v2628_v15 = vadd.f32 %v11106_v49, %v2614_v60  ;;  %v625_v58 = vperm.slane %v11228_v56, 3 }
 0x213   :  { %v7556_v50 = vld [vmem:[#allocation6 + $0x6b8] sm:$0xf0] }
 0x214   :  { %v10085_v41 = vld [vmem:[#allocation6 + $0x89c] sm:$0xf]  ;;  %v7559_v9 = vor.u32 %v10021_v39, %v7556_v50  ;;  %3321 = vmatpush.bf16.msra.mxu1 %v7303_v2  ;;  %v2642_v37 = vadd.f32 %v11102_v17, %v2628_v15  ;;  %v11242_v17 = vpop.f32.mrf.mxu2 }
 0x215   :  { %v7812_v27 = vld [vmem:[#allocation6 + $0x8b8] sm:$0xf0] }
 0x216   :  { %v10149_v3 = vld [vmem:[#allocation6 + $0xa9c] sm:$0xf]  ;;  %v7815_v20 = vor.u32 %v10085_v41, %v7812_v27  ;;  %3335 = vmatpush.bf16.msrb.mxu3 %v7559_v9 }
 0x217   :  { %v8068_v7 = vld [vmem:[#allocation6 + $0xab8] sm:$0xf0] }
 0x218   :  { %v9949_v18 = vld [vmem:[#allocation6 + $0x45c] sm:$0xf]  ;;  %v8071_v25 = vor.u32 %v10149_v3, %v8068_v7  ;;  %3349 = vmatpush.bf16.msrb.mxu2 %v7815_v20 }
 0x219   :  { %v10013_v26 = vld [vmem:[#allocation6 + $0x65c] sm:$0xf]  ;;  %v7271_v31 = vor.u32 %v9949_v18, %v7268_v34  ;;  %v11232_v34 = vpop.f32.mrf.mxu0 }
 0x21a   :  { %v7524_v22 = vld [vmem:[#allocation6 + $0x678] sm:$0xf0]  ;;  %11538 = vst [vmem:[#allocation39_spill] sm:$0xff] %v11232_v34  ;;  %3363 = vmatpush.bf16.msrb.mxu0 %v8071_v25  ;;  %v11539_v34 = vperm.slane %v11092_v1, 1  ;;  %v11540_v25 = vperm.slane %v11228_v56, 2 }
 0x21b   :  { %v10077_v24 = vld [vmem:[#allocation6 + $0x85c] sm:$0xf]  ;;  %v7527_v41 = vor.u32 %v10013_v26, %v7524_v22  ;;  %3322 = vmatpush.bf16.msra.mxu1 %v7271_v31  ;;  %v8386_v26 = vld [vmem:[#allocation9 + $0xe0] sm:$0xf]  ;;  %v10232_v22 = vld [vmem:[#allocation9 + $0xec] sm:$0xf0]  ;;  %v2908_v31 = vadd.f32 %v11198_v40, %v625_v58 }
 0x21c   :  { %v7780_v33 = vld [vmem:[#allocation6 + $0x878] sm:$0xf0]  ;;  %v2712_v20 = vadd.f32 %v11133_v28, %v11539_v34  ;;  %v10328_v1 = vld [vmem:[#allocation9 + $0x3ec] sm:$0xf0]  ;;  %v8370_v34 = vld [vmem:[#allocation9 + $0xc0] sm:$0xf] }
 0x21d   :  { %v10141_v32 = vld [vmem:[#allocation6 + $0xa5c] sm:$0xf]  ;;  %v7783_v18 = vor.u32 %v10077_v24, %v7780_v33  ;;  %v2810_v24 = vadd.f32 %v11174_v0, %v11540_v25  ;;  %3336 = vmatpush.bf16.msrb.mxu3 %v7527_v41  ;;  %v2949_v0 = vpop.f32.mrf.mxu3 }
 0x21e   :  { %v8036_v44 = vld [vmem:[#allocation6 + $0xa78] sm:$0xf0]  ;;  %v2726_v25 = vadd.f32 %v11137_v42, %v2712_v20  ;;  %v10324_v42 = vld [vmem:[#allocation9 + $0x3cc] sm:$0xf0]  ;;  %v8482_v20 = vld [vmem:[#allocation9 + $0x1a0] sm:$0xf] }
 0x21f   :  { %v9941_v39 = vld [vmem:[#allocation6 + $0x41c] sm:$0xf]  ;;  %v8039_v49 = vor.u32 %v10141_v32, %v8036_v44  ;;  %v10264_v32 = vld [vmem:[#allocation9 + $0x1ec] sm:$0xf0]  ;;  %v8642_v44 = vld [vmem:[#allocation9 + $0x2e0] sm:$0xf]  ;;  %3350 = vmatpush.bf16.msrb.mxu2 %v7783_v18  ;;  %v2824_v18 = vadd.f32 %v11192_v54, %v2810_v24 }
 0x220   :  { %v7236_v50 = vld [vmem:[#allocation6 + $0x438] sm:$0xf0]  ;;  %v8515_v40 = vor.u32 %v10264_v32, %v8514_v45  ;;  %v11250_v45 = vpop.f32.mrf.mxu1  ;;  %v2740_v54 = vadd.f32 %v11160_v23, %v2726_v25  ;;  %v10288_v32 = vld [vmem:[#allocation9 + $0x2ac] sm:$0xf0] }
 0x221   :  { %v10197_v27 = vld [vmem:[#allocation6 + $0xc1c] sm:$0xf]  ;;  %v7239_v36 = vor.u32 %v9941_v39, %v7236_v50  ;;  %v10296_v39 = vld [vmem:[#allocation9 + $0x2ec] sm:$0xf0]  ;;  %3364 = vmatpush.bf16.msrb.mxu0 %v8039_v49  ;;  %v8770_v50 = vld [vmem:[#allocation9 + $0x3e0] sm:$0xf]  ;;  %v2838_v24 = vadd.f32 %v11178_v5, %v2824_v18 }
 0x222   :  { %v8260_v2 = vld [vmem:[#allocation6 + $0xc38] sm:$0xf0]  ;;  %v8643_v41 = vor.u32 %v10296_v39, %v8642_v44  ;;  %v8771_v49 = vor.u32 %v10328_v1, %v8770_v50  ;;  %v10320_v50 = vld [vmem:[#allocation9 + $0x3ac] sm:$0xf0]  ;;  %v2754_v5 = vadd.f32 %v11156_v16, %v2740_v54 }
 0x223   :  { %v10005_v60 = vld [vmem:[#allocation6 + $0x61c] sm:$0xf]  ;;  %v8263_v9 = vor.u32 %v10197_v27, %v8260_v2  ;;  %3323 = vmatpush.bf16.msra.mxu1 %v7239_v36  ;;  %v8387_v27 = vor.u32 %v10232_v22, %v8386_v26  ;;  %v2656_v2 = vadd.f32 %v11112_v14, %v2642_v37  ;;  %v10260_v36 = vld [vmem:[#allocation9 + $0x1cc] sm:$0xf0]  ;;  %v2906_v37 = vadd.f32 %v11190_v21, %v625_v58  ;;  %v11257_v22 = vpop.f32.mrf.mxu0  ;;  %v8354_v58 = vld [vmem:[#allocation9 + $0xa0] sm:$0xf] }
 0x224   :  { %v7492_v3 = vld [vmem:[#allocation6 + $0x638] sm:$0xf0]  ;;  %v2852_v16 = vadd.f32 %v11180_v30, %v2838_v24 }
 0x225   :  { %v10069_v7 = vld [vmem:[#allocation6 + $0x81c] sm:$0xf]  ;;  %v7495_v33 = vor.u32 %v10005_v60, %v7492_v3  ;;  %v10228_v60 = vld [vmem:[#allocation9 + $0xcc] sm:$0xf0]  ;;  %v8498_v3 = vld [vmem:[#allocation9 + $0x1c0] sm:$0xf]  ;;  %v2670_v14 = vadd.f32 %v11126_v57, %v2656_v2  ;;  %v2920_v39 = vadd.f32 %v11205_v12, %v2906_v37 }
 0x226   :  { %v7748_v53 = vld [vmem:[#allocation6 + $0x838] sm:$0xf0]  ;;  %3324 = vmatmul.bf16.vlgmr.msra.gmra.mxu1 %v11055_v55  ;;  %v8371_v26 = vor.u32 %v10228_v60, %v8370_v34  ;;  %v8499_v57 = vor.u32 %v10260_v36, %v8498_v3  ;;  %v10224_v55 = vld [vmem:[#allocation9 + $0xac] sm:$0xf0]  ;;  %v11275_v60 = vmul.f32 0.2, %v11117_v62  ;;  %v2866_v30 = vadd.f32 %v11194_v59, %v2852_v16 }
 0x227   :  { %v10133_v8 = vld [vmem:[#allocation6 + $0xa1c] sm:$0xf]  ;;  %v7751_v15 = vor.u32 %v10069_v7, %v7748_v53  ;;  %3379 = vmatpush.bf16.msrb.mxu1 %v8263_v9  ;;  %v2922_v53 = vadd.f32 %v11216_v35, %v2908_v31  ;;  %3337 = vmatpush.bf16.msrb.mxu3 %v7495_v33  ;;  %v8754_v7 = vld [vmem:[#allocation9 + $0x3c0] sm:$0xf]  ;;  %v11541_v35 = vperm.slane %v11228_v56, 2  ;;  %v2684_v44 = vadd.f32 %v11128_v6, %v2670_v14 }
 0x228   :  { %v8004_v51 = vld [vmem:[#allocation6 + $0xa38] sm:$0xf0]  ;;  %v10256_v31 = vld [vmem:[#allocation9 + $0x1ac] sm:$0xf0]  ;;  %v8610_v33 = vld [vmem:[#allocation9 + $0x2a0] sm:$0xf]  ;;  %v2934_v25 = vadd.f32 %v11202_v4, %v2920_v39  ;;  %v11281_v18 = vpop.f32.mrf.mxu1 }
 0x229   :  { %v8007_v28 = vor.u32 %v10133_v8, %v8004_v51  ;;  %v8626_v8 = vld [vmem:[#allocation9 + $0x2c0] sm:$0xf]  ;;  %v10292_v51 = vld [vmem:[#allocation9 + $0x2cc] sm:$0xf0]  ;;  %3351 = vmatpush.bf16.msrb.mxu2 %v7751_v15  ;;  %v2808_v9 = vadd.f32 %v11164_v63, %v11541_v35  ;;  %v2936_v23 = vadd.f32 %v11214_v11, %v2922_v53  ;;  %v8755_v63 = vor.u32 %v10324_v42, %v8754_v7 }
 0x22a   :  { %v8627_v21 = vor.u32 %v10292_v51, %v8626_v8  ;;  %3338 = vmatmul.bf16.vlgmr.msrb.gmra.mxu3 %v11059_v61  ;;  %v8738_v15 = vld [vmem:[#allocation9 + $0x3a0] sm:$0xf]  ;;  %v8355_v61 = vor.u32 %v10224_v55, %v8354_v58  ;;  %v8483_v6 = vor.u32 %v10256_v31, %v8482_v20  ;;  %v8611_v12 = vor.u32 %v10288_v32, %v8610_v33  ;;  %v10220_v2 = vld [vmem:[#allocation9 + $0x8c] sm:$0xf0] }
 0x22b   :  { %3365 = vmatpush.bf16.msrb.mxu0 %v8007_v28  ;;  %4972 = vmatpush.bf16.msra.mxu3 %v8387_v27  ;;  %v2822_v11 = vadd.f32 %v11182_v52, %v2808_v9  ;;  %v2950_v1 = vadd.f32 %v2949_v0, %v2936_v23  ;;  %v11268_v28 = vpop.f32.mrf.mxu3  ;;  %v11270_v27 = vpop.f32.mrf.mxu2  ;;  %v8739_v52 = vor.u32 %v10320_v50, %v8738_v15  ;;  %v10252_v0 = vld [vmem:[#allocation9 + $0x18c] sm:$0xf0]  ;;  %v8722_v53 = vld [vmem:[#allocation9 + $0x380] sm:$0xf] }
 0x22c   :  { %4986 = vmatpush.bf16.msra.mxu1 %v8515_v40  ;;  %3352 = vmatmul.bf16.vlgmr.msrb.gmra.mxu2 %v11071_v38  ;;  %v8338_v38 = vld [vmem:[#allocation9 + $0x80] sm:$0xf]  ;;  %v2768_v40 = vadd.f32 %v11143_v47, %v2754_v5  ;;  %v10284_v34 = vld [vmem:[#allocation9 + $0x28c] sm:$0xf0]  ;;  %v11278_v3 = vadd.f32 %v11115_v29, %v2684_v44  ;;  %v2948_v51 = vadd.f32 %v11221_v46, %v2934_v25  ;;  %v11287_v14 = vpop.f32.mrf.mxu0 }
 0x22d   :  { %5000 = vmatpush.bf16.msra.mxu2 %v8643_v41  ;;  %v8594_v41 = vld [vmem:[#allocation9 + $0x280] sm:$0xf]  ;;  %v2836_v47 = vadd.f32 %v11166_v13, %v2822_v11  ;;  %v2964_v36 = vadd.f32 %v11223_v19, %v2950_v1  ;;  %v8339_v8 = vor.u32 %v10220_v2, %v8338_v38  ;;  %v10216_v7 = vld [vmem:[#allocation9 + $0x6c] sm:$0xf0]  ;;  %v2880_v46 = vadd.f32 %v11212_v10, %v2866_v30 }
 0x22e   :  { %3366 = vmatmul.bf16.vlgmr.msrb.gmra.mxu0 %v11073_v43  ;;  %v8466_v43 = vld [vmem:[#allocation9 + $0x180] sm:$0xf]  ;;  %v8595_v4 = vor.u32 %v10284_v34, %v8594_v41  ;;  %v2782_v54 = vadd.f32 %v11162_v48, %v2768_v40  ;;  %v10248_v59 = vld [vmem:[#allocation9 + $0x16c] sm:$0xf0]  ;;  %v11291_v9 = vmul.f32 0.2, %v11278_v3 }
 0x22f   :  { %5014 = vmatpush.bf16.msra.mxu0 %v8771_v49  ;;  %4973 = vmatpush.bf16.msra.mxu3 %v8371_v26  ;;  %v10316_v49 = vld [vmem:[#allocation9 + $0x38c] sm:$0xf0]  ;;  %v8467_v29 = vor.u32 %v10252_v0, %v8466_v43  ;;  %v8322_v37 = vld [vmem:[#allocation9 + $0x60] sm:$0xf]  ;;  %v2978_v24 = vadd.f32 %v11257_v22, %v2964_v36  ;;  %v11549_v0 = vld [vmem:[#allocation36_spill] sm:$0xff] }
 0x230   :  { %4987 = vmatpush.bf16.msra.mxu1 %v8499_v57  ;;  %v8450_v42 = vld [vmem:[#allocation9 + $0x160] sm:$0xf]  ;;  %v8723_v13 = vor.u32 %v10316_v49, %v8722_v53  ;;  %v10280_v19 = vld [vmem:[#allocation9 + $0x26c] sm:$0xf0]  ;;  %v8323_v48 = vor.u32 %v10216_v7, %v8322_v37 }
 0x231   :  { %5001 = vmatpush.bf16.msra.mxu2 %v8627_v21  ;;  %v8578_v35 = vld [vmem:[#allocation9 + $0x260] sm:$0xf]  ;;  %v10312_v57 = vld [vmem:[#allocation9 + $0x36c] sm:$0xf0]  ;;  %v11542_v21 = vld [vmem:[#allocation32_spill] sm:$0xff]  ;;  %v8451_v33 = vor.u32 %v10248_v59, %v8450_v42  ;;  %v11316_v34 = vadd.f32 %v11250_v45, %v2978_v24 }
 0x232   :  { %v8706_v26 = vld [vmem:[#allocation9 + $0x360] sm:$0xf]  ;;  %v11295_v58 = vadd.f32 %v11542_v21, %v2782_v54  ;;  %v11544_v23 = vld [vmem:[#allocation37_spill] sm:$0xff]  ;;  %v8579_v32 = vor.u32 %v10280_v19, %v8578_v35  ;;  %v11551_v35 = vld [vmem:[#allocation34_spill] sm:$0xff] }
 0x233   :  { %5015 = vmatpush.bf16.msra.mxu0 %v8755_v63  ;;  %4974 = vmatpush.bf16.msra.mxu3 %v8355_v61  ;;  %v11543_v55 = vld [vmem:[#allocation31_spill] sm:$0xff]  ;;  %v2962_v63 = vadd.f32 %v11544_v23, %v2948_v51  ;;  %v11300_v31 = vpop.f32.mrf.mxu2  ;;  %v10212_v44 = vld [vmem:[#allocation9 + $0x4c] sm:$0xf0]  ;;  %v8707_v5 = vor.u32 %v10312_v57, %v8706_v26  ;;  %v11546_v61 = vld [vmem:[#allocation30_spill] sm:$0xff]  ;;  %v3005_v2 = vpop.f32.mrf.mxu3  ;;  %v626_v26 = vperm.slane %v11228_v56, 4 }
 0x234   :  { %4988 = vmatpush.bf16.msra.mxu1 %v8483_v6  ;;  %v2850_v20 = vadd.f32 %v11543_v55, %v2836_v47  ;;  %v8306_v10 = vld [vmem:[#allocation9 + $0x40] sm:$0xf]  ;;  %v11545_v15 = vld [vmem:[#allocation33_spill] sm:$0xff]  ;;  %v11304_v6 = vmul.f32 0.2, %v11546_v61  ;;  %v11319_v47 = vpop.f32.mrf.mxu1  ;;  %v11324_v54 = vpop.f32.mrf.mxu0  ;;  %v11552_v55 = vld [vmem:[#allocation38_spill] sm:$0xff] }
 0x235   :  { %5002 = vmatpush.bf16.msra.mxu2 %v8611_v12  ;;  %v8434_v39 = vld [vmem:[#allocation9 + $0x140] sm:$0xf]  ;;  %v10244_v11 = vld [vmem:[#allocation9 + $0x14c] sm:$0xf0]  ;;  %v8307_v25 = vor.u32 %v10212_v44, %v8306_v10 }
 0x236   :  { %v2864_v50 = vadd.f32 %v11545_v15, %v2850_v20  ;;  %v8562_v1 = vld [vmem:[#allocation9 + $0x240] sm:$0xf]  ;;  %v10276_v22 = vld [vmem:[#allocation9 + $0x24c] sm:$0xf0]  ;;  %v8435_v30 = vor.u32 %v10244_v11, %v8434_v39 }
 0x237   :  { %5016 = vmatpush.bf16.msra.mxu0 %v8739_v52  ;;  %4975 = vmatpush.bf16.msra.mxu3 %v8339_v8  ;;  %v11547_v12 = vld [vmem:[#allocation35_spill] sm:$0xff]  ;;  %v11548_v43 = vld [vmem:[#allocation29_spill] sm:$0xff]  ;;  %v11312_v52 = vmul.f32 0.2, %v11295_v58  ;;  %v8563_v36 = vor.u32 %v10276_v22, %v8562_v1  ;;  %v3410_v22 = vmax.f32 %v11278_v3, %v11291_v9 }
 0x238   :  { %4989 = vmatpush.bf16.msra.mxu1 %v8467_v29  ;;  %v11307_v38 = vadd.f32 %v11547_v12, %v2880_v46  ;;  %v8690_v40 = vld [vmem:[#allocation9 + $0x340] sm:$0xf]  ;;  %v10308_v16 = vld [vmem:[#allocation9 + $0x34c] sm:$0xf0]  ;;  %v2878_v41 = vadd.f32 %v11549_v0, %v2864_v50  ;;  %v11328_v46 = vmul.f32 0.2, %v11316_v34 }
 0x239   :  { %5003 = vmatpush.bf16.msra.mxu2 %v8595_v4  ;;  %8271 = vmatmul.msk.bf16.vlgmr.msrb.gmra.mxu1 %vm2598_vm0, %v11548_v43  ;;  %v11550_v53 = vld [vmem:[#allocation39_spill] sm:$0xff]  ;;  %v10208_v51 = vld [vmem:[#allocation9 + $0x2c] sm:$0xf0]  ;;  %v8691_v4 = vor.u32 %v10308_v16, %v8690_v40 }
 0x23a   :  { %v2976_v49 = vadd.f32 %v11550_v53, %v2962_v63  ;;  %v8290_v8 = vld [vmem:[#allocation9 + $0x20] sm:$0xf]  ;;  %v10240_v37 = vld [vmem:[#allocation9 + $0x12c] sm:$0xf0]  ;;  %v11322_v45 = vmul.f32 0.2, %v11307_v38  ;;  %v2892_v19 = vadd.f32 %v11551_v35, %v2878_v41  ;;  %v3006_v41 = vadd.f32 %v3005_v2, %v626_v26 }
 0x23b   :  { %5017 = vmatpush.bf16.msra.mxu0 %v8723_v13  ;;  %4976 = vmatpush.bf16.msra.mxu3 %v8323_v48  ;;  %v8418_v29 = vld [vmem:[#allocation9 + $0x120] sm:$0xf]  ;;  %v10272_v42 = vld [vmem:[#allocation9 + $0x22c] sm:$0xf0]  ;;  %v8291_v57 = vor.u32 %v10208_v51, %v8290_v8  ;;  %v11332_v15 = vpop.f32.mrf.mxu3  ;;  %v11334_v50 = vpop.f32.mrf.mxu2  ;;  %v3402_v8 = vmax.f32 %v11117_v62, %v11275_v60  ;;  %v3413_v2 = vmax.f32 %v11316_v34, %v11328_v46 }
 0x23c   :  { %4990 = vmatpush.bf16.msra.mxu1 %v8451_v33  ;;  %v8546_v7 = vld [vmem:[#allocation9 + $0x220] sm:$0xf]  ;;  %v10304_v59 = vld [vmem:[#allocation9 + $0x32c] sm:$0xf0]  ;;  %v2990_v20 = vadd.f32 %v11552_v55, %v2976_v49  ;;  %v8419_v24 = vor.u32 %v10240_v37, %v8418_v29  ;;  %v3388_v12 = vmul.f32 0.2, %v2892_v19  ;;  %v3004_v51 = vadd.f32 %v11268_v28, %v626_v26 }
 0x23d   :  { %5004 = vmatpush.bf16.msra.mxu2 %v8579_v32  ;;  %v8674_v13 = vld [vmem:[#allocation9 + $0x320] sm:$0xf]  ;;  %v8547_v48 = vor.u32 %v10272_v42, %v8546_v7  ;;  %v10204_v23 = vld [vmem:[#allocation9 + $0xc] sm:$0xf0]  ;;  %v3020_v60 = vadd.f32 %v11319_v47, %v3006_v41 }
 0x23e   :  { %v8274_v21 = vld [vmem:[#allocation9] sm:$0xf]  ;;  %v10236_v33 = vld [vmem:[#allocation9 + $0x10c] sm:$0xf0]  ;;  %v8675_v32 = vor.u32 %v10304_v59, %v8674_v13  ;;  %v3389_v0 = vmul.f32 0.2, %v2990_v20 }
 0x23f   :  { %5018 = vmatpush.bf16.msra.mxu0 %v8707_v5  ;;  %4977 = vmatpush.bf16.msra.mxu3 %v8307_v25  ;;  %v8402_v63 = vld [vmem:[#allocation9 + $0x100] sm:$0xf]  ;;  %v10268_v44 = vld [vmem:[#allocation9 + $0x20c] sm:$0xf0]  ;;  %v8275_v43 = vor.u32 %v10204_v23, %v8274_v21  ;;  %v11338_v25 = vpop.f32.mrf.mxu1  ;;  %v3034_v55 = vadd.f32 %v11270_v27, %v3020_v60 }
 0x240   :  { %4991 = vmatpush.bf16.msra.mxu1 %v8435_v30  ;;  %v8530_v10 = vld [vmem:[#allocation9 + $0x200] sm:$0xf]  ;;  %v10300_v5 = vld [vmem:[#allocation9 + $0x30c] sm:$0xf0]  ;;  %v8403_v53 = vor.u32 %v10236_v33, %v8402_v63  ;;  %v3411_v30 = vmax.f32 %v11295_v58, %v11312_v52  ;;  %v3403_v58 = vmax.f32 %v11546_v61, %v11304_v6  ;;  %v3405_v62 = vmax.f32 %v2990_v20, %v3389_v0 }
 0x241   :  { %5005 = vmatpush.bf16.msra.mxu2 %v8563_v36  ;;  %v8658_v39 = vld [vmem:[#allocation9 + $0x300] sm:$0xf]  ;;  %v10360_v1 = vld [vmem:[#allocation9 + $0x4ec] sm:$0xf0]  ;;  %v8531_v49 = vor.u32 %v10268_v44, %v8530_v10  ;;  %v3412_v36 = vmax.f32 %v11307_v38, %v11322_v45  ;;  %v3404_v38 = vmax.f32 %v2892_v19, %v3388_v12  ;;  %v11353_v45 = vpack.c.bf16 %v3410_v22, %v3402_v8 }
 0x242   :  { %v8898_v11 = vld [vmem:[#allocation9 + $0x4e0] sm:$0xf]  ;;  %v10392_v16 = vld [vmem:[#allocation9 + $0x5ec] sm:$0xf0]  ;;  %v8659_v3 = vor.u32 %v10300_v5, %v8658_v39  ;;  %v11356_v28 = vpack.c.bf16 %v3411_v30, %v3403_v58  ;;  %v11360_v59 = vpack.c.bf16 %v3413_v2, %v3405_v62  ;;  %v3018_v61 = vadd.f32 %v11281_v18, %v3004_v51 }
 0x243   :  { %5019 = vmatpush.bf16.msra.mxu0 %v8691_v4  ;;  %4978 = vmatpush.bf16.msra.mxu3 %v8291_v57  ;;  %v9026_v40 = vld [vmem:[#allocation9 + $0x5e0] sm:$0xf]  ;;  %v8899_v9 = vor.u32 %v10360_v1, %v8898_v11  ;;  %v11349_v4 = vpop.f32.mrf.mxu0  ;;  %v10356_v7 = vld [vmem:[#allocation9 + $0x4cc] sm:$0xf0]  ;;  %v11358_v34 = vpack.c.bf16 %v3412_v36, %v3404_v38  ;;  %v3115_v6 = vpop.f32.mrf.mxu2  ;;  %v3048_v11 = vadd.f32 %v11324_v54, %v3034_v55 }
 0x244   :  { %4992 = vmatpush.bf16.msra.mxu1 %v8419_v24  ;;  %v9027_v29 = vor.u32 %v10392_v16, %v9026_v40  ;;  %v8882_v37 = vld [vmem:[#allocation9 + $0x4c0] sm:$0xf]  ;;  %v10388_v42 = vld [vmem:[#allocation9 + $0x5cc] sm:$0xf0]  ;;  %v3061_v20 = vpop.f32.mrf.mxu3  ;;  %v627_v24 = vperm.slane %v11228_v56, 5  ;;  %v3032_v23 = vadd.f32 %v11242_v17, %v3018_v61 }
 0x245   :  { %5006 = vmatpush.bf16.msra.mxu2 %v8547_v48  ;;  %v9010_v52 = vld [vmem:[#allocation9 + $0x5c0] sm:$0xf]  ;;  %v8883_v13 = vor.u32 %v10356_v7, %v8882_v37  ;;  %v10352_v47 = vld [vmem:[#allocation9 + $0x4ac] sm:$0xf0]  ;;  %v3062_v40 = vadd.f32 %v3061_v20, %v3048_v11  ;;  %v8388_v11 = vld [vmem:[#allocation9 + $0xf0] sm:$0xf0] }
 0x246   :  { %v9011_v35 = vor.u32 %v10388_v42, %v9010_v52  ;;  %v8866_v19 = vld [vmem:[#allocation9 + $0x4a0] sm:$0xf]  ;;  %v10384_v26 = vld [vmem:[#allocation9 + $0x5ac] sm:$0xf0] }
 0x247   :  { %5020 = vmatpush.bf16.msra.mxu0 %v8675_v32  ;;  %4979 = vmatpush.bf16.msra.mxu3 %v8275_v43  ;;  %v8994_v46 = vld [vmem:[#allocation9 + $0x5a0] sm:$0xf]  ;;  %v10424_v21 = vld [vmem:[#allocation9 + $0x6ec] sm:$0xf0]  ;;  %v8867_v48 = vor.u32 %v10352_v47, %v8866_v19  ;;  %v3075_v63 = vpop.f32.mrf.mxu1  ;;  %v3046_v43 = vadd.f32 %v11287_v14, %v3032_v23 }
 0x248   :  { %4993 = vmatpush.bf16.msra.mxu1 %v8403_v53  ;;  %v9154_v57 = vld [vmem:[#allocation9 + $0x6e0] sm:$0xf]  ;;  %v8995_v33 = vor.u32 %v10384_v26, %v8994_v46  ;;  %v10348_v10 = vld [vmem:[#allocation9 + $0x48c] sm:$0xf0]  ;;  %v3102_v53 = vadd.f32 %v11349_v4, %v627_v24  ;;  %v3076_v14 = vadd.f32 %v3075_v63, %v3062_v40  ;;  %v8516_v40 = vld [vmem:[#allocation9 + $0x1f0] sm:$0xf0] }
 0x249   :  { %5007 = vmatpush.bf16.msra.mxu2 %v8531_v49  ;;  %v9155_v18 = vor.u32 %v10424_v21, %v9154_v57  ;;  %v8850_v32 = vld [vmem:[#allocation9 + $0x480] sm:$0xf]  ;;  %v10380_v39 = vld [vmem:[#allocation9 + $0x58c] sm:$0xf0]  ;;  %v3060_v54 = vadd.f32 %v11332_v15, %v3046_v43  ;;  %v10262_v43 = vld [vmem:[#allocation9 + $0x1e4] sm:$0xf] }
 0x24a   :  { %4980 = vmatmul.bf16.vlgmr.msra.gmra.mxu3 %v11353_v45  ;;  %v8978_v44 = vld [vmem:[#allocation9 + $0x580] sm:$0xf]  ;;  %v10420_v27 = vld [vmem:[#allocation9 + $0x6cc] sm:$0xf0]  ;;  %v8851_v12 = vor.u32 %v10348_v10, %v8850_v32  ;;  %v3116_v38 = vadd.f32 %v3115_v6, %v3102_v53  ;;  %v3090_v61 = vadd.f32 %v11334_v50, %v3076_v14 }
 0x24b   :  { %5021 = vmatpush.bf16.msra.mxu0 %v8659_v3  ;;  %5028 = vmatpush.bf16.msrb.mxu3 %v8899_v9  ;;  %v9138_v5 = vld [vmem:[#allocation9 + $0x6c0] sm:$0xf]  ;;  %v3103_v1 = vpop.f32.mrf.mxu0  ;;  %v8979_v17 = vor.u32 %v10380_v39, %v8978_v44  ;;  %v10344_v0 = vld [vmem:[#allocation9 + $0x46c] sm:$0xf0]  ;;  %v3117_v3 = vpop.f32.mrf.mxu2  ;;  %v3074_v62 = vadd.f32 %v11338_v25, %v3060_v54  ;;  %v10230_v39 = vld [vmem:[#allocation9 + $0xe4] sm:$0xf]  ;;  %v8519_v54 = vor.u32 %v10262_v43, %v8516_v40 }
 0x24c   :  { %5042 = vmatpush.bf16.msrb.mxu1 %v9027_v29  ;;  %5008 = vmatmul.bf16.vlgmr.msra.gmra.mxu2 %v11358_v34  ;;  %v9139_v22 = vor.u32 %v10420_v27, %v9138_v5  ;;  %v8834_v16 = vld [vmem:[#allocation9 + $0x460] sm:$0xf]  ;;  %v10376_v49 = vld [vmem:[#allocation9 + $0x56c] sm:$0xf0]  ;;  %v3129_v9 = vpop.f32.mrf.mxu3  ;;  %v3104_v60 = vadd.f32 %v3103_v1, %v627_v24  ;;  %v8391_v53 = vor.u32 %v10230_v39, %v8388_v11  ;;  %v8452_v43 = vld [vmem:[#allocation9 + $0x170] sm:$0xf0] }
 0x24d   :  { %4994 = vmatmul.bf16.vlgmr.msra.gmra.mxu1 %v11356_v28  ;;  %5056 = vmatpush.bf16.msrb.mxu2 %v9155_v18  ;;  %v8962_v41 = vld [vmem:[#allocation9 + $0x560] sm:$0xf]  ;;  %v10416_v36 = vld [vmem:[#allocation9 + $0x6ac] sm:$0xf0]  ;;  %v8835_v2 = vor.u32 %v10344_v0, %v8834_v16  ;;  %v3130_v57 = vadd.f32 %v3129_v9, %v3116_v38  ;;  %v3088_v20 = vadd.f32 %v11300_v31, %v3074_v62  ;;  %v10286_v40 = vld [vmem:[#allocation9 + $0x2a4] sm:$0xf] }
 0x24e   :  { %5022 = vmatmul.bf16.vlgmr.msra.gmra.mxu0 %v11360_v59  ;;  %v9122_v30 = vld [vmem:[#allocation9 + $0x6a0] sm:$0xf]  ;;  %v8963_v29 = vor.u32 %v10376_v49, %v8962_v41  ;;  %v10340_v7 = vld [vmem:[#allocation9 + $0x44c] sm:$0xf0]  ;;  %v3118_v24 = vadd.f32 %v3117_v3, %v3104_v60  ;;  %v10226_v49 = vld [vmem:[#allocation9 + $0xc4] sm:$0xf] }
 0x24f   :  { %5029 = vmatpush.bf16.msrb.mxu3 %v8883_v13  ;;  %v9123_v8 = vor.u32 %v10416_v36, %v9122_v30  ;;  %v3143_v51 = vpop.f32.mrf.mxu1  ;;  %v8818_v37 = vld [vmem:[#allocation9 + $0x440] sm:$0xf]  ;;  %v10372_v4 = vld [vmem:[#allocation9 + $0x54c] sm:$0xf0]  ;;  %v8372_v3 = vld [vmem:[#allocation9 + $0xd0] sm:$0xf0] }
 0x250   :  { %5043 = vmatpush.bf16.msrb.mxu1 %v9011_v35  ;;  %v8946_v58 = vld [vmem:[#allocation9 + $0x540] sm:$0xf]  ;;  %v10412_v42 = vld [vmem:[#allocation9 + $0x68c] sm:$0xf0]  ;;  %v8819_v13 = vor.u32 %v10340_v7, %v8818_v37  ;;  %v3144_v5 = vadd.f32 %v3143_v51, %v3130_v57  ;;  %v8500_v37 = vld [vmem:[#allocation9 + $0x1d0] sm:$0xf0]  ;;  %v8375_v38 = vor.u32 %v10226_v49, %v8372_v3 }
 0x251   :  { %5057 = vmatpush.bf16.msrb.mxu2 %v9139_v22  ;;  %v9106_v52 = vld [vmem:[#allocation9 + $0x680] sm:$0xf]  ;;  %v8947_v19 = vor.u32 %v10372_v4, %v8946_v58  ;;  %v10336_v46 = vld [vmem:[#allocation9 + $0x42c] sm:$0xf0]  ;;  %v3390_v22 = vmul.f32 0.2, %v3088_v20 }
 0x252   :  { %v9107_v15 = vor.u32 %v10412_v42, %v9106_v52  ;;  %v8802_v47 = vld [vmem:[#allocation9 + $0x420] sm:$0xf]  ;;  %v10368_v6 = vld [vmem:[#allocation9 + $0x52c] sm:$0xf0]  ;;  %v10222_v4 = vld [vmem:[#allocation9 + $0xa4] sm:$0xf] }
 0x253   :  { %5030 = vmatpush.bf16.msrb.mxu3 %v8867_v48  ;;  %v3157_v35 = vpop.f32.mrf.mxu0  ;;  %v8930_v26 = vld [vmem:[#allocation9 + $0x520] sm:$0xf]  ;;  %v10408_v55 = vld [vmem:[#allocation9 + $0x66c] sm:$0xf0]  ;;  %v8803_v48 = vor.u32 %v10336_v46, %v8802_v47  ;;  %v3171_v32 = vpop.f32.mrf.mxu2  ;;  %v8356_v52 = vld [vmem:[#allocation9 + $0xb0] sm:$0xf0] }
 0x254   :  { %5044 = vmatpush.bf16.msrb.mxu1 %v8995_v33  ;;  %v9090_v21 = vld [vmem:[#allocation9 + $0x660] sm:$0xf]  ;;  %v3131_v25 = vpop.f32.mrf.mxu3  ;;  %v10332_v50 = vld [vmem:[#allocation9 + $0x40c] sm:$0xf0]  ;;  %v3398_v33 = vmul.f32 0.2, %v3090_v61  ;;  %v8931_v10 = vor.u32 %v10368_v6, %v8930_v26  ;;  %v3158_v30 = vadd.f32 %v3157_v35, %v3144_v5 }
 0x255   :  { %5058 = vmatpush.bf16.msrb.mxu2 %v9123_v8  ;;  %v9091_v18 = vor.u32 %v10408_v55, %v9090_v21  ;;  %v8786_v23 = vld [vmem:[#allocation9 + $0x400] sm:$0xf]  ;;  %v10364_v44 = vld [vmem:[#allocation9 + $0x50c] sm:$0xf0]  ;;  %v3132_v27 = vadd.f32 %v3131_v25, %v3118_v24  ;;  %v10254_v60 = vld [vmem:[#allocation9 + $0x1a4] sm:$0xf]  ;;  %v8359_v21 = vor.u32 %v10222_v4, %v8356_v52 }
 0x256   :  { %v8914_v63 = vld [vmem:[#allocation9 + $0x500] sm:$0xf]  ;;  %v10404_v31 = vld [vmem:[#allocation9 + $0x64c] sm:$0xf0]  ;;  %v8787_v16 = vor.u32 %v10332_v50, %v8786_v23  ;;  %v3414_v0 = vmax.f32 %v3090_v61, %v3398_v33  ;;  %v3172_v42 = vadd.f32 %v3171_v32, %v3158_v30  ;;  %v10294_v46 = vld [vmem:[#allocation9 + $0x2e4] sm:$0xf] }
 0x257   :  { %5031 = vmatpush.bf16.msrb.mxu3 %v8851_v12  ;;  %v9074_v1 = vld [vmem:[#allocation9 + $0x640] sm:$0xf]  ;;  %v3145_v12 = vpop.f32.mrf.mxu1  ;;  %v8915_v41 = vor.u32 %v10364_v44, %v8914_v63  ;;  %v10400_v8 = vld [vmem:[#allocation9 + $0x62c] sm:$0xf0]  ;;  %v8644_v26 = vld [vmem:[#allocation9 + $0x2f0] sm:$0xf0] }
 0x258   :  { %5045 = vmatpush.bf16.msrb.mxu1 %v8979_v17  ;;  %v9075_v17 = vor.u32 %v10404_v31, %v9074_v1  ;;  %v3146_v36 = vadd.f32 %v3145_v12, %v3132_v27  ;;  %v9058_v9 = vld [vmem:[#allocation9 + $0x620] sm:$0xf]  ;;  %v10396_v61 = vld [vmem:[#allocation9 + $0x60c] sm:$0xf0]  ;;  %v8647_v6 = vor.u32 %v10294_v46, %v8644_v26  ;;  %v10218_v55 = vld [vmem:[#allocation9 + $0x84] sm:$0xf] }
 0x259   :  { %5059 = vmatpush.bf16.msrb.mxu2 %v9107_v15  ;;  %v9059_v7 = vor.u32 %v10400_v8, %v9058_v9  ;;  %v10250_v24 = vld [vmem:[#allocation9 + $0x184] sm:$0xf]  ;;  %v8628_v63 = vld [vmem:[#allocation9 + $0x2d0] sm:$0xf0]  ;;  %v9282_v33 = vld [vmem:[#allocation9 + $0x7e0] sm:$0xf] }
 0x25a   :  { %v10290_v50 = vld [vmem:[#allocation9 + $0x2c4] sm:$0xf]  ;;  %v10456_v39 = vld [vmem:[#allocation9 + $0x7ec] sm:$0xf0]  ;;  %v8308_v8 = vld [vmem:[#allocation9 + $0x50] sm:$0xf0] }
 0x25b   :  { %5032 = vmatpush.bf16.msrb.mxu3 %v8835_v2  ;;  %v3406_v2 = vmax.f32 %v3088_v20, %v3390_v22  ;;  %v3159_v14 = vpop.f32.mrf.mxu0  ;;  %v3173_v35 = vpop.f32.mrf.mxu2  ;;  %v8631_v44 = vor.u32 %v10290_v50, %v8628_v63  ;;  %v10214_v27 = vld [vmem:[#allocation9 + $0x64] sm:$0xf]  ;;  %v9283_v11 = vor.u32 %v10456_v39, %v9282_v33  ;;  %v8324_v22 = vld [vmem:[#allocation9 + $0x70] sm:$0xf0]  ;;  %v10452_v49 = vld [vmem:[#allocation9 + $0x7cc] sm:$0xf0] }
 0x25c   :  { %5046 = vmatpush.bf16.msrb.mxu1 %v8963_v29  ;;  %v3185_v51 = vpop.f32.mrf.mxu3  ;;  %v10258_v29 = vld [vmem:[#allocation9 + $0x1c4] sm:$0xf]  ;;  %v3160_v62 = vadd.f32 %v3159_v14, %v3146_v36  ;;  %v8327_v30 = vor.u32 %v10214_v27, %v8324_v22  ;;  %v8436_v14 = vld [vmem:[#allocation9 + $0x150] sm:$0xf0]  ;;  %v9234_v46 = vld [vmem:[#allocation9 + $0x780] sm:$0xf] }
 0x25d   :  { %5060 = vmatpush.bf16.msrb.mxu2 %v9091_v18  ;;  %v11377_v58 = vpack.c.bf16 %v3414_v0, %v3406_v2  ;;  %v8503_v15 = vor.u32 %v10258_v29, %v8500_v37  ;;  %v3186_v57 = vadd.f32 %v3185_v51, %v3172_v42  ;;  %v8340_v18 = vld [vmem:[#allocation9 + $0x90] sm:$0xf0]  ;;  %v10246_v12 = vld [vmem:[#allocation9 + $0x164] sm:$0xf]  ;;  %5070 = vmatpush.bf16.msrb.mxu0 %v9283_v11  ;;  %v10444_v26 = vld [vmem:[#allocation9 + $0x78c] sm:$0xf0] }
 0x25e   :  { %v3174_v20 = vadd.f32 %v3173_v35, %v3160_v62  ;;  %v8343_v5 = vor.u32 %v10218_v55, %v8340_v18  ;;  %v8455_v3 = vor.u32 %v10246_v12, %v8452_v43  ;;  %v10210_v9 = vld [vmem:[#allocation9 + $0x44] sm:$0xf]  ;;  %v8596_v29 = vld [vmem:[#allocation9 + $0x290] sm:$0xf0]  ;;  %v10440_v39 = vld [vmem:[#allocation9 + $0x76c] sm:$0xf0] }
 0x25f   :  { %5033 = vmatpush.bf16.msrb.mxu3 %v8819_v13  ;;  %v9042_v13 = vld [vmem:[#allocation9 + $0x600] sm:$0xf]  ;;  %v3391_v32 = vmul.f32 0.2, %v3186_v57  ;;  %v10242_v2 = vld [vmem:[#allocation9 + $0x144] sm:$0xf]  ;;  %v8311_v4 = vor.u32 %v10210_v9, %v8308_v8 }
 0x260   :  { %5047 = vmatpush.bf16.msrb.mxu1 %v8947_v19  ;;  %v8484_v19 = vld [vmem:[#allocation9 + $0x1b0] sm:$0xf0]  ;;  %v9043_v47 = vor.u32 %v10396_v61, %v9042_v13  ;;  %v10282_v51 = vld [vmem:[#allocation9 + $0x284] sm:$0xf]  ;;  %v8439_v42 = vor.u32 %v10242_v2, %v8436_v14  ;;  %v628_v11 = vperm.slane %v11228_v56, 6 }
 0x261   :  { %5061 = vmatpush.bf16.msrb.mxu2 %v9075_v17  ;;  %v8487_v25 = vor.u32 %v10254_v60, %v8484_v19  ;;  %v8612_v17 = vld [vmem:[#allocation9 + $0x2b0] sm:$0xf0]  ;;  %v8599_v37 = vor.u32 %v10282_v51, %v8596_v29  ;;  %v10206_v62 = vld [vmem:[#allocation9 + $0x24] sm:$0xf] }
 0x262   :  { %v10238_v60 = vld [vmem:[#allocation9 + $0x124] sm:$0xf]  ;;  %v8420_v61 = vld [vmem:[#allocation9 + $0x130] sm:$0xf0] }
 0x263   :  { %5034 = vmatpush.bf16.msrb.mxu3 %v8803_v48  ;;  %v8468_v48 = vld [vmem:[#allocation9 + $0x190] sm:$0xf0]  ;;  %v11383_v13 = vpop.f32.mrf.mxu0  ;;  %v10278_v35 = vld [vmem:[#allocation9 + $0x264] sm:$0xf]  ;;  %v8423_v18 = vor.u32 %v10238_v60, %v8420_v61 }
 0x264   :  { %5048 = vmatpush.bf16.msrb.mxu1 %v8931_v10  ;;  %v3187_v23 = vpop.f32.mrf.mxu3  ;;  %v8471_v31 = vor.u32 %v10250_v24, %v8468_v48  ;;  %v8580_v19 = vld [vmem:[#allocation9 + $0x270] sm:$0xf0]  ;;  %v10358_v48 = vld [vmem:[#allocation9 + $0x4e4] sm:$0xf] }
 0x265   :  { %5062 = vmatpush.bf16.msrb.mxu2 %v9059_v7  ;;  %v3188_v10 = vadd.f32 %v3187_v23, %v3174_v20  ;;  %v9250_v7 = vld [vmem:[#allocation9 + $0x7a0] sm:$0xf]  ;;  %v8276_v55 = vld [vmem:[#allocation9 + $0x10] sm:$0xf0]  ;;  %v10234_v20 = vld [vmem:[#allocation9 + $0x104] sm:$0xf] }
 0x266   :  { %v8404_v24 = vld [vmem:[#allocation9 + $0x110] sm:$0xf0]  ;;  %v10390_v50 = vld [vmem:[#allocation9 + $0x5e4] sm:$0xf] }
 0x267   :  { %5035 = vmatpush.bf16.msrb.mxu3 %v8787_v16  ;;  %v3399_v1 = vmul.f32 0.2, %v3188_v10  ;;  %v3407_v16 = vmax.f32 %v3186_v57, %v3391_v32  ;;  %v3199_v57 = vpop.f32.mrf.mxu1  ;;  %v8900_v23 = vld [vmem:[#allocation9 + $0x4f0] sm:$0xf0]  ;;  %v10274_v63 = vld [vmem:[#allocation9 + $0x244] sm:$0xf] }
 0x268   :  { %5049 = vmatpush.bf16.msrb.mxu1 %v8915_v41  ;;  %v8615_v41 = vor.u32 %v10286_v40, %v8612_v17  ;;  %v8564_v33 = vld [vmem:[#allocation9 + $0x250] sm:$0xf0]  ;;  %v10354_v22 = vld [vmem:[#allocation9 + $0x4c4] sm:$0xf] }
 0x269   :  { %5063 = vmatpush.bf16.msrb.mxu2 %v9043_v47  ;;  %v3415_v0 = vmax.f32 %v3188_v10, %v3399_v1  ;;  %v8583_v47 = vor.u32 %v10278_v35, %v8580_v19  ;;  %v9028_v32 = vld [vmem:[#allocation9 + $0x5f0] sm:$0xf0]  ;;  %v8567_v10 = vor.u32 %v10274_v63, %v8564_v33  ;;  %v8407_v1 = vor.u32 %v10234_v20, %v8404_v24  ;;  %v10386_v17 = vld [vmem:[#allocation9 + $0x5c4] sm:$0xf] }
 0x26a   :  { %5036 = vmatmul.bf16.vlgmr.msrb.gmra.mxu3 %v11377_v58  ;;  %v8884_v12 = vld [vmem:[#allocation9 + $0x4d0] sm:$0xf0]  ;;  %v9031_v40 = vor.u32 %v10390_v50, %v9028_v32  ;;  %v10350_v9 = vld [vmem:[#allocation9 + $0x4a4] sm:$0xf] }
 0x26b   :  { %5084 = vmatpush.bf16.msra.mxu3 %v8391_v53  ;;  %v9266_v53 = vld [vmem:[#allocation9 + $0x7c0] sm:$0xf]  ;;  %v8868_v8 = vld [vmem:[#allocation9 + $0x4b0] sm:$0xf0]  ;;  %v10382_v51 = vld [vmem:[#allocation9 + $0x5a4] sm:$0xf] }
 0x26c   :  { %5098 = vmatpush.bf16.msra.mxu1 %v8519_v54  ;;  %v9267_v36 = vor.u32 %v10452_v49, %v9266_v53  ;;  %v11380_v54 = vpack.c.bf16 %v3415_v0, %v3407_v16  ;;  %v3213_v43 = vpop.f32.mrf.mxu3  ;;  %v10270_v16 = vld [vmem:[#allocation9 + $0x224] sm:$0xf]  ;;  %v8548_v0 = vld [vmem:[#allocation9 + $0x230] sm:$0xf0]  ;;  %v9202_v49 = vld [vmem:[#allocation9 + $0x740] sm:$0xf] }
 0x26d   :  { %5112 = vmatpush.bf16.msra.mxu2 %v8647_v6  ;;  %v8551_v53 = vor.u32 %v10270_v16, %v8548_v0  ;;  %v10266_v29 = vld [vmem:[#allocation9 + $0x204] sm:$0xf]  ;;  %v8852_v35 = vld [vmem:[#allocation9 + $0x490] sm:$0xf0] }
 0x26e   :  { %5071 = vmatpush.bf16.msrb.mxu0 %v9267_v36  ;;  %5050 = vmatmul.bf16.vlgmr.msrb.gmra.mxu1 %v11380_v54  ;;  %v11386_v36 = vpop.f32.mrf.mxu0  ;;  %v10346_v61 = vld [vmem:[#allocation9 + $0x484] sm:$0xf]  ;;  %v8836_v32 = vld [vmem:[#allocation9 + $0x470] sm:$0xf0] }
 0x26f   :  { %5085 = vmatpush.bf16.msra.mxu3 %v8375_v38  ;;  %v10448_v38 = vld [vmem:[#allocation9 + $0x7ac] sm:$0xf0]  ;;  %v3201_v2 = vpop.f32.mrf.mxu1  ;;  %v10378_v19 = vld [vmem:[#allocation9 + $0x584] sm:$0xf]  ;;  %v8948_v16 = vld [vmem:[#allocation9 + $0x550] sm:$0xf0] }
 0x270   :  { %5099 = vmatpush.bf16.msra.mxu1 %v8503_v15  ;;  %v9251_v52 = vor.u32 %v10448_v38, %v9250_v7  ;;  %v8292_v15 = vld [vmem:[#allocation9 + $0x30] sm:$0xf0]  ;;  %v3200_v7 = vadd.f32 %v3199_v57, %v628_v11  ;;  %v9170_v57 = vld [vmem:[#allocation9 + $0x700] sm:$0xf]  ;;  %v3202_v24 = vadd.f32 %v3201_v2, %v628_v11  ;;  %v10342_v33 = vld [vmem:[#allocation9 + $0x464] sm:$0xf] }
 0x271   :  { %5113 = vmatpush.bf16.msra.mxu2 %v8631_v44  ;;  %v8295_v6 = vor.u32 %v10206_v62, %v8292_v15  ;;  %v9218_v44 = vld [vmem:[#allocation9 + $0x760] sm:$0xf]  ;;  %v8996_v38 = vld [vmem:[#allocation9 + $0x5b0] sm:$0xf0]  ;;  %v8871_v15 = vor.u32 %v10350_v9, %v8868_v8  ;;  %v10334_v2 = vld [vmem:[#allocation9 + $0x424] sm:$0xf] }
 0x272   :  { %5072 = vmatpush.bf16.msrb.mxu0 %v9251_v52  ;;  %v9219_v27 = vor.u32 %v10440_v39, %v9218_v44  ;;  %v9186_v52 = vld [vmem:[#allocation9 + $0x720] sm:$0xf]  ;;  %v8999_v60 = vor.u32 %v10382_v51, %v8996_v38  ;;  %v10374_v44 = vld [vmem:[#allocation9 + $0x564] sm:$0xf]  ;;  %v8964_v39 = vld [vmem:[#allocation9 + $0x570] sm:$0xf0] }
 0x273   :  { %5086 = vmatpush.bf16.msra.mxu3 %v8359_v21  ;;  %v10202_v21 = vld [vmem:[#allocation9 + $0x4] sm:$0xf] }
 0x274   :  { %5100 = vmatpush.bf16.msra.mxu1 %v8487_v25  ;;  %v9235_v25 = vor.u32 %v10444_v26, %v9234_v46  ;;  %v3241_v46 = vpop.f32.mrf.mxu2  ;;  %v8980_v26 = vld [vmem:[#allocation9 + $0x590] sm:$0xf0]  ;;  %v10314_v38 = vld [vmem:[#allocation9 + $0x384] sm:$0xf] }
 0x275   :  { %5114 = vmatpush.bf16.msra.mxu2 %v8615_v41  ;;  %v9012_v41 = vld [vmem:[#allocation9 + $0x5d0] sm:$0xf0]  ;;  %v8983_v63 = vor.u32 %v10378_v19, %v8980_v26  ;;  %v10233_v26 = vld [vmem:[#allocation9 + $0xf4] sm:$0xf0] }
 0x276   :  { %5073 = vmatpush.bf16.msrb.mxu0 %v9235_v25  ;;  %v9015_v14 = vor.u32 %v10386_v17, %v9012_v41  ;;  %v10326_v25 = vld [vmem:[#allocation9 + $0x3e4] sm:$0xf]  ;;  %v8740_v41 = vld [vmem:[#allocation9 + $0x3b0] sm:$0xf0] }
 0x277   :  { %5087 = vmatpush.bf16.msra.mxu3 %v8343_v5  ;;  %v8279_v5 = vor.u32 %v10202_v21, %v8276_v55  ;;  %v3215_v21 = vpop.f32.mrf.mxu3  ;;  %v11390_v55 = vpop.f32.mrf.mxu0  ;;  %v10370_v17 = vld [vmem:[#allocation9 + $0x544] sm:$0xf] }
 0x278   :  { %5101 = vmatpush.bf16.msra.mxu1 %v8471_v31  ;;  %v8903_v31 = vor.u32 %v10358_v48, %v8900_v23  ;;  %v8855_v48 = vor.u32 %v10346_v61, %v8852_v35  ;;  %v3255_v50 = vpop.f32.mrf.mxu1  ;;  %v8951_v8 = vor.u32 %v10370_v17, %v8948_v16  ;;  %v10362_v61 = vld [vmem:[#allocation9 + $0x504] sm:$0xf]  ;;  %v8916_v35 = vld [vmem:[#allocation9 + $0x510] sm:$0xf0] }
 0x279   :  { %5115 = vmatpush.bf16.msra.mxu2 %v8599_v37  ;;  %v8532_v37 = vld [vmem:[#allocation9 + $0x210] sm:$0xf0] }
 0x27a   :  { %5074 = vmatpush.bf16.msrb.mxu0 %v9219_v27  ;;  %v8756_v27 = vld [vmem:[#allocation9 + $0x3d0] sm:$0xf0] }
 0x27b   :  { %5088 = vmatpush.bf16.msra.mxu3 %v8327_v30  ;;  %v10436_v30 = vld [vmem:[#allocation9 + $0x74c] sm:$0xf0] }
 0x27c   :  { %5102 = vmatpush.bf16.msra.mxu1 %v8455_v3  ;;  %v9203_v56 = vor.u32 %v10436_v30, %v9202_v49  ;;  %v8887_v3 = vor.u32 %v10354_v22, %v8884_v12  ;;  %v8967_v22 = vor.u32 %v10374_v44, %v8964_v39  ;;  %v10338_v12 = vld [vmem:[#allocation9 + $0x444] sm:$0xf]  ;;  %v8506_v44 = vld [vmem:[#allocation9 + $0x1c8] sm:$0xf] }
 0x27d   :  { %5116 = vmatpush.bf16.msra.mxu2 %v8583_v47  ;;  %v3214_v47 = vadd.f32 %v3213_v43, %v3200_v7  ;;  %v8820_v43 = vld [vmem:[#allocation9 + $0x450] sm:$0xf0] }
 0x27e   :  { %5075 = vmatpush.bf16.msrb.mxu0 %v9203_v56  ;;  %v8823_v30 = vor.u32 %v10338_v12, %v8820_v43  ;;  %v9156_v12 = vld [vmem:[#allocation9 + $0x6f0] sm:$0xf0] }
 0x27f   :  { %5089 = vmatpush.bf16.msra.mxu3 %v8311_v4  ;;  %v8535_v4 = vor.u32 %v10266_v29, %v8532_v37  ;;  %v3269_v0 = vpop.f32.mrf.mxu3  ;;  %v3285_v9 = vpop.f32.mrf.mxu0  ;;  %v10366_v29 = vld [vmem:[#allocation9 + $0x524] sm:$0xf]  ;;  %v8932_v37 = vld [vmem:[#allocation9 + $0x530] sm:$0xf0] }
 0x280   :  { %5103 = vmatpush.bf16.msra.mxu1 %v8439_v42  ;;  %v10432_v42 = vld [vmem:[#allocation9 + $0x72c] sm:$0xf0]  ;;  %v3257_v7 = vpop.f32.mrf.mxu1 }
 0x281   :  { %5117 = vmatpush.bf16.msra.mxu2 %v8567_v10  ;;  %v9187_v62 = vor.u32 %v10432_v42, %v9186_v52  ;;  %v3228_v10 = vadd.f32 %v11383_v13, %v3214_v47  ;;  %v10318_v13 = vld [vmem:[#allocation9 + $0x3a4] sm:$0xf] }
 0x282   :  { %v8743_v56 = vor.u32 %v10318_v13, %v8740_v41  ;;  %v10330_v42 = vld [vmem:[#allocation9 + $0x404] sm:$0xf]  ;;  %v8362_v13 = vld [vmem:[#allocation9 + $0xa8] sm:$0xf]  ;;  %v10225_v41 = vld [vmem:[#allocation9 + $0xb4] sm:$0xf0] }
 0x283   :  { %5090 = vmatpush.bf16.msra.mxu3 %v8295_v6  ;;  %5076 = vmatpush.bf16.msrb.mxu0 %v9187_v62  ;;  %v10428_v6 = vld [vmem:[#allocation9 + $0x70c] sm:$0xf0] }
 0x284   :  { %5104 = vmatpush.bf16.msra.mxu1 %v8423_v18  ;;  %v9171_v20 = vor.u32 %v10428_v6, %v9170_v57  ;;  %v8772_v18 = vld [vmem:[#allocation9 + $0x3f0] sm:$0xf0]  ;;  %v8522_v57 = vld [vmem:[#allocation9 + $0x1e8] sm:$0xf] }
 0x285   :  { %5118 = vmatpush.bf16.msra.mxu2 %v8551_v53  ;;  %v8775_v23 = vor.u32 %v10326_v25, %v8772_v18  ;;  %v8708_v25 = vld [vmem:[#allocation9 + $0x370] sm:$0xf0] }
 0x287   :  { %5091 = vmatpush.bf16.msra.mxu3 %v8279_v5  ;;  %5077 = vmatpush.bf16.msrb.mxu0 %v9171_v20  ;;  %v10322_v5 = vld [vmem:[#allocation9 + $0x3c4] sm:$0xf]  ;;  %v3271_v6 = vpop.f32.mrf.mxu3  ;;  %v11395_v39 = vpop.f32.mrf.mxu0 }
 0x288   :  { %5105 = vmatpush.bf16.msra.mxu1 %v8407_v1  ;;  %v3216_v1 = vadd.f32 %v3215_v21, %v3202_v24  ;;  %v8759_v11 = vor.u32 %v10322_v5, %v8756_v27  ;;  %v10265_v21 = vld [vmem:[#allocation9 + $0x1f4] sm:$0xf0]  ;;  %v10310_v20 = vld [vmem:[#allocation9 + $0x364] sm:$0xf] }
 0x289   :  { %5119 = vmatpush.bf16.msra.mxu2 %v8535_v4  ;;  %v8724_v4 = vld [vmem:[#allocation9 + $0x390] sm:$0xf0]  ;;  %v10261_v5 = vld [vmem:[#allocation9 + $0x1d4] sm:$0xf0]  ;;  %v10306_v27 = vld [vmem:[#allocation9 + $0x344] sm:$0xf] }
 0x28a   :  { %5092 = vmatmul.bf16.vlgmr.msra.gmra.mxu3 %v11353_v45  ;;  %v3230_v53 = vadd.f32 %v11386_v36, %v3216_v1  ;;  %v8727_v62 = vor.u32 %v10314_v38, %v8724_v4  ;;  %v8692_v1 = vld [vmem:[#allocation9 + $0x350] sm:$0xf0]  ;;  %v8346_v38 = vld [vmem:[#allocation9 + $0x88] sm:$0xf]  ;;  %v10221_v4 = vld [vmem:[#allocation9 + $0x94] sm:$0xf0] }
 0x28b   :  { %5140 = vmatpush.bf16.msrb.mxu3 %v8903_v31  ;;  %5106 = vmatmul.bf16.vlgmr.msra.gmra.mxu1 %v11356_v28  ;;  %v8839_v31 = vor.u32 %v10342_v33, %v8836_v32  ;;  %v8695_v43 = vor.u32 %v10306_v27, %v8692_v1 }
 0x28c   :  { %5154 = vmatpush.bf16.msrb.mxu1 %v9031_v40  ;;  %5126 = vmatpush.bf16.msra.mxu0 %v8775_v23  ;;  %v3242_v40 = vadd.f32 %v3241_v46, %v3228_v10  ;;  %v8394_v46 = vld [vmem:[#allocation9 + $0xe8] sm:$0xf]  ;;  %v8919_v23 = vor.u32 %v10362_v61, %v8916_v35  ;;  %v8523_v10 = vor.u32 %v10265_v21, %v8522_v57  ;;  %v10414_v35 = vld [vmem:[#allocation9 + $0x6a4] sm:$0xf] }
 0x28d   :  { %v8330_v21 = vld [vmem:[#allocation9 + $0x68] sm:$0xf] }
 0x28e   :  { %v3256_v49 = vadd.f32 %v3255_v50, %v3242_v40  ;;  %v8395_v50 = vor.u32 %v10233_v26, %v8394_v46  ;;  %v8347_v26 = vor.u32 %v10221_v4, %v8346_v38  ;;  %v8906_v4 = vld [vmem:[#allocation9 + $0x4e8] sm:$0xf] }
 0x28f   :  { %5141 = vmatpush.bf16.msrb.mxu3 %v8887_v3  ;;  %v3243_v3 = vpop.f32.mrf.mxu2  ;;  %v3313_v46 = vpop.f32.mrf.mxu0 }
 0x290   :  { %5155 = vmatpush.bf16.msrb.mxu1 %v9015_v14  ;;  %5127 = vmatpush.bf16.msra.mxu0 %v8759_v11  ;;  %v8804_v14 = vld [vmem:[#allocation9 + $0x430] sm:$0xf0]  ;;  %v3270_v51 = vadd.f32 %v3269_v0, %v3256_v49  ;;  %v3244_v52 = vadd.f32 %v3243_v3, %v3230_v53  ;;  %v8507_v0 = vor.u32 %v10261_v5, %v8506_v44  ;;  %v8490_v53 = vld [vmem:[#allocation9 + $0x1a8] sm:$0xf]  ;;  %v10245_v5 = vld [vmem:[#allocation9 + $0x154] sm:$0xf0] }
 0x291   :  { %v8807_v36 = vor.u32 %v10334_v2, %v8804_v14  ;;  %v8676_v3 = vld [vmem:[#allocation9 + $0x330] sm:$0xf0]  ;;  %v10418_v14 = vld [vmem:[#allocation9 + $0x6c4] sm:$0xf]  ;;  %v8442_v44 = vld [vmem:[#allocation9 + $0x148] sm:$0xf] }
 0x292   :  { %v3258_v19 = vadd.f32 %v3257_v7, %v3244_v52  ;;  %v3284_v47 = vadd.f32 %v11390_v55, %v3270_v51  ;;  %v10229_v55 = vld [vmem:[#allocation9 + $0xd4] sm:$0xf0]  ;;  %v9140_v51 = vld [vmem:[#allocation9 + $0x6d0] sm:$0xf0]  ;;  %v8474_v52 = vld [vmem:[#allocation9 + $0x188] sm:$0xf] }
 0x293   :  { %5142 = vmatpush.bf16.msrb.mxu3 %v8871_v15  ;;  %v8935_v15 = vor.u32 %v10366_v29, %v8932_v37  ;;  %v8363_v37 = vor.u32 %v10225_v41, %v8362_v13 }
 0x294   :  { %5156 = vmatpush.bf16.msrb.mxu1 %v8999_v60  ;;  %5128 = vmatpush.bf16.msra.mxu0 %v8743_v56  ;;  %v8788_v60 = vld [vmem:[#allocation9 + $0x410] sm:$0xf0]  ;;  %v3272_v18 = vadd.f32 %v3271_v6, %v3258_v19  ;;  %v3392_v33 = vmul.f32 0.2, %v3284_v47  ;;  %v10302_v56 = vld [vmem:[#allocation9 + $0x324] sm:$0xf] }
 0x295   :  { %v8791_v24 = vor.u32 %v10330_v42, %v8788_v60  ;;  %v8679_v29 = vor.u32 %v10302_v56, %v8676_v3  ;;  %v10253_v42 = vld [vmem:[#allocation9 + $0x194] sm:$0xf0]  ;;  %v9124_v19 = vld [vmem:[#allocation9 + $0x6b0] sm:$0xf0] }
 0x296   :  { %v3286_v32 = vadd.f32 %v3285_v9, %v3272_v18  ;;  %v3408_v17 = vmax.f32 %v3284_v47, %v3392_v33  ;;  %v8475_v6 = vor.u32 %v10253_v42, %v8474_v52  ;;  %v8458_v18 = vld [vmem:[#allocation9 + $0x168] sm:$0xf]  ;;  %v9076_v56 = vld [vmem:[#allocation9 + $0x650] sm:$0xf0]  ;;  %v10361_v52 = vld [vmem:[#allocation9 + $0x4f4] sm:$0xf0] }
 0x297   :  { %5143 = vmatpush.bf16.msrb.mxu3 %v8855_v48  ;;  %v8711_v48 = vor.u32 %v10310_v20, %v8708_v25  ;;  %v3297_v11 = vpop.f32.mrf.mxu2  ;;  %v10217_v20 = vld [vmem:[#allocation9 + $0x74] sm:$0xf0]  ;;  %v9127_v25 = vor.u32 %v10414_v35, %v9124_v19 }
 0x298   :  { %5157 = vmatpush.bf16.msrb.mxu1 %v8983_v63  ;;  %5129 = vmatpush.bf16.msra.mxu0 %v8727_v62  ;;  %v8378_v63 = vld [vmem:[#allocation9 + $0xc8] sm:$0xf]  ;;  %v10298_v62 = vld [vmem:[#allocation9 + $0x304] sm:$0xf] }
 0x299   :  { %v8379_v40 = vor.u32 %v10229_v55, %v8378_v63  ;;  %v8331_v63 = vor.u32 %v10217_v20, %v8330_v21 }
 0x29b   :  { %5144 = vmatpush.bf16.msrb.mxu3 %v8839_v31  ;;  %v3400_v31 = vmul.f32 0.2, %v3286_v32 }
 0x29c   :  { %5158 = vmatpush.bf16.msrb.mxu1 %v8967_v22  ;;  %5130 = vmatpush.bf16.msra.mxu0 %v8711_v48  ;;  %v10422_v22 = vld [vmem:[#allocation9 + $0x6e4] sm:$0xf] }
 0x29d   :  { %v3416_v16 = vmax.f32 %v3286_v32, %v3400_v31  ;;  %v9159_v49 = vor.u32 %v10422_v22, %v9156_v12  ;;  %v8314_v32 = vld [vmem:[#allocation9 + $0x48] sm:$0xf]  ;;  %v10406_v31 = vld [vmem:[#allocation9 + $0x664] sm:$0xf] }
 0x29f   :  { %5145 = vmatpush.bf16.msrb.mxu3 %v8823_v30  ;;  %v10257_v30 = vld [vmem:[#allocation9 + $0x1b4] sm:$0xf0]  ;;  %v11398_v9 = vpack.c.bf16 %v3416_v16, %v3408_v17  ;;  %v3299_v57 = vpop.f32.mrf.mxu2  ;;  %v8443_v17 = vor.u32 %v10245_v5, %v8442_v44  ;;  %v8298_v16 = vld [vmem:[#allocation9 + $0x28] sm:$0xf] }
 0x2a0   :  { %5159 = vmatpush.bf16.msrb.mxu1 %v8951_v8  ;;  %5131 = vmatpush.bf16.msra.mxu0 %v8695_v43  ;;  %v10623_v8 = vld [vmem:[#allocation8] sm:$0xff]  ;;  %v8491_v7 = vor.u32 %v10257_v30, %v8490_v53  ;;  %v8426_v53 = vld [vmem:[#allocation9 + $0x128] sm:$0xf]  ;;  %v10402_v30 = vld [vmem:[#allocation9 + $0x644] sm:$0xf] }
 0x2a1   :  { %v629_v2 = vperm.slane %v10623_v8, 7  ;;  %5064 = vmatmul.bf16.vlgmr.msrb.gmra.mxu2 %v11398_v9  ;;  %v9079_v38 = vor.u32 %v10402_v30, %v9076_v56  ;;  %v8858_v56 = vld [vmem:[#allocation9 + $0x488] sm:$0xf] }
 0x2a2   :  { %5168 = vmatpush.bf16.msrb.mxu2 %v9159_v49  ;;  %v10241_v49 = vld [vmem:[#allocation9 + $0x134] sm:$0xf0] }
 0x2a3   :  { %5146 = vmatpush.bf16.msrb.mxu3 %v8807_v36  ;;  %v9143_v36 = vor.u32 %v10418_v14, %v9140_v51  ;;  %v3298_v60 = vadd.f32 %v3297_v11, %v629_v2  ;;  %v3325_v61 = vpop.f32.mrf.mxu1  ;;  %v9092_v11 = vld [vmem:[#allocation9 + $0x670] sm:$0xf0]  ;;  %v8282_v14 = vld [vmem:[#allocation9 + $0x8] sm:$0xf] }
 0x2a4   :  { %5160 = vmatpush.bf16.msrb.mxu1 %v8935_v15  ;;  %5132 = vmatpush.bf16.msra.mxu0 %v8679_v29  ;;  %v8660_v15 = vld [vmem:[#allocation9 + $0x310] sm:$0xf0]  ;;  %v9095_v41 = vor.u32 %v10406_v31, %v9092_v11  ;;  %v10205_v29 = vld [vmem:[#allocation9 + $0x14] sm:$0xf0]  ;;  %v8874_v31 = vld [vmem:[#allocation9 + $0x4a8] sm:$0xf] }
 0x2a5   :  { %v8663_v47 = vor.u32 %v10298_v62, %v8660_v15  ;;  %v3312_v48 = vadd.f32 %v11395_v39, %v3298_v60  ;;  %v3300_v39 = vadd.f32 %v3299_v57, %v629_v2  ;;  %v8427_v2 = vor.u32 %v10241_v49, %v8426_v53  ;;  %v10393_v15 = vld [vmem:[#allocation9 + $0x5f4] sm:$0xf0]  ;;  %v10398_v60 = vld [vmem:[#allocation9 + $0x624] sm:$0xf]  ;;  %v9284_v53 = vld [vmem:[#allocation9 + $0x7f0] sm:$0xf0] }
 0x2a6   :  { %5169 = vmatpush.bf16.msrb.mxu2 %v9143_v36  ;;  %v9034_v36 = vld [vmem:[#allocation9 + $0x5e8] sm:$0xf]  ;;  %v8907_v57 = vor.u32 %v10361_v52, %v8906_v4  ;;  %v10353_v11 = vld [vmem:[#allocation9 + $0x4b4] sm:$0xf0]  ;;  %v10450_v52 = vld [vmem:[#allocation9 + $0x7c4] sm:$0xf] }
 0x2a7   :  { %5147 = vmatpush.bf16.msrb.mxu3 %v8791_v24  ;;  %v10249_v24 = vld [vmem:[#allocation9 + $0x174] sm:$0xf0]  ;;  %v3326_v27 = vadd.f32 %v3325_v61, %v3312_v48  ;;  %v3314_v51 = vadd.f32 %v3313_v46, %v3300_v39  ;;  %v9060_v61 = vld [vmem:[#allocation9 + $0x630] sm:$0xf0]  ;;  %v9035_v21 = vor.u32 %v10393_v15, %v9034_v36  ;;  %v9002_v39 = vld [vmem:[#allocation9 + $0x5a8] sm:$0xf] }
 0x2a8   :  { %5161 = vmatpush.bf16.msrb.mxu1 %v8919_v23  ;;  %5133 = vmatpush.bf16.msra.mxu0 %v8663_v47  ;;  %v10410_v23 = vld [vmem:[#allocation9 + $0x684] sm:$0xf]  ;;  %v8459_v33 = vor.u32 %v10249_v24, %v8458_v18  ;;  %v8283_v47 = vor.u32 %v10205_v29, %v8282_v14  ;;  %v9063_v20 = vor.u32 %v10398_v60, %v9060_v61  ;;  %v10357_v18 = vld [vmem:[#allocation9 + $0x4d4] sm:$0xf0]  ;;  %v9018_v24 = vld [vmem:[#allocation9 + $0x5c8] sm:$0xf] }
 0x2a9   :  { %v8986_v14 = vld [vmem:[#allocation9 + $0x588] sm:$0xf]  ;;  %v10345_v60 = vld [vmem:[#allocation9 + $0x474] sm:$0xf0] }
 0x2aa   :  { %5148 = vmatmul.bf16.vlgmr.msrb.gmra.mxu3 %v11377_v58  ;;  %5170 = vmatpush.bf16.msrb.mxu2 %v9127_v25  ;;  %v8890_v25 = vld [vmem:[#allocation9 + $0x4c8] sm:$0xf] }
 0x2ab   :  { %5196 = vmatpush.bf16.msra.mxu3 %v8395_v50  ;;  %5162 = vmatmul.bf16.vlgmr.msrb.gmra.mxu1 %v11380_v54  ;;  %v9108_v50 = vld [vmem:[#allocation9 + $0x690] sm:$0xf0]  ;;  %v3327_v1 = vpop.f32.mrf.mxu1  ;;  %v3367_v13 = vpop.f32.mrf.mxu0  ;;  %v8891_v5 = vor.u32 %v10357_v18, %v8890_v25  ;;  %v8842_v15 = vld [vmem:[#allocation9 + $0x468] sm:$0xf]  ;;  %v10341_v18 = vld [vmem:[#allocation9 + $0x454] sm:$0xf0] }
 0x2ac   :  { %5210 = vmatpush.bf16.msra.mxu1 %v8523_v10  ;;  %v10213_v10 = vld [vmem:[#allocation9 + $0x54] sm:$0xf0]  ;;  %v9111_v55 = vor.u32 %v10410_v23, %v9108_v50  ;;  %v3328_v42 = vadd.f32 %v3327_v1, %v3314_v51  ;;  %v10394_v50 = vld [vmem:[#allocation9 + $0x604] sm:$0xf]  ;;  %v8826_v25 = vld [vmem:[#allocation9 + $0x448] sm:$0xf] }
 0x2ad   :  { %v3339_v22 = vpop.f32.mrf.mxu3  ;;  %v8315_v12 = vor.u32 %v10213_v10, %v8314_v32  ;;  %v10389_v23 = vld [vmem:[#allocation9 + $0x5d4] sm:$0xf0]  ;;  %v8650_v10 = vld [vmem:[#allocation9 + $0x2e8] sm:$0xf] }
 0x2ae   :  { %v3340_v43 = vadd.f32 %v3339_v22, %v3326_v27  ;;  %5171 = vmatpush.bf16.msrb.mxu2 %v9111_v55  ;;  %v10297_v55 = vld [vmem:[#allocation9 + $0x2f4] sm:$0xf0]  ;;  %v9019_v27 = vor.u32 %v10389_v23, %v9018_v24 }
 0x2af   :  { %5197 = vmatpush.bf16.msra.mxu3 %v8379_v40  ;;  %v3353_v40 = vpop.f32.mrf.mxu2  ;;  %v10381_v51 = vld [vmem:[#allocation9 + $0x594] sm:$0xf0] }
 0x2b0   :  { %5211 = vmatpush.bf16.msra.mxu1 %v8507_v0  ;;  %v10209_v0 = vld [vmem:[#allocation9 + $0x34] sm:$0xf0]  ;;  %v3354_v3 = vadd.f32 %v3353_v40, %v3340_v43 }
 0x2b1   :  { %v8299_v8 = vor.u32 %v10209_v0, %v8298_v16  ;;  %5120 = vmatmul.bf16.vlgmr.msra.gmra.mxu2 %v11358_v34  ;;  %v10385_v43 = vld [vmem:[#allocation9 + $0x5b4] sm:$0xf0]  ;;  %v8634_v16 = vld [vmem:[#allocation9 + $0x2c8] sm:$0xf] }
 0x2b2   :  { %5172 = vmatpush.bf16.msrb.mxu2 %v9095_v41  ;;  %v3368_v35 = vadd.f32 %v3367_v13, %v3354_v3  ;;  %v10293_v0 = vld [vmem:[#allocation9 + $0x2d4] sm:$0xf0]  ;;  %v8875_v13 = vor.u32 %v10353_v11, %v8874_v31  ;;  %v10454_v41 = vld [vmem:[#allocation9 + $0x7e4] sm:$0xf]  ;;  %v9003_v30 = vor.u32 %v10385_v43, %v9002_v39  ;;  %v8938_v31 = vld [vmem:[#allocation9 + $0x528] sm:$0xf] }
 0x2b3   :  { %5198 = vmatpush.bf16.msra.mxu3 %v8363_v37  ;;  %v8410_v37 = vld [vmem:[#allocation9 + $0x108] sm:$0xf]  ;;  %v10349_v3 = vld [vmem:[#allocation9 + $0x494] sm:$0xf0] }
 0x2b4   :  { %5212 = vmatpush.bf16.msra.mxu1 %v8491_v7  ;;  %v10237_v7 = vld [vmem:[#allocation9 + $0x114] sm:$0xf0]  ;;  %v8859_v4 = vor.u32 %v10349_v3, %v8858_v56  ;;  %v8396_v56 = vld [vmem:[#allocation9 + $0xf8] sm:$0xf0]  ;;  %v10263_v3 = vld [vmem:[#allocation9 + $0x1ec] sm:$0xf] }
 0x2b5   :  { %v3341_v19 = vpop.f32.mrf.mxu3  ;;  %v10373_v23 = vld [vmem:[#allocation9 + $0x554] sm:$0xf0] }
 0x2b6   :  { %v3381_v62 = vpop.f32.mrf.mxu1  ;;  %v3342_v46 = vadd.f32 %v3341_v19, %v3328_v42  ;;  %5173 = vmatpush.bf16.msrb.mxu2 %v9079_v38  ;;  %v9287_v38 = vor.u32 %v10454_v41, %v9284_v53  ;;  %v8987_v42 = vor.u32 %v10381_v51, %v8986_v14  ;;  %v10377_v19 = vld [vmem:[#allocation9 + $0x574] sm:$0xf0]  ;;  %v8922_v41 = vld [vmem:[#allocation9 + $0x508] sm:$0xf] }
 0x2b7   :  { %5199 = vmatpush.bf16.msra.mxu3 %v8347_v26  ;;  %v8411_v26 = vor.u32 %v10237_v7, %v8410_v37  ;;  %v3382_v32 = vadd.f32 %v3381_v62, %v3368_v35  ;;  %v8618_v37 = vld [vmem:[#allocation9 + $0x2a8] sm:$0xf]  ;;  %v10289_v7 = vld [vmem:[#allocation9 + $0x2b4] sm:$0xf0]  ;;  %v9268_v62 = vld [vmem:[#allocation9 + $0x7d0] sm:$0xf0] }
 0x2b8   :  { %5213 = vmatpush.bf16.msra.mxu1 %v8475_v6  ;;  %v3355_v6 = vpop.f32.mrf.mxu2  ;;  %v8619_v61 = vor.u32 %v10289_v7, %v8618_v37  ;;  %v8970_v35 = vld [vmem:[#allocation9 + $0x568] sm:$0xf]  ;;  %v10369_v11 = vld [vmem:[#allocation9 + $0x534] sm:$0xf0] }
 0x2b9   :  { %v3356_v48 = vadd.f32 %v3355_v6, %v3342_v46  ;;  %v3393_v40 = vmul.f32 0.2, %v3382_v32  ;;  %v10285_v46 = vld [vmem:[#allocation9 + $0x294] sm:$0xf0]  ;;  %v10446_v6 = vld [vmem:[#allocation9 + $0x7a4] sm:$0xf] }
 0x2ba   :  { %5174 = vmatpush.bf16.msrb.mxu2 %v9063_v20  ;;  %v9252_v20 = vld [vmem:[#allocation9 + $0x7b0] sm:$0xf0]  ;;  %v10365_v53 = vld [vmem:[#allocation9 + $0x514] sm:$0xf0]  ;;  %v8554_v14 = vld [vmem:[#allocation9 + $0x228] sm:$0xf] }
 0x2bb   :  { %5200 = vmatpush.bf16.msra.mxu3 %v8331_v63  ;;  %v9044_v63 = vld [vmem:[#allocation9 + $0x610] sm:$0xf0]  ;;  %v10273_v51 = vld [vmem:[#allocation9 + $0x234] sm:$0xf0]  ;;  %v8923_v37 = vor.u32 %v10365_v53, %v8922_v41 }
 0x2bc   :  { %5214 = vmatpush.bf16.msra.mxu1 %v8459_v33  ;;  %v3369_v33 = vpop.f32.mrf.mxu0  ;;  %v9047_v1 = vor.u32 %v10394_v50, %v9044_v63  ;;  %v8586_v50 = vld [vmem:[#allocation9 + $0x268] sm:$0xf]  ;;  %v10281_v63 = vld [vmem:[#allocation9 + $0x274] sm:$0xf0] }
 0x2bd   :  { %v3370_v44 = vadd.f32 %v3369_v33, %v3356_v48  ;;  %v8954_v48 = vld [vmem:[#allocation9 + $0x548] sm:$0xf]  ;;  %v9255_v33 = vor.u32 %v10446_v6, %v9252_v20  ;;  %v10430_v6 = vld [vmem:[#allocation9 + $0x724] sm:$0xf]  ;;  %v10325_v53 = vld [vmem:[#allocation9 + $0x3d4] sm:$0xf0] }
 0x2be   :  { %v3383_v22 = vpop.f32.mrf.mxu1  ;;  %5175 = vmatpush.bf16.msrb.mxu2 %v9047_v1  ;;  %v8587_v1 = vor.u32 %v10281_v63, %v8586_v50  ;;  %v8492_v50 = vld [vmem:[#allocation9 + $0x1b8] sm:$0xf0] }
 0x2bf   :  { %5201 = vmatpush.bf16.msra.mxu3 %v8315_v12  ;;  %v8651_v12 = vor.u32 %v10297_v55, %v8650_v10  ;;  %v10442_v10 = vld [vmem:[#allocation9 + $0x784] sm:$0xf]  ;;  %v8955_v55 = vor.u32 %v10373_v23, %v8954_v48  ;;  %v10255_v23 = vld [vmem:[#allocation9 + $0x1ac] sm:$0xf] }
 0x2c0   :  { %5215 = vmatpush.bf16.msra.mxu1 %v8443_v17  ;;  %v3384_v17 = vadd.f32 %v3383_v22, %v3370_v44  ;;  %v9236_v44 = vld [vmem:[#allocation9 + $0x790] sm:$0xf0]  ;;  %v8570_v22 = vld [vmem:[#allocation9 + $0x248] sm:$0xf] }
 0x2c1   :  { %5176 = vmatmul.bf16.vlgmr.msrb.gmra.mxu2 %v11398_v9  ;;  %v9239_v39 = vor.u32 %v10442_v10, %v9236_v44  ;;  %v9172_v44 = vld [vmem:[#allocation9 + $0x710] sm:$0xf0] }
 0x2c2   :  { %v3401_v49 = vmul.f32 0.2, %v3384_v17  ;;  %5224 = vmatpush.bf16.msra.mxu2 %v8651_v12  ;;  %v10277_v12 = vld [vmem:[#allocation9 + $0x254] sm:$0xf0] }
 0x2c3   :  { %5202 = vmatpush.bf16.msra.mxu3 %v8299_v8  ;;  %v8635_v8 = vor.u32 %v10293_v0, %v8634_v16  ;;  %v8794_v16 = vld [vmem:[#allocation9 + $0x408] sm:$0xf]  ;;  %v8939_v0 = vor.u32 %v10369_v11, %v8938_v31  ;;  %v10219_v31 = vld [vmem:[#allocation9 + $0x8c] sm:$0xf]  ;;  %v8348_v11 = vld [vmem:[#allocation9 + $0x98] sm:$0xf0] }
 0x2c4   :  { %5216 = vmatpush.bf16.msra.mxu1 %v8427_v2  ;;  %v3409_v2 = vmax.f32 %v3382_v32, %v3393_v40  ;;  %v3417_v29 = vmax.f32 %v3384_v17, %v3401_v49  ;;  %v8827_v32 = vor.u32 %v10341_v18, %v8826_v25  ;;  %v10438_v40 = vld [vmem:[#allocation9 + $0x764] sm:$0xf]  ;;  %v9220_v17 = vld [vmem:[#allocation9 + $0x770] sm:$0xf0]  ;;  %v8571_v49 = vor.u32 %v10277_v12, %v8570_v22  ;;  %v10223_v18 = vld [vmem:[#allocation9 + $0xac] sm:$0xf] }
 0x2c5   :  { %v10251_v12 = vld [vmem:[#allocation9 + $0x18c] sm:$0xf] }
 0x2c6   :  { %v11407_v36 = vpack.c.bf16 %v3417_v29, %v3409_v2  ;;  %5225 = vmatpush.bf16.msra.mxu2 %v8635_v8  ;;  %v8524_v8 = vld [vmem:[#allocation9 + $0x1f8] sm:$0xf0]  ;;  %v9223_v2 = vor.u32 %v10438_v40, %v9220_v17  ;;  %v9130_v40 = vld [vmem:[#allocation9 + $0x6a8] sm:$0xf]  ;;  %v10417_v17 = vld [vmem:[#allocation9 + $0x6b4] sm:$0xf0] }
 0x2c7   :  { %5203 = vmatpush.bf16.msra.mxu3 %v8283_v47  ;;  %v8602_v47 = vld [vmem:[#allocation9 + $0x288] sm:$0xf] }
 0x2c8   :  { %5217 = vmatpush.bf16.msra.mxu1 %v8411_v26  ;;  %5078 = vmatmul.bf16.vlgmr.msrb.gmra.mxu0 %v11407_v36  ;;  %v9271_v26 = vor.u32 %v10450_v52, %v9268_v62  ;;  %v8603_v24 = vor.u32 %v10285_v46, %v8602_v47  ;;  %v8527_v52 = vor.u32 %v10263_v3, %v8524_v8  ;;  %v10227_v62 = vld [vmem:[#allocation9 + $0xcc] sm:$0xf]  ;;  %v9162_v46 = vld [vmem:[#allocation9 + $0x6e8] sm:$0xf]  ;;  %v8460_v8 = vld [vmem:[#allocation9 + $0x178] sm:$0xf0] }
 0x2c9   :  { %5182 = vmatpush.bf16.msrb.mxu0 %v9287_v38  ;;  %v10434_v38 = vld [vmem:[#allocation9 + $0x744] sm:$0xf]  ;;  %v10247_v3 = vld [vmem:[#allocation9 + $0x16c] sm:$0xf] }
 0x2ca   :  { %5204 = vmatmul.bf16.vlgmr.msra.gmra.mxu3 %v11353_v45  ;;  %5226 = vmatpush.bf16.msra.mxu2 %v8619_v61  ;;  %v8508_v61 = vld [vmem:[#allocation9 + $0x1d8] sm:$0xf0] }
 0x2cb   :  { %5252 = vmatpush.bf16.msrb.mxu3 %v8907_v57  ;;  %5218 = vmatmul.bf16.vlgmr.msra.gmra.mxu1 %v11356_v28  ;;  %v8843_v57 = vor.u32 %v10345_v60, %v8842_v15  ;;  %v8380_v15 = vld [vmem:[#allocation9 + $0xd8] sm:$0xf0]  ;;  %v10259_v60 = vld [vmem:[#allocation9 + $0x1cc] sm:$0xf] }
 0x2cc   :  { %5266 = vmatpush.bf16.msrb.mxu1 %v9035_v21  ;;  %v8971_v21 = vor.u32 %v10377_v19, %v8970_v35  ;;  %v8538_v35 = vld [vmem:[#allocation9 + $0x208] sm:$0xf]  ;;  %v10269_v19 = vld [vmem:[#allocation9 + $0x214] sm:$0xf0]  ;;  %v8511_v20 = vor.u32 %v10259_v60, %v8508_v61 }
 0x2cd   :  { %5183 = vmatpush.bf16.msrb.mxu0 %v9271_v26  ;;  %v10425_v26 = vld [vmem:[#allocation9 + $0x6f4] sm:$0xf0]  ;;  %v8539_v25 = vor.u32 %v10269_v19, %v8538_v35  ;;  %v9098_v60 = vld [vmem:[#allocation9 + $0x668] sm:$0xf] }
 0x2ce   :  { %5227 = vmatpush.bf16.msra.mxu2 %v8603_v24  ;;  %v8364_v24 = vld [vmem:[#allocation9 + $0xb8] sm:$0xf0]  ;;  %v9163_v48 = vor.u32 %v10425_v26, %v9162_v46  ;;  %v10409_v61 = vld [vmem:[#allocation9 + $0x674] sm:$0xf0] }
 0x2cf   :  { %5253 = vmatpush.bf16.msrb.mxu3 %v8891_v5  ;;  %v8810_v5 = vld [vmem:[#allocation9 + $0x428] sm:$0xf]  ;;  %v8367_v10 = vor.u32 %v10223_v18, %v8364_v24  ;;  %v10317_v26 = vld [vmem:[#allocation9 + $0x394] sm:$0xf0] }
 0x2d0   :  { %5267 = vmatpush.bf16.msrb.mxu1 %v9019_v27  ;;  %v10337_v27 = vld [vmem:[#allocation9 + $0x434] sm:$0xf0]  ;;  %v9082_v18 = vld [vmem:[#allocation9 + $0x648] sm:$0xf] }
 0x2d1   :  { %5184 = vmatpush.bf16.msrb.mxu0 %v9255_v33  ;;  %v8811_v43 = vor.u32 %v10337_v27, %v8810_v5  ;;  %v9146_v33 = vld [vmem:[#allocation9 + $0x6c8] sm:$0xf]  ;;  %v8495_v27 = vor.u32 %v10255_v23, %v8492_v50  ;;  %v10405_v24 = vld [vmem:[#allocation9 + $0x654] sm:$0xf0] }
 0x2d2   :  { %5228 = vmatpush.bf16.msra.mxu2 %v8587_v1  ;;  %v8778_v5 = vld [vmem:[#allocation9 + $0x3e8] sm:$0xf]  ;;  %v10329_v1 = vld [vmem:[#allocation9 + $0x3f4] sm:$0xf0] }
 0x2d3   :  { %5254 = vmatpush.bf16.msrb.mxu3 %v8875_v13  ;;  %v10333_v13 = vld [vmem:[#allocation9 + $0x414] sm:$0xf0]  ;;  %v8714_v50 = vld [vmem:[#allocation9 + $0x368] sm:$0xf] }
 0x2d4   :  { %5268 = vmatpush.bf16.msrb.mxu1 %v9003_v30  ;;  %v10231_v30 = vld [vmem:[#allocation9 + $0xec] sm:$0xf]  ;;  %v8795_v29 = vor.u32 %v10333_v13, %v8794_v16  ;;  %v8779_v16 = vor.u32 %v10329_v1, %v8778_v5  ;;  %v8762_v13 = vld [vmem:[#allocation9 + $0x3c8] sm:$0xf]  ;;  %v9083_v5 = vor.u32 %v10405_v24, %v9082_v18  ;;  %v8908_v1 = vld [vmem:[#allocation9 + $0x4f8] sm:$0xf0] }
 0x2d5   :  { %5185 = vmatpush.bf16.msrb.mxu0 %v9239_v39  ;;  %v8399_v7 = vor.u32 %v10231_v30, %v8396_v56  ;;  %v8476_v39 = vld [vmem:[#allocation9 + $0x198] sm:$0xf0]  ;;  %v9131_v56 = vor.u32 %v10417_v17, %v9130_v40  ;;  %v10379_v18 = vld [vmem:[#allocation9 + $0x58c] sm:$0xf] }
 0x2d6   :  { %5229 = vmatpush.bf16.msra.mxu2 %v8571_v49  ;;  %v8479_v41 = vor.u32 %v10251_v12, %v8476_v39  ;;  %v10215_v49 = vld [vmem:[#allocation9 + $0x6c] sm:$0xf]  ;;  %v8332_v30 = vld [vmem:[#allocation9 + $0x78] sm:$0xf0]  ;;  %v10401_v12 = vld [vmem:[#allocation9 + $0x634] sm:$0xf0] }
 0x2d7   :  { %5255 = vmatpush.bf16.msrb.mxu3 %v8859_v4  ;;  %v9204_v4 = vld [vmem:[#allocation9 + $0x750] sm:$0xf0]  ;;  %v8988_v24 = vld [vmem:[#allocation9 + $0x598] sm:$0xf0] }
 0x2d8   :  { %5269 = vmatpush.bf16.msrb.mxu1 %v8987_v42  ;;  %v8555_v42 = vor.u32 %v10273_v51, %v8554_v14  ;;  %5134 = vmatmul.bf16.vlgmr.msra.gmra.mxu0 %v11360_v59  ;;  %v9207_v47 = vor.u32 %v10434_v38, %v9204_v4  ;;  %v9114_v14 = vld [vmem:[#allocation9 + $0x688] sm:$0xf]  ;;  %v10413_v51 = vld [vmem:[#allocation9 + $0x694] sm:$0xf0]  ;;  %v10211_v4 = vld [vmem:[#allocation9 + $0x4c] sm:$0xf] }
 0x2d9   :  { %5186 = vmatpush.bf16.msrb.mxu0 %v9223_v2  ;;  %v8763_v2 = vor.u32 %v10325_v53, %v8762_v13  ;;  %v10321_v38 = vld [vmem:[#allocation9 + $0x3b4] sm:$0xf0]  ;;  %v10355_v53 = vld [vmem:[#allocation9 + $0x4cc] sm:$0xf] }
 0x2da   :  { %5230 = vmatpush.bf16.msra.mxu2 %v8555_v42  ;;  %v9115_v42 = vor.u32 %v10413_v51, %v9114_v14  ;;  %v10295_v51 = vld [vmem:[#allocation9 + $0x2ec] sm:$0xf] }
 0x2db   :  { %5256 = vmatpush.bf16.msrb.mxu3 %v8843_v57  ;;  %v8383_v57 = vor.u32 %v10227_v62, %v8380_v15  ;;  %v10243_v62 = vld [vmem:[#allocation9 + $0x14c] sm:$0xf]  ;;  %v8444_v15 = vld [vmem:[#allocation9 + $0x158] sm:$0xf0] }
 0x2dc   :  { %5270 = vmatpush.bf16.msrb.mxu1 %v8971_v21  ;;  %v9188_v21 = vld [vmem:[#allocation9 + $0x730] sm:$0xf0]  ;;  %v8447_v46 = vor.u32 %v10243_v62, %v8444_v15  ;;  %v10383_v15 = vld [vmem:[#allocation9 + $0x5ac] sm:$0xf] }
 0x2dd   :  { %5187 = vmatpush.bf16.msrb.mxu0 %v9207_v47  ;;  %v9191_v63 = vor.u32 %v10430_v6, %v9188_v21  ;;  %v8730_v47 = vld [vmem:[#allocation9 + $0x388] sm:$0xf]  ;;  %v8300_v6 = vld [vmem:[#allocation9 + $0x38] sm:$0xf0]  ;;  %v9099_v21 = vor.u32 %v10409_v61, %v9098_v60 }
 0x2de   :  { %5231 = vmatpush.bf16.msra.mxu2 %v8539_v25  ;;  %v8428_v25 = vld [vmem:[#allocation9 + $0x138] sm:$0xf0] }
 0x2df   :  { %5257 = vmatpush.bf16.msrb.mxu3 %v8827_v32  ;;  %v10421_v32 = vld [vmem:[#allocation9 + $0x6d4] sm:$0xf0]  ;;  %v9004_v60 = vld [vmem:[#allocation9 + $0x5b8] sm:$0xf0] }
 0x2e0   :  { %5271 = vmatpush.bf16.msrb.mxu1 %v8955_v55  ;;  %v10426_v55 = vld [vmem:[#allocation9 + $0x704] sm:$0xf]  ;;  %v9147_v22 = vor.u32 %v10421_v32, %v9146_v33  ;;  %v10203_v33 = vld [vmem:[#allocation9 + $0xc] sm:$0xf] }
 0x2e1   :  { %5188 = vmatpush.bf16.msrb.mxu0 %v9191_v63  ;;  %5232 = vmatmul.bf16.vlgmr.msra.gmra.mxu2 %v11358_v34  ;;  %v10313_v63 = vld [vmem:[#allocation9 + $0x374] sm:$0xf0] }
 0x2e2   :  { %5280 = vmatpush.bf16.msrb.mxu2 %v9163_v48  ;;  %v8731_v48 = vor.u32 %v10317_v26, %v8730_v47  ;;  %v8715_v39 = vor.u32 %v10313_v63, %v8714_v50  ;;  %v10301_v26 = vld [vmem:[#allocation9 + $0x314] sm:$0xf0] }
 0x2e3   :  { %5258 = vmatpush.bf16.msrb.mxu3 %v8811_v43  ;;  %v9175_v43 = vor.u32 %v10426_v55, %v9172_v44  ;;  %v10235_v55 = vld [vmem:[#allocation9 + $0x10c] sm:$0xf]  ;;  %v8412_v44 = vld [vmem:[#allocation9 + $0x118] sm:$0xf0] }
 0x2e4   :  { %5272 = vmatpush.bf16.msrb.mxu1 %v8939_v0  ;;  %v8351_v0 = vor.u32 %v10219_v31, %v8348_v11  ;;  %v10391_v31 = vld [vmem:[#allocation9 + $0x5ec] sm:$0xf]  ;;  %v9036_v11 = vld [vmem:[#allocation9 + $0x5f8] sm:$0xf0]  ;;  %v8415_v40 = vor.u32 %v10235_v55, %v8412_v44 }
 0x2e5   :  { %5189 = vmatpush.bf16.msrb.mxu0 %v9175_v43  ;;  %v9039_v13 = vor.u32 %v10391_v31, %v9036_v11  ;;  %v10343_v55 = vld [vmem:[#allocation9 + $0x46c] sm:$0xf]  ;;  %v8844_v44 = vld [vmem:[#allocation9 + $0x478] sm:$0xf0] }
 0x2e6   :  { %5281 = vmatpush.bf16.msrb.mxu2 %v9147_v22  ;;  %v9066_v22 = vld [vmem:[#allocation9 + $0x628] sm:$0xf]  ;;  %v10283_v31 = vld [vmem:[#allocation9 + $0x28c] sm:$0xf]  ;;  %v8604_v11 = vld [vmem:[#allocation9 + $0x298] sm:$0xf0] }
 0x2e7   :  { %5259 = vmatpush.bf16.msrb.mxu3 %v8795_v29  ;;  %v8335_v29 = vor.u32 %v10215_v49, %v8332_v30  ;;  %v8892_v49 = vld [vmem:[#allocation9 + $0x4d8] sm:$0xf0]  ;;  %v10387_v30 = vld [vmem:[#allocation9 + $0x5cc] sm:$0xf] }
 0x2e8   :  { %5273 = vmatpush.bf16.msrb.mxu1 %v8923_v37  ;;  %v8746_v37 = vld [vmem:[#allocation9 + $0x3a8] sm:$0xf]  ;;  %5190 = vmatmul.bf16.vlgmr.msrb.gmra.mxu0 %v11407_v36 }
 0x2e9   :  { %5238 = vmatpush.bf16.msra.mxu0 %v8779_v16  ;;  %v8747_v35 = vor.u32 %v10321_v38, %v8746_v37  ;;  %v8698_v16 = vld [vmem:[#allocation9 + $0x348] sm:$0xf] }
 0x2ea   :  { %5260 = vmatmul.bf16.vlgmr.msrb.gmra.mxu3 %v11377_v58  ;;  %5282 = vmatpush.bf16.msrb.mxu2 %v9131_v56  ;;  %v9020_v56 = vld [vmem:[#allocation9 + $0x5d8] sm:$0xf0]  ;;  %v8682_v37 = vld [vmem:[#allocation9 + $0x328] sm:$0xf] }
 0x2eb   :  { %5308 = vmatpush.bf16.msra.mxu3 %v8399_v7  ;;  %5274 = vmatmul.bf16.vlgmr.msrb.gmra.mxu1 %v11380_v54  ;;  %v8463_v7 = vor.u32 %v10247_v3, %v8460_v8  ;;  %v9050_v3 = vld [vmem:[#allocation9 + $0x608] sm:$0xf]  ;;  %v10397_v8 = vld [vmem:[#allocation9 + $0x614] sm:$0xf0]  ;;  %v9023_v38 = vor.u32 %v10387_v30, %v9020_v56 }
 0x2ec   :  { %5322 = vmatpush.bf16.msra.mxu1 %v8527_v52  ;;  %v8316_v52 = vld [vmem:[#allocation9 + $0x58] sm:$0xf0] }
 0x2ed   :  { %5239 = vmatpush.bf16.msra.mxu0 %v8763_v2  ;;  %v8319_v19 = vor.u32 %v10211_v4, %v8316_v52  ;;  %v8652_v2 = vld [vmem:[#allocation9 + $0x2f8] sm:$0xf0]  ;;  %v9051_v4 = vor.u32 %v10397_v8, %v9050_v3  ;;  %v10351_v52 = vld [vmem:[#allocation9 + $0x4ac] sm:$0xf]  ;;  %v9242_v3 = vld [vmem:[#allocation9 + $0x788] sm:$0xf] }
 0x2ee   :  { %5283 = vmatpush.bf16.msrb.mxu2 %v9115_v42  ;;  %v8876_v42 = vld [vmem:[#allocation9 + $0x4b8] sm:$0xf0]  ;;  %v8655_v62 = vor.u32 %v10295_v51, %v8652_v2  ;;  %v10335_v51 = vld [vmem:[#allocation9 + $0x42c] sm:$0xf] }
 0x2ef   :  { %5309 = vmatpush.bf16.msra.mxu3 %v8383_v57  ;;  %v10207_v57 = vld [vmem:[#allocation9 + $0x2c] sm:$0xf]  ;;  %v8879_v47 = vor.u32 %v10351_v52, %v8876_v42  ;;  %v8812_v2 = vld [vmem:[#allocation9 + $0x438] sm:$0xf0] }
 0x2f0   :  { %5323 = vmatpush.bf16.msra.mxu1 %v8511_v20  ;;  %v10239_v20 = vld [vmem:[#allocation9 + $0x12c] sm:$0xf]  ;;  %v8303_v23 = vor.u32 %v10207_v57, %v8300_v6  ;;  %v9290_v57 = vld [vmem:[#allocation9 + $0x7e8] sm:$0xf]  ;;  %v9007_v6 = vor.u32 %v10383_v15, %v9004_v60  ;;  %v8815_v42 = vor.u32 %v10335_v51, %v8812_v2  ;;  %v10441_v15 = vld [vmem:[#allocation9 + $0x774] sm:$0xf0] }
 0x2f1   :  { %5240 = vmatpush.bf16.msra.mxu0 %v8747_v35  ;;  %v8431_v32 = vor.u32 %v10239_v20, %v8428_v25  ;;  %v10291_v35 = vld [vmem:[#allocation9 + $0x2cc] sm:$0xf]  ;;  %v10504_v51 = vld [vmem:[#allocation12 + $0x170] sm:$0xf0]  ;;  %v8764_v2 = vld [vmem:[#allocation9 + $0x3d8] sm:$0xf0] }
 0x2f2   :  { %5284 = vmatpush.bf16.msrb.mxu2 %v9099_v21  ;;  %v10457_v21 = vld [vmem:[#allocation9 + $0x7f4] sm:$0xf0]  ;;  %v10347_v20 = vld [vmem:[#allocation9 + $0x48c] sm:$0xf] }
 0x2f3   :  { %5310 = vmatpush.bf16.msra.mxu3 %v8367_v10  ;;  %v8284_v10 = vld [vmem:[#allocation9 + $0x18] sm:$0xf0]  ;;  %v9291_v50 = vor.u32 %v10457_v21, %v9290_v57  ;;  %v10480_v57 = vld [vmem:[#allocation12 + $0xb0] sm:$0xf0] }
 0x2f4   :  { %5324 = vmatpush.bf16.msra.mxu1 %v8495_v27  ;;  %v10359_v27 = vld [vmem:[#allocation9 + $0x4ec] sm:$0xf]  ;;  %v8287_v43 = vor.u32 %v10203_v33, %v8284_v10  ;;  %v9274_v33 = vld [vmem:[#allocation9 + $0x7c8] sm:$0xf]  ;;  %v10453_v10 = vld [vmem:[#allocation9 + $0x7d4] sm:$0xf0] }
 0x2f5   :  { %5241 = vmatpush.bf16.msra.mxu0 %v8731_v48  ;;  %v8911_v17 = vor.u32 %v10359_v27, %v8908_v1  ;;  %v10287_v48 = vld [vmem:[#allocation9 + $0x2ac] sm:$0xf]  ;;  %v8972_v1 = vld [vmem:[#allocation9 + $0x578] sm:$0xf0] }
 0x2f6   :  { %5285 = vmatpush.bf16.msrb.mxu2 %v9083_v5  ;;  %v10375_v27 = vld [vmem:[#allocation9 + $0x56c] sm:$0xf]  ;;  %v8556_v21 = vld [vmem:[#allocation9 + $0x238] sm:$0xf0] }
 0x2f7   :  { %5311 = vmatpush.bf16.msra.mxu3 %v8351_v0  ;;  %v10309_v0 = vld [vmem:[#allocation9 + $0x354] sm:$0xf0] }
 0x2f8   :  { %5325 = vmatpush.bf16.msra.mxu1 %v8479_v41  ;;  %v9067_v41 = vor.u32 %v10401_v12, %v9066_v22  ;;  %v8699_v14 = vor.u32 %v10309_v0, %v8698_v16  ;;  %v9275_v22 = vor.u32 %v10453_v10, %v9274_v33  ;;  %v8847_v12 = vor.u32 %v10343_v55, %v8844_v44  ;;  %v8828_v16 = vld [vmem:[#allocation9 + $0x458] sm:$0xf0]  ;;  %v10423_v10 = vld [vmem:[#allocation9 + $0x6ec] sm:$0xf]  ;;  %v9194_v44 = vld [vmem:[#allocation9 + $0x728] sm:$0xf] }
 0x2f9   :  { %5242 = vmatpush.bf16.msra.mxu0 %v8715_v39  ;;  %v9258_v39 = vld [vmem:[#allocation9 + $0x7a8] sm:$0xf]  ;;  %v8607_v0 = vor.u32 %v10283_v31, %v8604_v11  ;;  %v8540_v33 = vld [vmem:[#allocation9 + $0x218] sm:$0xf0] }
 0x2fa   :  { %5286 = vmatpush.bf16.msrb.mxu2 %v9067_v41  ;;  %v8956_v41 = vld [vmem:[#allocation9 + $0x558] sm:$0xf0]  ;;  %v10474_v11 = vld [vmem:[#allocation12 + $0x80] sm:$0xf0] }
 0x2fb   :  { %5312 = vmatpush.bf16.msra.mxu3 %v8335_v29  ;;  %v8895_v29 = vor.u32 %v10355_v53, %v8892_v49  ;;  %v10279_v53 = vld [vmem:[#allocation9 + $0x26c] sm:$0xf]  ;;  %v8588_v49 = vld [vmem:[#allocation9 + $0x278] sm:$0xf0] }
 0x2fc   :  { %5326 = vmatpush.bf16.msra.mxu1 %v8463_v7  ;;  %v10305_v7 = vld [vmem:[#allocation9 + $0x334] sm:$0xf0]  ;;  %v9164_v55 = vld [vmem:[#allocation9 + $0x6f8] sm:$0xf0] }
 0x2fd   :  { %5243 = vmatpush.bf16.msra.mxu0 %v8699_v14  ;;  %v8683_v61 = vor.u32 %v10305_v7, %v8682_v37  ;;  %v10445_v14 = vld [vmem:[#allocation9 + $0x794] sm:$0xf0]  ;;  %v10367_v37 = vld [vmem:[#allocation9 + $0x52c] sm:$0xf]  ;;  %v8940_v7 = vld [vmem:[#allocation9 + $0x538] sm:$0xf0] }
 0x2fe   :  { %5287 = vmatpush.bf16.msrb.mxu2 %v9051_v4  ;;  %v8572_v4 = vld [vmem:[#allocation9 + $0x258] sm:$0xf0]  ;;  %v9243_v52 = vor.u32 %v10445_v14, %v9242_v3  ;;  %v8943_v60 = vor.u32 %v10367_v37, %v8940_v7  ;;  %v10323_v3 = vld [vmem:[#allocation9 + $0x3cc] sm:$0xf]  ;;  %v10468_v37 = vld [vmem:[#allocation12 + $0x50] sm:$0xf0] }
 0x2ff   :  { %5313 = vmatpush.bf16.msra.mxu3 %v8319_v19  ;;  %v8636_v19 = vld [vmem:[#allocation9 + $0x2d8] sm:$0xf0]  ;;  %v9478_v14 = vld [vmem:[#allocation12 + $0x168] sm:$0xf] }
 0x300   :  { %5327 = vmatpush.bf16.msra.mxu1 %v8447_v46  ;;  %v8666_v46 = vld [vmem:[#allocation9 + $0x308] sm:$0xf]  ;;  %v8639_v25 = vor.u32 %v10291_v35, %v8636_v19  ;;  %v8796_v35 = vld [vmem:[#allocation9 + $0x418] sm:$0xf0]  ;;  %v10363_v19 = vld [vmem:[#allocation9 + $0x50c] sm:$0xf]  ;;  %v9479_v7 = vor.u32 %v10504_v51, %v9478_v14 }
 0x301   :  { %5244 = vmatpush.bf16.msra.mxu0 %v8683_v61  ;;  %5288 = vmatmul.bf16.vlgmr.msrb.gmra.mxu2 %v11398_v9  ;;  %v10331_v61 = vld [vmem:[#allocation9 + $0x40c] sm:$0xf]  ;;  %v9358_v31 = vld [vmem:[#allocation12 + $0x78] sm:$0xf]  ;;  %v9372_v14 = vld [vmem:[#allocation12 + $0x9c] sm:$0xf0] }
 0x302   :  { %5336 = vmatpush.bf16.msra.mxu2 %v8655_v62  ;;  %v9226_v62 = vld [vmem:[#allocation9 + $0x768] sm:$0xf]  ;;  %v11431_v51 = vld [vmem:[#allocation11] sm:$0xf] }
 0x303   :  { %5314 = vmatpush.bf16.msra.mxu3 %v8303_v23  ;;  %v8620_v23 = vld [vmem:[#allocation9 + $0x2b8] sm:$0xf0] }
 0x304   :  { %5328 = vmatpush.bf16.msra.mxu1 %v8431_v32  ;;  %v8991_v32 = vor.u32 %v10379_v18, %v8988_v24  ;;  %v8623_v5 = vor.u32 %v10287_v48, %v8620_v23  ;;  %v9210_v18 = vld [vmem:[#allocation9 + $0x748] sm:$0xf]  ;;  %v10437_v24 = vld [vmem:[#allocation9 + $0x754] sm:$0xf0]  ;;  %v9370_v23 = vld [vmem:[#allocation12 + $0x90] sm:$0xf] }
 0x306   :  { %5337 = vmatpush.bf16.msra.mxu2 %v8639_v25 }
 0x307   :  { %5315 = vmatpush.bf16.msra.mxu3 %v8287_v43  ;;  %v8975_v43 = vor.u32 %v10375_v27, %v8972_v1 }
 0x308   :  { %5329 = vmatpush.bf16.msra.mxu1 %v8415_v40  ;;  %v10449_v40 = vld [vmem:[#allocation9 + $0x7b4] sm:$0xf0] }
 0x309   :  { %v9259_v30 = vor.u32 %v10449_v40, %v9258_v39  ;;  %v10419_v39 = vld [vmem:[#allocation9 + $0x6cc] sm:$0xf]  ;;  %v9178_v40 = vld [vmem:[#allocation9 + $0x708] sm:$0xf] }
 0x30a   :  { %5316 = vmatmul.bf16.vlgmr.msra.gmra.mxu3 %v11353_v45  ;;  %v8860_v45 = vld [vmem:[#allocation9 + $0x498] sm:$0xf0]  ;;  %5338 = vmatpush.bf16.msra.mxu2 %v8623_v5  ;;  %v10433_v5 = vld [vmem:[#allocation9 + $0x734] sm:$0xf0] }
 0x30b   :  { %5364 = vmatpush.bf16.msrb.mxu3 %v8911_v17  ;;  %5330 = vmatmul.bf16.vlgmr.msra.gmra.mxu1 %v11356_v28  ;;  %v8667_v28 = vor.u32 %v10301_v26, %v8666_v46  ;;  %v8863_v63 = vor.u32 %v10347_v20, %v8860_v45  ;;  %v10339_v17 = vld [vmem:[#allocation9 + $0x44c] sm:$0xf]  ;;  %v8924_v46 = vld [vmem:[#allocation9 + $0x518] sm:$0xf0]  ;;  %v9227_v20 = vor.u32 %v10441_v15, %v9226_v62  ;;  %v9466_v15 = vld [vmem:[#allocation12 + $0x150] sm:$0xf] }
 0x30c   :  { %5378 = vmatpush.bf16.msrb.mxu1 %v9039_v13  ;;  %v10371_v13 = vld [vmem:[#allocation9 + $0x54c] sm:$0xf]  ;;  %v8831_v56 = vor.u32 %v10339_v17, %v8828_v16  ;;  %v8799_v45 = vor.u32 %v10331_v61, %v8796_v35  ;;  %v8927_v25 = vor.u32 %v10363_v19, %v8924_v46  ;;  %v10429_v17 = vld [vmem:[#allocation9 + $0x714] sm:$0xf0]  ;;  %v8748_v61 = vld [vmem:[#allocation9 + $0x3b8] sm:$0xf0] }
 0x30d   :  { %5245 = vmatpush.bf16.msra.mxu0 %v8667_v28  ;;  %v8959_v8 = vor.u32 %v10371_v13, %v8956_v41  ;;  %v9382_v26 = vld [vmem:[#allocation12 + $0xa8] sm:$0xf]  ;;  %v8780_v13 = vld [vmem:[#allocation9 + $0x3f8] sm:$0xf0]  ;;  %v9346_v41 = vld [vmem:[#allocation12 + $0x60] sm:$0xf] }
 0x30e   :  { %5339 = vmatpush.bf16.msra.mxu2 %v8607_v0  ;;  %v9383_v28 = vor.u32 %v10480_v57, %v9382_v26  ;;  %v10327_v16 = vld [vmem:[#allocation9 + $0x3ec] sm:$0xf]  ;;  %v9359_v0 = vor.u32 %v10474_v11, %v9358_v31  ;;  %v9322_v35 = vld [vmem:[#allocation12 + $0x30] sm:$0xf]  ;;  %v10465_v19 = vld [vmem:[#allocation12 + $0x38] sm:$0xf0]  ;;  %v11423_v26 = vpop.f32.mrf.mxu3 }
 0x30f   :  { %5365 = vmatpush.bf16.msrb.mxu3 %v8895_v29  ;;  %v8591_v29 = vor.u32 %v10279_v53, %v8588_v49  ;;  %v10471_v53 = vld [vmem:[#allocation12 + $0x68] sm:$0xf0]  ;;  %v10319_v62 = vld [vmem:[#allocation9 + $0x3ac] sm:$0xf]  ;;  %v8716_v31 = vld [vmem:[#allocation9 + $0x378] sm:$0xf0] }
 0x310   :  { %5379 = vmatpush.bf16.msrb.mxu1 %v9023_v38  ;;  %5246 = vmatmul.bf16.vlgmr.msra.gmra.mxu0 %v11360_v59  ;;  %v10275_v38 = vld [vmem:[#allocation9 + $0x24c] sm:$0xf]  ;;  %v9298_v11 = vld [vmem:[#allocation12] sm:$0xf] }
 0x311   :  { %5294 = vmatpush.bf16.msrb.mxu0 %v9291_v50  ;;  %v10477_v50 = vld [vmem:[#allocation12 + $0x98] sm:$0xf0]  ;;  %v10407_v57 = vld [vmem:[#allocation9 + $0x66c] sm:$0xf] }
 0x312   :  { %5340 = vmatpush.bf16.msra.mxu2 %v8591_v29  ;;  %v9371_v27 = vor.u32 %v10477_v50, %v9370_v23  ;;  %v9334_v29 = vld [vmem:[#allocation12 + $0x48] sm:$0xf]  ;;  %v10462_v23 = vld [vmem:[#allocation12 + $0x20] sm:$0xf0] }
 0x313   :  { %5366 = vmatpush.bf16.msrb.mxu3 %v8879_v47  ;;  %v8575_v47 = vor.u32 %v10275_v38, %v8572_v4  ;;  %v10411_v4 = vld [vmem:[#allocation9 + $0x68c] sm:$0xf] }
 0x314   :  { %5380 = vmatpush.bf16.msrb.mxu1 %v9007_v6  ;;  %v10271_v6 = vld [vmem:[#allocation9 + $0x22c] sm:$0xf] }
 0x315   :  { %5295 = vmatpush.bf16.msrb.mxu0 %v9275_v22  ;;  %v8559_v48 = vor.u32 %v10271_v6, %v8556_v21  ;;  %v9167_v22 = vor.u32 %v10423_v10, %v9164_v55  ;;  %v9100_v6 = vld [vmem:[#allocation9 + $0x678] sm:$0xf0]  ;;  %v8751_v21 = vor.u32 %v10319_v62, %v8748_v61 }
 0x316   :  { %5341 = vmatpush.bf16.msra.mxu2 %v8575_v47  ;;  %v9084_v10 = vld [vmem:[#allocation9 + $0x658] sm:$0xf0] }
 0x317   :  { %5367 = vmatpush.bf16.msrb.mxu3 %v8863_v63  ;;  %v10267_v63 = vld [vmem:[#allocation9 + $0x20c] sm:$0xf]  ;;  %v8684_v62 = vld [vmem:[#allocation9 + $0x338] sm:$0xf0] }
 0x318   :  { %5381 = vmatpush.bf16.msrb.mxu1 %v8991_v32  ;;  %v9211_v32 = vor.u32 %v10437_v24, %v9210_v18  ;;  %v8543_v1 = vor.u32 %v10267_v63, %v8540_v33  ;;  %v10498_v18 = vld [vmem:[#allocation12 + $0x140] sm:$0xf0]  ;;  %v11425_v24 = vpop.f32.mrf.mxu1  ;;  %v9103_v63 = vor.u32 %v10407_v57, %v9100_v6  ;;  %v11427_v33 = vpop.f32.mrf.mxu2  ;;  %v9406_v57 = vld [vmem:[#allocation12 + $0xd8] sm:$0xf] }
 0x319   :  { %5296 = vmatpush.bf16.msrb.mxu0 %v9259_v30  ;;  %v10415_v30 = vld [vmem:[#allocation9 + $0x6ac] sm:$0xf]  ;;  %v10486_v6 = vld [vmem:[#allocation12 + $0xe0] sm:$0xf0] }
 0x31a   :  { %5342 = vmatpush.bf16.msra.mxu2 %v8559_v48  ;;  %v9310_v48 = vld [vmem:[#allocation12 + $0x18] sm:$0xf] }
 0x31b   :  { %5368 = vmatpush.bf16.msrb.mxu3 %v8847_v12  ;;  %v9195_v12 = vor.u32 %v10433_v5, %v9194_v44  ;;  %v10311_v44 = vld [vmem:[#allocation9 + $0x36c] sm:$0xf]  ;;  %v9311_v5 = vor.u32 %v10462_v23, %v9310_v48  ;;  %v9292_v23 = vld [vmem:[#allocation9 + $0x7f8] sm:$0xf0] }
 0x31c   :  { %5382 = vmatpush.bf16.msrb.mxu1 %v8975_v43  ;;  %v9148_v43 = vld [vmem:[#allocation9 + $0x6d8] sm:$0xf0] }
 0x31d   :  { %5297 = vmatpush.bf16.msrb.mxu0 %v9243_v52  ;;  %v9151_v49 = vor.u32 %v10419_v39, %v9148_v43  ;;  %v9116_v52 = vld [vmem:[#allocation9 + $0x698] sm:$0xf0]  ;;  %v10479_v43 = vld [vmem:[#allocation12 + $0xac] sm:$0xf] }
 0x31e   :  { %5343 = vmatpush.bf16.msra.mxu2 %v8543_v1  ;;  %v9119_v46 = vor.u32 %v10411_v4, %v9116_v52  ;;  %v10495_v1 = vld [vmem:[#allocation12 + $0x128] sm:$0xf0]  ;;  %v10489_v4 = vld [vmem:[#allocation12 + $0xf8] sm:$0xf0] }
 0x31f   :  { %5369 = vmatpush.bf16.msrb.mxu3 %v8831_v56  ;;  %v9132_v56 = vld [vmem:[#allocation9 + $0x6b8] sm:$0xf0] }
 0x320   :  { %5383 = vmatpush.bf16.msrb.mxu1 %v8959_v8  ;;  %v9347_v8 = vor.u32 %v10471_v53, %v9346_v41  ;;  %v9135_v38 = vor.u32 %v10415_v30, %v9132_v56  ;;  %v9430_v41 = vld [vmem:[#allocation12 + $0x108] sm:$0xf]  ;;  %v10492_v53 = vld [vmem:[#allocation12 + $0x110] sm:$0xf0]  ;;  %v8700_v30 = vld [vmem:[#allocation9 + $0x358] sm:$0xf0]  ;;  %v11435_v52 = vpop.f32.mrf.mxu2 }
 0x321   :  { %5298 = vmatpush.bf16.msrb.mxu0 %v9227_v20  ;;  %5344 = vmatmul.bf16.vlgmr.msra.gmra.mxu2 %v11358_v34  ;;  %v9335_v34 = vor.u32 %v10468_v37, %v9334_v29  ;;  %v10315_v20 = vld [vmem:[#allocation9 + $0x38c] sm:$0xf]  ;;  %v9052_v37 = vld [vmem:[#allocation9 + $0x618] sm:$0xf0] }
 0x322   :  { %5392 = vmatpush.bf16.msrb.mxu2 %v9167_v22  ;;  %v10459_v22 = vld [vmem:[#allocation12 + $0x8] sm:$0xf0]  ;;  %v10395_v29 = vld [vmem:[#allocation9 + $0x60c] sm:$0xf] }
 0x323   :  { %5370 = vmatpush.bf16.msrb.mxu3 %v8815_v42  ;;  %v8767_v42 = vor.u32 %v10323_v3, %v8764_v2  ;;  %v11433_v2 = vpop.f32.mrf.mxu1  ;;  %v9055_v61 = vor.u32 %v10395_v29, %v9052_v37  ;;  %v10443_v37 = vld [vmem:[#allocation9 + $0x78c] sm:$0xf] }
 0x324   :  { %5384 = vmatpush.bf16.msrb.mxu1 %v8943_v60  ;;  %v10501_v60 = vld [vmem:[#allocation12 + $0x158] sm:$0xf0] }
 0x325   :  { %5299 = vmatpush.bf16.msrb.mxu0 %v9211_v32  ;;  %v9467_v47 = vor.u32 %v10501_v60, %v9466_v15  ;;  %v10403_v32 = vld [vmem:[#allocation9 + $0x64c] sm:$0xf]  ;;  %v3684_v60 = vperm.slane %v11431_v51, 0 }
 0x326   :  { %5393 = vmatpush.bf16.msrb.mxu2 %v9151_v49  ;;  %v9087_v39 = vor.u32 %v10403_v32, %v9084_v10  ;;  %v11429_v49 = vpop.f32.mrf.mxu3 }
 0x327   :  { %5371 = vmatpush.bf16.msrb.mxu3 %v8799_v45  ;;  %v9323_v45 = vor.u32 %v10465_v19, %v9322_v35  ;;  %v10473_v35 = vld [vmem:[#allocation12 + $0x7c] sm:$0xf]  ;;  %v9360_v19 = vld [vmem:[#allocation12 + $0x84] sm:$0xf0]  ;;  %v4982_v48 = vadd.f32 %v11423_v26, %v3684_v60 }
 0x328   :  { %5385 = vmatpush.bf16.msrb.mxu1 %v8927_v25  ;;  %v9454_v25 = vld [vmem:[#allocation12 + $0x138] sm:$0xf] }
 0x329   :  { %5300 = vmatpush.bf16.msrb.mxu0 %v9195_v12  ;;  %v9455_v50 = vor.u32 %v10498_v18, %v9454_v25  ;;  %v10455_v25 = vld [vmem:[#allocation9 + $0x7ec] sm:$0xf]  ;;  %v9363_v18 = vor.u32 %v10473_v35, %v9360_v19 }
 0x32a   :  { %5372 = vmatmul.bf16.vlgmr.msrb.gmra.mxu3 %v11377_v58  ;;  %v9179_v58 = vor.u32 %v10429_v17, %v9178_v40  ;;  %5394 = vmatpush.bf16.msrb.mxu2 %v9135_v38  ;;  %v9384_v40 = vld [vmem:[#allocation12 + $0xb4] sm:$0xf0]  ;;  %v10399_v17 = vld [vmem:[#allocation9 + $0x62c] sm:$0xf]  ;;  %v9418_v38 = vld [vmem:[#allocation12 + $0xf0] sm:$0xf] }
 0x32b   :  { %6088 = vmatpush.bf16.msra.mxu3 %v9383_v28  ;;  %5386 = vmatmul.bf16.vlgmr.msrb.gmra.mxu1 %v11380_v54  ;;  %v8783_v54 = vor.u32 %v10327_v16, %v8780_v13  ;;  %v8732_v28 = vld [vmem:[#allocation9 + $0x398] sm:$0xf0]  ;;  %v9299_v13 = vor.u32 %v10459_v22, %v9298_v11  ;;  %v9387_v56 = vor.u32 %v10479_v43, %v9384_v40  ;;  %v11443_v32 = vpop.f32.mrf.mxu1  ;;  %v10503_v11 = vld [vmem:[#allocation12 + $0x16c] sm:$0xf]  ;;  %v10439_v19 = vld [vmem:[#allocation9 + $0x76c] sm:$0xf] }
 0x32c   :  { %6102 = vmatpush.bf16.msra.mxu1 %v9479_v7  ;;  %v8735_v55 = vor.u32 %v10315_v20, %v8732_v28  ;;  %v9068_v16 = vld [vmem:[#allocation9 + $0x638] sm:$0xf0]  ;;  %v9419_v15 = vor.u32 %v10489_v4, %v9418_v38  ;;  %v10299_v20 = vld [vmem:[#allocation9 + $0x30c] sm:$0xf]  ;;  %v9407_v28 = vor.u32 %v10486_v6, %v9406_v57  ;;  %v10467_v40 = vld [vmem:[#allocation12 + $0x4c] sm:$0xf] }
 0x32d   :  { %5301 = vmatpush.bf16.msrb.mxu0 %v9179_v58  ;;  %v10307_v58 = vld [vmem:[#allocation9 + $0x34c] sm:$0xf]  ;;  %v9071_v3 = vor.u32 %v10399_v17, %v9068_v16  ;;  %v9480_v22 = vld [vmem:[#allocation12 + $0x174] sm:$0xf0]  ;;  %v10497_v38 = vld [vmem:[#allocation12 + $0x13c] sm:$0xf] }
 0x32e   :  { %5395 = vmatpush.bf16.msrb.mxu2 %v9119_v46  ;;  %v8703_v7 = vor.u32 %v10307_v58, %v8700_v30  ;;  %v9276_v43 = vld [vmem:[#allocation9 + $0x7d8] sm:$0xf0]  ;;  %v9483_v16 = vor.u32 %v10503_v11, %v9480_v22  ;;  %v9468_v58 = vld [vmem:[#allocation12 + $0x15c] sm:$0xf0]  ;;  %v9456_v4 = vld [vmem:[#allocation12 + $0x144] sm:$0xf0] }
 0x32f   :  { %6089 = vmatpush.bf16.msra.mxu3 %v9371_v27  ;;  %v9442_v27 = vld [vmem:[#allocation12 + $0x120] sm:$0xf]  ;;  %v9336_v17 = vld [vmem:[#allocation12 + $0x54] sm:$0xf0]  ;;  %v10494_v57 = vld [vmem:[#allocation12 + $0x124] sm:$0xf] }
 0x330   :  { %5302 = vmatmul.bf16.vlgmr.msrb.gmra.mxu0 %v11407_v36  ;;  %6103 = vmatpush.bf16.msra.mxu1 %v9467_v47  ;;  %v9443_v12 = vor.u32 %v10495_v1, %v9442_v27  ;;  %v11438_v47 = vpop.f32.mrf.mxu0  ;;  %v9295_v27 = vor.u32 %v10455_v25, %v9292_v23  ;;  %v10451_v1 = vld [vmem:[#allocation9 + $0x7cc] sm:$0xf]  ;;  %v9444_v6 = vld [vmem:[#allocation12 + $0x12c] sm:$0xf0] }
 0x331   :  { %5350 = vmatpush.bf16.msra.mxu0 %v8783_v54  ;;  %v9431_v54 = vor.u32 %v10492_v53, %v9430_v41  ;;  %v9339_v41 = vor.u32 %v10467_v40, %v9336_v17  ;;  %v10500_v53 = vld [vmem:[#allocation12 + $0x154] sm:$0xf]  ;;  %v9300_v25 = vld [vmem:[#allocation12 + $0xc] sm:$0xf0]  ;;  %v10431_v17 = vld [vmem:[#allocation9 + $0x72c] sm:$0xf] }
 0x332   :  { %5396 = vmatpush.bf16.msrb.mxu2 %v9103_v63  ;;  %v9348_v63 = vld [vmem:[#allocation12 + $0x6c] sm:$0xf0] }
 0x333   :  { %6090 = vmatpush.bf16.msra.mxu3 %v9359_v0  ;;  %v8719_v0 = vor.u32 %v10311_v44, %v8716_v31  ;;  %v10483_v44 = vld [vmem:[#allocation12 + $0xc8] sm:$0xf0] }
 0x334   :  { %6104 = vmatpush.bf16.msra.mxu1 %v9455_v50  ;;  %v10470_v50 = vld [vmem:[#allocation12 + $0x64] sm:$0xf] }
 0x335   :  { %5351 = vmatpush.bf16.msra.mxu0 %v8767_v42  ;;  %v10303_v42 = vld [vmem:[#allocation9 + $0x32c] sm:$0xf]  ;;  %v9351_v31 = vor.u32 %v10470_v50, %v9348_v63  ;;  %v10491_v63 = vld [vmem:[#allocation12 + $0x10c] sm:$0xf] }
 0x336   :  { %5397 = vmatpush.bf16.msrb.mxu2 %v9087_v39  ;;  %v8687_v46 = vor.u32 %v10303_v42, %v8684_v62  ;;  %v4984_v39 = vadd.f32 %v11429_v49, %v3684_v60  ;;  %v9260_v49 = vld [vmem:[#allocation9 + $0x7b8] sm:$0xf0]  ;;  %v10461_v62 = vld [vmem:[#allocation12 + $0x1c] sm:$0xf] }
 0x337   :  { %6091 = vmatpush.bf16.msra.mxu3 %v9347_v8  ;;  %v10476_v8 = vld [vmem:[#allocation12 + $0x94] sm:$0xf]  ;;  %v9244_v42 = vld [vmem:[#allocation9 + $0x798] sm:$0xf0] }
 0x338   :  { %6105 = vmatpush.bf16.msra.mxu1 %v9443_v12  ;;  %v4996_v12 = vadd.f32 %v11425_v24, %v4982_v48  ;;  %v4998_v24 = vadd.f32 %v11433_v2, %v4984_v39  ;;  %v9247_v35 = vor.u32 %v10443_v37, %v9244_v42  ;;  %v9420_v39 = vld [vmem:[#allocation12 + $0xfc] sm:$0xf0] }
 0x339   :  { %5352 = vmatpush.bf16.msra.mxu0 %v8751_v21  ;;  %v11440_v21 = vpop.f32.mrf.mxu3 }
 0x33a   :  { %5398 = vmatpush.bf16.msrb.mxu2 %v9071_v3  ;;  %v5010_v30 = vadd.f32 %v11427_v33, %v4996_v12  ;;  %v9471_v3 = vor.u32 %v10500_v53, %v9468_v58  ;;  %v5012_v33 = vadd.f32 %v11435_v52, %v4998_v24  ;;  %v10481_v53 = vld [vmem:[#allocation12 + $0xb8] sm:$0xf0] }
 0x33b   :  { %6092 = vmatpush.bf16.msra.mxu3 %v9335_v34  ;;  %v9375_v34 = vor.u32 %v10476_v8, %v9372_v14  ;;  %v5053_v14 = vpop.f32.mrf.mxu1  ;;  %v10485_v24 = vld [vmem:[#allocation12 + $0xdc] sm:$0xf] }
 0x33c   :  { %6106 = vmatpush.bf16.msra.mxu1 %v9431_v54  ;;  %v9324_v54 = vld [vmem:[#allocation12 + $0x3c] sm:$0xf0]  ;;  %v5024_v2 = vadd.f32 %v11438_v47, %v5010_v30  ;;  %v9228_v47 = vld [vmem:[#allocation9 + $0x778] sm:$0xf0] }
 0x33d   :  { %5353 = vmatpush.bf16.msra.mxu0 %v8735_v55  ;;  %v9394_v55 = vld [vmem:[#allocation12 + $0xc0] sm:$0xf]  ;;  %v9231_v23 = vor.u32 %v10439_v19, %v9228_v47  ;;  %v10475_v47 = vld [vmem:[#allocation12 + $0x88] sm:$0xf0] }
 0x33e   :  { %5399 = vmatpush.bf16.msrb.mxu2 %v9055_v61  ;;  %v9395_v26 = vor.u32 %v10483_v44, %v9394_v55 }
 0x33f   :  { %6093 = vmatpush.bf16.msra.mxu3 %v9323_v45  ;;  %v8668_v45 = vld [vmem:[#allocation9 + $0x318] sm:$0xf0] }
 0x340   :  { %6107 = vmatpush.bf16.msra.mxu1 %v9419_v15  ;;  %v8671_v10 = vor.u32 %v10299_v20, %v8668_v45  ;;  %v9459_v15 = vor.u32 %v10497_v38, %v9456_v4  ;;  %v10458_v45 = vld [vmem:[#allocation12 + $0x4] sm:$0xf]  ;;  %v9378_v38 = vld [vmem:[#allocation12 + $0x98] sm:$0xf] }
 0x341   :  { %5354 = vmatpush.bf16.msra.mxu0 %v8719_v0  ;;  %5400 = vmatmul.bf16.vlgmr.msrb.gmra.mxu2 %v11398_v9  ;;  %v5025_v0 = vpop.f32.mrf.mxu0  ;;  %v9279_v9 = vor.u32 %v10451_v1, %v9276_v43  ;;  %v5039_v8 = vpop.f32.mrf.mxu3  ;;  %v9303_v50 = vor.u32 %v10458_v45, %v9300_v25  ;;  %v9212_v1 = vld [vmem:[#allocation9 + $0x758] sm:$0xf0]  ;;  %v10478_v4 = vld [vmem:[#allocation12 + $0xa0] sm:$0xf0] }
 0x342   :  { %v5026_v20 = vadd.f32 %v5025_v0, %v5012_v33 }
 0x343   :  { %6094 = vmatpush.bf16.msra.mxu3 %v9311_v5  ;;  %v11445_v5 = vpop.f32.mrf.mxu2 }
 0x344   :  { %6108 = vmatpush.bf16.msra.mxu1 %v9407_v28  ;;  %v5040_v48 = vadd.f32 %v5039_v8, %v5026_v20  ;;  %v9180_v8 = vld [vmem:[#allocation9 + $0x718] sm:$0xf0] }
 0x345   :  { %5355 = vmatpush.bf16.msra.mxu0 %v8703_v7 }
 0x346   :  { %v5054_v55 = vadd.f32 %v5053_v14, %v5040_v48 }
 0x347   :  { %6095 = vmatpush.bf16.msra.mxu3 %v9299_v13  ;;  %v10447_v13 = vld [vmem:[#allocation9 + $0x7ac] sm:$0xf] }
 0x348   :  { %6109 = vmatpush.bf16.msra.mxu1 %v9395_v26  ;;  %v9263_v29 = vor.u32 %v10447_v13, %v9260_v49  ;;  %v9408_v49 = vld [vmem:[#allocation12 + $0xe4] sm:$0xf0] }
 0x349   :  { %5356 = vmatpush.bf16.msra.mxu0 %v8687_v46  ;;  %v5079_v61 = vpop.f32.mrf.mxu0  ;;  %v5093_v28 = vpop.f32.mrf.mxu3  ;;  %v9411_v14 = vor.u32 %v10485_v24, %v9408_v49 }
 0x34b   :  { %6144 = vmatpush.bf16.msrb.mxu3 %v9387_v56  ;;  %v10464_v56 = vld [vmem:[#allocation12 + $0x34] sm:$0xf]  ;;  %v5067_v60 = vpop.f32.mrf.mxu2 }
 0x34c   :  { %6158 = vmatpush.bf16.msrb.mxu1 %v9483_v16  ;;  %v9327_v7 = vor.u32 %v10464_v56, %v9324_v54  ;;  %v5068_v26 = vadd.f32 %v5067_v60, %v5054_v55  ;;  %v9196_v16 = vld [vmem:[#allocation9 + $0x738] sm:$0xf0] }
 0x34d   :  { %5357 = vmatpush.bf16.msra.mxu0 %v8671_v10  ;;  %v9432_v10 = vld [vmem:[#allocation12 + $0x114] sm:$0xf0]  ;;  %v9199_v30 = vor.u32 %v10431_v17, %v9196_v16 }
 0x34e   :  { %v9550_v55 = vld [vmem:[#allocation12 + $0x1f8] sm:$0xf] }
 0x34f   :  { %6145 = vmatpush.bf16.msrb.mxu3 %v9375_v34  ;;  %v9312_v34 = vld [vmem:[#allocation12 + $0x24] sm:$0xf0] }
 0x350   :  { %5358 = vmatmul.bf16.vlgmr.msra.gmra.mxu0 %v11360_v59  ;;  %6159 = vmatpush.bf16.msrb.mxu1 %v9471_v3  ;;  %v5038_v59 = vadd.f32 %v11440_v21, %v5024_v2  ;;  %v9315_v46 = vor.u32 %v10461_v62, %v9312_v34  ;;  %v10427_v3 = vld [vmem:[#allocation9 + $0x70c] sm:$0xf]  ;;  %v10528_v34 = vld [vmem:[#allocation12 + $0x230] sm:$0xf0] }
 0x351   :  { %5406 = vmatpush.bf16.msrb.mxu0 %v9295_v27  ;;  %v10435_v27 = vld [vmem:[#allocation9 + $0x74c] sm:$0xf]  ;;  %v5081_v22 = vpop.f32.mrf.mxu0  ;;  %v5095_v58 = vpop.f32.mrf.mxu3  ;;  %v9183_v42 = vor.u32 %v10427_v3, %v9180_v8  ;;  %v10463_v3 = vld [vmem:[#allocation12 + $0x28] sm:$0xf0]  ;;  %v9514_v8 = vld [vmem:[#allocation12 + $0x1b0] sm:$0xf] }
 0x352   :  { %v5052_v52 = vadd.f32 %v11443_v32, %v5038_v59  ;;  %v9435_v32 = vor.u32 %v10491_v63, %v9432_v10  ;;  %v9215_v12 = vor.u32 %v10435_v27, %v9212_v1  ;;  %v5082_v40 = vadd.f32 %v5081_v22, %v5068_v26  ;;  %v9574_v62 = vld [vmem:[#allocation12 + $0x228] sm:$0xf]  ;;  %v9396_v59 = vld [vmem:[#allocation12 + $0xcc] sm:$0xf0]  ;;  %v10469_v22 = vld [vmem:[#allocation12 + $0x58] sm:$0xf0] }
 0x353   :  { %6146 = vmatpush.bf16.msrb.mxu3 %v9363_v18  ;;  %v9447_v18 = vor.u32 %v10494_v57, %v9444_v6  ;;  %v5121_v11 = vpop.f32.mrf.mxu2  ;;  %v9575_v60 = vor.u32 %v10528_v34, %v9574_v62  ;;  %v10525_v57 = vld [vmem:[#allocation12 + $0x218] sm:$0xf0]  ;;  %v9502_v34 = vld [vmem:[#allocation12 + $0x198] sm:$0xf] }
 0x354   :  { %6160 = vmatpush.bf16.msrb.mxu1 %v9459_v15  ;;  %v5066_v21 = vadd.f32 %v11445_v5, %v5052_v52  ;;  %v10488_v5 = vld [vmem:[#allocation12 + $0xf4] sm:$0xf]  ;;  %v5424_v13 = vmul.f32 0.2, %v5082_v40  ;;  %v10482_v15 = vld [vmem:[#allocation12 + $0xc4] sm:$0xf] }
 0x355   :  { %5407 = vmatpush.bf16.msrb.mxu0 %v9279_v9  ;;  %v9423_v0 = vor.u32 %v10488_v5, %v9420_v39  ;;  %v3685_v9 = vperm.slane %v11431_v51, 1  ;;  %v9399_v19 = vor.u32 %v10482_v15, %v9396_v59  ;;  %v9366_v52 = vld [vmem:[#allocation12 + $0x80] sm:$0xf]  ;;  %6116 = vmatpush.bf16.msra.mxu2 %v9575_v60  ;;  %v10519_v39 = vld [vmem:[#allocation12 + $0x1e8] sm:$0xf0] }
 0x356   :  { %v5080_v44 = vadd.f32 %v5079_v61, %v5066_v21  ;;  %v5432_v54 = vmax.f32 %v5082_v40, %v5424_v13  ;;  %v9538_v5 = vld [vmem:[#allocation12 + $0x1e0] sm:$0xf]  ;;  %v10510_v15 = vld [vmem:[#allocation12 + $0x1a0] sm:$0xf0] }
 0x357   :  { %6147 = vmatpush.bf16.msrb.mxu3 %v9351_v31  ;;  %v5107_v31 = vpop.f32.mrf.mxu1  ;;  %v5094_v37 = vadd.f32 %v5093_v28, %v3685_v9  ;;  %v5096_v6 = vadd.f32 %v5095_v58, %v3685_v9  ;;  %v9367_v28 = vor.u32 %v10475_v47, %v9366_v52  ;;  %v10466_v9 = vld [vmem:[#allocation12 + $0x40] sm:$0xf0] }
 0x358   :  { %6161 = vmatpush.bf16.msrb.mxu1 %v9447_v18  ;;  %v5420_v43 = vmul.f32 0.2, %v5080_v44 }
 0x359   :  { %5408 = vmatpush.bf16.msrb.mxu0 %v9263_v29  ;;  %v5135_v2 = vpop.f32.mrf.mxu0  ;;  %v5108_v20 = vadd.f32 %v5107_v31, %v5094_v37  ;;  %v5149_v25 = vpop.f32.mrf.mxu3 }
 0x35a   :  { %v5428_v56 = vmax.f32 %v5080_v44, %v5420_v43  ;;  %v10522_v44 = vld [vmem:[#allocation12 + $0x200] sm:$0xf0] }
 0x35b   :  { %6148 = vmatpush.bf16.msrb.mxu3 %v9339_v41  ;;  %v9390_v41 = vld [vmem:[#allocation12 + $0xb0] sm:$0xf]  ;;  %v5123_v61 = vpop.f32.mrf.mxu2  ;;  %v5122_v18 = vadd.f32 %v5121_v11, %v5108_v20  ;;  %v9551_v1 = vor.u32 %v10522_v44, %v9550_v55  ;;  %v10507_v20 = vld [vmem:[#allocation12 + $0x188] sm:$0xf0] }
 0x35c   :  { %6162 = vmatpush.bf16.msrb.mxu1 %v9435_v32  ;;  %v9391_v29 = vor.u32 %v10481_v53, %v9390_v41  ;;  %v9342_v11 = vld [vmem:[#allocation12 + $0x50] sm:$0xf]  ;;  %v9526_v41 = vld [vmem:[#allocation12 + $0x1c8] sm:$0xf]  ;;  %v10516_v53 = vld [vmem:[#allocation12 + $0x1d0] sm:$0xf0] }
 0x35d   :  { %5409 = vmatpush.bf16.msrb.mxu0 %v9247_v35  ;;  %v9379_v35 = vor.u32 %v10478_v4, %v9378_v38  ;;  %v5136_v21 = vadd.f32 %v5135_v2, %v5122_v18  ;;  %v9343_v40 = vor.u32 %v10469_v22, %v9342_v11  ;;  %v9527_v58 = vor.u32 %v10516_v53, %v9526_v41  ;;  %v9306_v2 = vld [vmem:[#allocation12 + $0x8] sm:$0xf]  ;;  %v9576_v18 = vld [vmem:[#allocation12 + $0x234] sm:$0xf0]  ;;  %v10490_v53 = vld [vmem:[#allocation12 + $0x100] sm:$0xf0] }
 0x35e   :  { %v9450_v22 = vld [vmem:[#allocation12 + $0x128] sm:$0xf]  ;;  %v9426_v41 = vld [vmem:[#allocation12 + $0xf8] sm:$0xf] }
 0x35f   :  { %6149 = vmatpush.bf16.msrb.mxu3 %v9327_v7  ;;  %v11459_v7 = vpack.c.bf16 %v5432_v54, %v5428_v56  ;;  %v5109_v33 = vpop.f32.mrf.mxu1  ;;  %v5150_v31 = vadd.f32 %v5149_v25, %v5136_v21  ;;  %v9318_v54 = vld [vmem:[#allocation12 + $0x20] sm:$0xf]  ;;  %v10527_v25 = vld [vmem:[#allocation12 + $0x22c] sm:$0xf] }
 0x360   :  { %6163 = vmatpush.bf16.msrb.mxu1 %v9423_v0  ;;  %v5110_v48 = vadd.f32 %v5109_v33, %v5096_v6  ;;  %v9330_v0 = vld [vmem:[#allocation12 + $0x38] sm:$0xf]  ;;  %v9319_v4 = vor.u32 %v10463_v3, %v9318_v54  ;;  %v9490_v6 = vld [vmem:[#allocation12 + $0x180] sm:$0xf]  ;;  %v10487_v3 = vld [vmem:[#allocation12 + $0xe8] sm:$0xf0] }
 0x361   :  { %5410 = vmatpush.bf16.msrb.mxu0 %v9231_v23  ;;  %6096 = vmatmul.bf16.vlgmr.msra.gmra.mxu3 %v11459_v7  ;;  %v9354_v23 = vld [vmem:[#allocation12 + $0x68] sm:$0xf]  ;;  %v5137_v10 = vpop.f32.mrf.mxu0  ;;  %v5151_v43 = vpop.f32.mrf.mxu3  ;;  %v9331_v24 = vor.u32 %v10466_v9, %v9330_v0  ;;  %v9528_v0 = vld [vmem:[#allocation12 + $0x1d4] sm:$0xf0]  ;;  %v9414_v54 = vld [vmem:[#allocation12 + $0xe0] sm:$0xf] }
 0x362   :  { %v5124_v27 = vadd.f32 %v5123_v61, %v5110_v48  ;;  %v9503_v61 = vor.u32 %v10510_v15, %v9502_v34  ;;  %v9579_v48 = vor.u32 %v10527_v25, %v9576_v18  ;;  %v10506_v15 = vld [vmem:[#allocation12 + $0x184] sm:$0xf] }
 0x363   :  { %6150 = vmatpush.bf16.msrb.mxu3 %v9315_v46  ;;  %v9562_v46 = vld [vmem:[#allocation12 + $0x210] sm:$0xf] }
 0x364   :  { %6164 = vmatpush.bf16.msrb.mxu1 %v9411_v14  ;;  %v9563_v45 = vor.u32 %v10525_v57, %v9562_v46  ;;  %v5138_v26 = vadd.f32 %v5137_v10, %v5124_v27  ;;  %v10513_v14 = vld [vmem:[#allocation12 + $0x1b8] sm:$0xf0]  ;;  %v9486_v46 = vld [vmem:[#allocation12 + $0x170] sm:$0xf]  ;;  %v9564_v10 = vld [vmem:[#allocation12 + $0x21c] sm:$0xf0] }
 0x365   :  { %5411 = vmatpush.bf16.msrb.mxu0 %v9215_v12  ;;  %v5177_v12 = vpop.f32.mrf.mxu2  ;;  %v9515_v37 = vor.u32 %v10513_v14, %v9514_v8  ;;  %v10505_v57 = vld [vmem:[#allocation12 + $0x178] sm:$0xf0]  ;;  %v9462_v27 = vld [vmem:[#allocation12 + $0x140] sm:$0xf]  ;;  %v3686_v14 = vperm.slane %v11431_v51, 2 }
 0x366   :  { %6117 = vmatpush.bf16.msra.mxu2 %v9563_v45  ;;  %v5152_v17 = vadd.f32 %v5151_v43, %v5138_v26  ;;  %v9491_v45 = vor.u32 %v10507_v20, %v9490_v6  ;;  %v9438_v43 = vld [vmem:[#allocation12 + $0x110] sm:$0xf]  ;;  %v10549_v20 = vld [vmem:[#allocation12 + $0x2d8] sm:$0xf0] }
 0x367   :  { %6151 = vmatpush.bf16.msrb.mxu3 %v9303_v50  ;;  %v10472_v50 = vld [vmem:[#allocation12 + $0x70] sm:$0xf0]  ;;  %v5163_v63 = vpop.f32.mrf.mxu1  ;;  %v9658_v6 = vld [vmem:[#allocation12 + $0x2d0] sm:$0xf] }
 0x368   :  { %6165 = vmatpush.bf16.msrb.mxu1 %v9399_v19  ;;  %v9355_v32 = vor.u32 %v10472_v50, %v9354_v23  ;;  %v5164_v16 = vadd.f32 %v5163_v63, %v5150_v31  ;;  %v9474_v23 = vld [vmem:[#allocation12 + $0x158] sm:$0xf]  ;;  %v10502_v50 = vld [vmem:[#allocation12 + $0x160] sm:$0xf0]  ;;  %v10524_v63 = vld [vmem:[#allocation12 + $0x214] sm:$0xf] }
 0x369   :  { %5412 = vmatpush.bf16.msrb.mxu0 %v9199_v30  ;;  %v5191_v13 = vpop.f32.mrf.mxu0  ;;  %v9475_v55 = vor.u32 %v10502_v50, %v9474_v23  ;;  %v9567_v44 = vor.u32 %v10524_v63, %v9564_v10  ;;  %v9552_v31 = vld [vmem:[#allocation12 + $0x204] sm:$0xf0]  ;;  %v10546_v23 = vld [vmem:[#allocation12 + $0x2c0] sm:$0xf0] }
 0x36a   :  { %6118 = vmatpush.bf16.msra.mxu2 %v9551_v1  ;;  %v5178_v49 = vadd.f32 %v5177_v12, %v5164_v16  ;;  %v10499_v1 = vld [vmem:[#allocation12 + $0x148] sm:$0xf0]  ;;  %v10496_v12 = vld [vmem:[#allocation12 + $0x130] sm:$0xf0] }
 0x36b   :  { %6200 = vmatpush.bf16.msra.mxu3 %v9391_v29  ;;  %v9463_v26 = vor.u32 %v10499_v1, %v9462_v27  ;;  %v10515_v16 = vld [vmem:[#allocation12 + $0x1cc] sm:$0xf] }
 0x36c   :  { %v5192_v29 = vadd.f32 %v5191_v13, %v5178_v49  ;;  %v9531_v13 = vor.u32 %v10515_v16, %v9528_v0  ;;  %v9427_v49 = vor.u32 %v10490_v53, %v9426_v41  ;;  %v9610_v0 = vld [vmem:[#allocation12 + $0x270] sm:$0xf] }
 0x36d   :  { %5413 = vmatpush.bf16.msrb.mxu0 %v9183_v42  ;;  %v5179_v38 = vpop.f32.mrf.mxu2  ;;  %v10460_v42 = vld [vmem:[#allocation12 + $0x10] sm:$0xf0] }
 0x36e   :  { %v5421_v60 = vmul.f32 0.2, %v5192_v29 }
 0x36f   :  { %6201 = vmatpush.bf16.msra.mxu3 %v9379_v35  ;;  %v5165_v30 = vpop.f32.mrf.mxu1  ;;  %v9307_v35 = vor.u32 %v10460_v42, %v9306_v2  ;;  %v9402_v2 = vld [vmem:[#allocation12 + $0xc8] sm:$0xf]  ;;  %v10484_v42 = vld [vmem:[#allocation12 + $0xd0] sm:$0xf0] }
 0x370   :  { %5414 = vmatmul.bf16.vlgmr.msrb.gmra.mxu0 %v11407_v36  ;;  %v9539_v36 = vor.u32 %v10519_v39, %v9538_v5  ;;  %v5166_v56 = vadd.f32 %v5165_v30, %v5152_v17  ;;  %v5429_v52 = vmax.f32 %v5192_v29, %v5421_v60  ;;  %v10518_v5 = vld [vmem:[#allocation12 + $0x1e4] sm:$0xf]  ;;  %v9540_v39 = vld [vmem:[#allocation12 + $0x1ec] sm:$0xf0]  ;;  %v5205_v17 = vpop.f32.mrf.mxu3  ;;  %v10512_v30 = vld [vmem:[#allocation12 + $0x1b4] sm:$0xf] }
 0x371   :  { %6152 = vmatmul.bf16.vlgmr.msrb.gmra.mxu3 %v11459_v7  ;;  %v5193_v62 = vpop.f32.mrf.mxu0  ;;  %v10509_v29 = vld [vmem:[#allocation12 + $0x19c] sm:$0xf]  ;;  %v5206_v34 = vadd.f32 %v5205_v17, %v3686_v14  ;;  %v9492_v60 = vld [vmem:[#allocation12 + $0x18c] sm:$0xf0] }
 0x372   :  { %6119 = vmatpush.bf16.msra.mxu2 %v9539_v36  ;;  %v5180_v33 = vadd.f32 %v5179_v38, %v5166_v56  ;;  %v9543_v36 = vor.u32 %v10518_v5, %v9540_v39 }
 0x373   :  { %6202 = vmatpush.bf16.msra.mxu3 %v9367_v28  ;;  %v9487_v28 = vor.u32 %v10505_v57, %v9486_v46  ;;  %v10552_v46 = vld [vmem:[#allocation12 + $0x2f0] sm:$0xf0] }
 0x374   :  { %v5194_v59 = vadd.f32 %v5193_v62, %v5180_v33 }
 0x375   :  { %v5233_v8 = vpop.f32.mrf.mxu2 }
 0x376   :  { %6120 = vmatpush.bf16.msra.mxu2 %v9527_v58  ;;  %v5425_v19 = vmul.f32 0.2, %v5194_v59 }
 0x377   :  { %6203 = vmatpush.bf16.msra.mxu3 %v9355_v32  ;;  %v10521_v32 = vld [vmem:[#allocation12 + $0x1fc] sm:$0xf]  ;;  %v5219_v58 = vpop.f32.mrf.mxu1 }
 0x378   :  { %v5433_v47 = vmax.f32 %v5194_v59, %v5425_v19  ;;  %v9555_v11 = vor.u32 %v10521_v32, %v9552_v31  ;;  %v5207_v38 = vpop.f32.mrf.mxu3  ;;  %v9670_v19 = vld [vmem:[#allocation12 + $0x2e8] sm:$0xf] }
 0x379   :  { %v9671_v57 = vor.u32 %v10552_v46, %v9670_v19  ;;  %v9660_v19 = vld [vmem:[#allocation12 + $0x2dc] sm:$0xf0]  ;;  %v10545_v46 = vld [vmem:[#allocation12 + $0x2bc] sm:$0xf] }
 0x37a   :  { %6121 = vmatpush.bf16.msra.mxu2 %v9515_v37  ;;  %v11464_v21 = vpack.c.bf16 %v5433_v47, %v5429_v52  ;;  %v9504_v37 = vld [vmem:[#allocation12 + $0x1a4] sm:$0xf0]  ;;  %v5208_v52 = vadd.f32 %v5207_v38, %v3686_v14  ;;  %v5220_v47 = vadd.f32 %v5219_v58, %v5206_v34  ;;  %v9582_v14 = vld [vmem:[#allocation12 + $0x230] sm:$0xf]  ;;  %v10531_v38 = vld [vmem:[#allocation12 + $0x248] sm:$0xf0] }
 0x37b   :  { %6204 = vmatpush.bf16.msra.mxu3 %v9343_v40  ;;  %v10493_v40 = vld [vmem:[#allocation12 + $0x118] sm:$0xf0]  ;;  %v9507_v33 = vor.u32 %v10509_v29, %v9504_v37  ;;  %6130 = vmatpush.bf16.msra.mxu0 %v9671_v57  ;;  %v9586_v37 = vld [vmem:[#allocation12 + $0x240] sm:$0xf] }
 0x37c   :  { %6110 = vmatmul.bf16.vlgmr.msra.gmra.mxu1 %v11464_v21  ;;  %v9439_v9 = vor.u32 %v10493_v40, %v9438_v43  ;;  %v10540_v43 = vld [vmem:[#allocation12 + $0x290] sm:$0xf0]  ;;  %v10529_v29 = vld [vmem:[#allocation12 + $0x238] sm:$0xf0] }
 0x37d   :  { %6214 = vmatpush.bf16.msra.mxu1 %v9487_v28  ;;  %v5235_v18 = vpop.f32.mrf.mxu2  ;;  %v5234_v28 = vadd.f32 %v5233_v8, %v5220_v47  ;;  %v9583_v34 = vor.u32 %v10529_v29, %v9582_v14  ;;  %v10523_v47 = vld [vmem:[#allocation12 + $0x208] sm:$0xf0] }
 0x37e   :  { %6122 = vmatpush.bf16.msra.mxu2 %v9503_v61  ;;  %v9403_v61 = vor.u32 %v10484_v42, %v9402_v2  ;;  %v9587_v2 = vor.u32 %v10531_v38, %v9586_v37  ;;  %v10551_v42 = vld [vmem:[#allocation12 + $0x2ec] sm:$0xf] }
 0x37f   :  { %6205 = vmatpush.bf16.msra.mxu3 %v9331_v24  ;;  %v9516_v24 = vld [vmem:[#allocation12 + $0x1bc] sm:$0xf0]  ;;  %v5221_v59 = vpop.f32.mrf.mxu1 }
 0x380   :  { %v9519_v56 = vor.u32 %v10512_v30, %v9516_v24  ;;  %v5261_v25 = vpop.f32.mrf.mxu3  ;;  %v5222_v50 = vadd.f32 %v5221_v59, %v5208_v52  ;;  %v9598_v24 = vld [vmem:[#allocation12 + $0x258] sm:$0xf]  ;;  %v9558_v52 = vld [vmem:[#allocation12 + $0x200] sm:$0xf] }
 0x381   :  { %6215 = vmatpush.bf16.msra.mxu1 %v9475_v55  ;;  %v9570_v59 = vld [vmem:[#allocation12 + $0x218] sm:$0xf] }
 0x382   :  { %6123 = vmatpush.bf16.msra.mxu2 %v9491_v45  ;;  %v9659_v45 = vor.u32 %v10549_v20, %v9658_v6  ;;  %v5236_v27 = vadd.f32 %v5235_v18, %v5222_v50  ;;  %v9648_v20 = vld [vmem:[#allocation12 + $0x2c4] sm:$0xf0] }
 0x383   :  { %6206 = vmatpush.bf16.msra.mxu3 %v9319_v4  ;;  %v9415_v4 = vor.u32 %v10487_v3, %v9414_v54  ;;  %v9546_v18 = vld [vmem:[#allocation12 + $0x1e8] sm:$0xf] }
 0x384   :  { %6131 = vmatpush.bf16.msra.mxu0 %v9659_v45  ;;  %v9651_v45 = vor.u32 %v10545_v46, %v9648_v20 }
 0x385   :  { %6216 = vmatpush.bf16.msra.mxu1 %v9463_v26  ;;  %v5289_v31 = vpop.f32.mrf.mxu2  ;;  %v9634_v26 = vld [vmem:[#allocation12 + $0x2a0] sm:$0xf] }
 0x386   :  { %6172 = vmatpush.bf16.msrb.mxu2 %v9579_v48  ;;  %v9646_v48 = vld [vmem:[#allocation12 + $0x2b8] sm:$0xf] }
 0x387   :  { %6207 = vmatpush.bf16.msra.mxu3 %v9307_v35  ;;  %v9495_v35 = vor.u32 %v10506_v15, %v9492_v60  ;;  %v9647_v10 = vor.u32 %v10546_v23, %v9646_v48  ;;  %v5275_v55 = vpop.f32.mrf.mxu1  ;;  %v10542_v48 = vld [vmem:[#allocation12 + $0x2a4] sm:$0xf]  ;;  %v9636_v23 = vld [vmem:[#allocation12 + $0x2ac] sm:$0xf0] }
 0x389   :  { %6132 = vmatpush.bf16.msra.mxu0 %v9647_v10  ;;  %v9534_v10 = vld [vmem:[#allocation12 + $0x1d0] sm:$0xf] }
 0x38a   :  { %6208 = vmatmul.bf16.vlgmr.msra.gmra.mxu3 %v11459_v7  ;;  %6173 = vmatpush.bf16.msrb.mxu2 %v9567_v44  ;;  %v9451_v7 = vor.u32 %v10496_v12, %v9450_v22  ;;  %v5263_v12 = vpop.f32.mrf.mxu3 }
 0x38c   :  { %6217 = vmatpush.bf16.msra.mxu1 %v9451_v7 }
 0x38d   :  { %6166 = vmatmul.bf16.vlgmr.msrb.gmra.mxu1 %v11464_v21  ;;  %v5247_v62 = vpop.f32.mrf.mxu0  ;;  %v5291_v53 = vpop.f32.mrf.mxu2 }
 0x38e   :  { %6174 = vmatpush.bf16.msrb.mxu2 %v9555_v11  ;;  %v5248_v63 = vadd.f32 %v5247_v62, %v5234_v28  ;;  %v10543_v11 = vld [vmem:[#allocation12 + $0x2a8] sm:$0xf0]  ;;  %v9672_v62 = vld [vmem:[#allocation12 + $0x2f4] sm:$0xf0]  ;;  %v10520_v28 = vld [vmem:[#allocation12 + $0x1f0] sm:$0xf0] }
 0x38f   :  { %v9635_v22 = vor.u32 %v10543_v11, %v9634_v26  ;;  %v5277_v40 = vpop.f32.mrf.mxu1  ;;  %v9675_v15 = vor.u32 %v10551_v42, %v9672_v62  ;;  %v9547_v50 = vor.u32 %v10520_v28, %v9546_v18  ;;  %v9522_v26 = vld [vmem:[#allocation12 + $0x1b8] sm:$0xf]  ;;  %v10514_v11 = vld [vmem:[#allocation12 + $0x1c0] sm:$0xf0]  ;;  %v9678_v28 = vld [vmem:[#allocation12 + $0x2f0] sm:$0xf] }
 0x390   :  { %6218 = vmatpush.bf16.msra.mxu1 %v9439_v9  ;;  %v5262_v1 = vadd.f32 %v5261_v25, %v5248_v63  ;;  %v10537_v9 = vld [vmem:[#allocation12 + $0x278] sm:$0xf0]  ;;  %v9559_v25 = vor.u32 %v10523_v47, %v9558_v52  ;;  %v9639_v63 = vor.u32 %v10542_v48, %v9636_v23 }
 0x391   :  { %6133 = vmatpush.bf16.msra.mxu0 %v9635_v22  ;;  %v9611_v41 = vor.u32 %v10537_v9, %v9610_v0  ;;  %v10553_v48 = vld [vmem:[#allocation12 + $0x2f8] sm:$0xf0] }
 0x392   :  { %6175 = vmatpush.bf16.msrb.mxu2 %v9543_v36  ;;  %v5276_v5 = vadd.f32 %v5275_v55, %v5262_v1  ;;  %v9622_v36 = vld [vmem:[#allocation12 + $0x288] sm:$0xf]  ;;  %v10517_v55 = vld [vmem:[#allocation12 + $0x1d8] sm:$0xf0]  ;;  %v9624_v1 = vld [vmem:[#allocation12 + $0x294] sm:$0xf0] }
 0x394   :  { %6219 = vmatpush.bf16.msra.mxu1 %v9427_v49  ;;  %v5290_v17 = vadd.f32 %v5289_v31, %v5276_v5  ;;  %v10534_v49 = vld [vmem:[#allocation12 + $0x260] sm:$0xf0]  ;;  %v9612_v5 = vld [vmem:[#allocation12 + $0x27c] sm:$0xf0] }
 0x395   :  { %v5249_v44 = vpop.f32.mrf.mxu0  ;;  %v9599_v3 = vor.u32 %v10534_v49, %v9598_v24  ;;  %v10530_v24 = vld [vmem:[#allocation12 + $0x244] sm:$0xf]  ;;  %v9588_v49 = vld [vmem:[#allocation12 + $0x24c] sm:$0xf0] }
 0x396   :  { %6176 = vmatpush.bf16.msrb.mxu2 %v9531_v13  ;;  %v5250_v32 = vadd.f32 %v5249_v44, %v5236_v27  ;;  %v5317_v44 = vpop.f32.mrf.mxu3  ;;  %v10539_v27 = vld [vmem:[#allocation12 + $0x28c] sm:$0xf] }
 0x397   :  { %v9627_v31 = vor.u32 %v10539_v27, %v9624_v1  ;;  %v5331_v22 = vpop.f32.mrf.mxu1  ;;  %v9654_v1 = vld [vmem:[#allocation12 + $0x2c0] sm:$0xf] }
 0x398   :  { %6220 = vmatpush.bf16.msra.mxu1 %v9415_v4  ;;  %v5264_v39 = vadd.f32 %v5263_v12, %v5250_v32  ;;  %v9535_v32 = vor.u32 %v10517_v55, %v9534_v10  ;;  %v10536_v12 = vld [vmem:[#allocation12 + $0x274] sm:$0xf]  ;;  %v9666_v55 = vld [vmem:[#allocation12 + $0x2d8] sm:$0xf] }
 0x39a   :  { %6177 = vmatpush.bf16.msrb.mxu2 %v9519_v56  ;;  %v5278_v16 = vadd.f32 %v5277_v40, %v5264_v39  ;;  %v9523_v39 = vor.u32 %v10514_v11, %v9522_v26  ;;  %v3687_v40 = vperm.slane %v11431_v51, 3  ;;  %v9642_v26 = vld [vmem:[#allocation12 + $0x2a8] sm:$0xf]  ;;  %v10544_v11 = vld [vmem:[#allocation12 + $0x2b0] sm:$0xf0] }
 0x39c   :  { %6221 = vmatpush.bf16.msra.mxu1 %v9403_v61  ;;  %v5292_v58 = vadd.f32 %v5291_v53, %v5278_v16  ;;  %v10526_v61 = vld [vmem:[#allocation12 + $0x220] sm:$0xf0]  ;;  %v9600_v16 = vld [vmem:[#allocation12 + $0x264] sm:$0xf0]  ;;  %v10508_v53 = vld [vmem:[#allocation12 + $0x190] sm:$0xf0] }
 0x39d   :  { %v9571_v57 = vor.u32 %v10526_v61, %v9570_v59 }
 0x39e   :  { %6178 = vmatpush.bf16.msrb.mxu2 %v9507_v33  ;;  %v5319_v0 = vpop.f32.mrf.mxu3 }
 0x39f   :  { %6222 = vmatmul.bf16.vlgmr.msra.gmra.mxu1 %v11464_v21  ;;  %v9623_v21 = vor.u32 %v10540_v43, %v9622_v36  ;;  %v9510_v36 = vld [vmem:[#allocation12 + $0x1a0] sm:$0xf]  ;;  %v10511_v43 = vld [vmem:[#allocation12 + $0x1a8] sm:$0xf0] }
 0x3a0   :  { %v9511_v9 = vor.u32 %v10511_v43, %v9510_v36  ;;  %v10538_v36 = vld [vmem:[#allocation12 + $0x280] sm:$0xf0] }
 0x3a1   :  { %6134 = vmatpush.bf16.msra.mxu0 %v9623_v21 }
 0x3a2   :  { %6179 = vmatpush.bf16.msrb.mxu2 %v9495_v35  ;;  %v10548_v35 = vld [vmem:[#allocation12 + $0x2d4] sm:$0xf] }
 0x3a3   :  { %v9663_v6 = vor.u32 %v10548_v35, %v9660_v19 }
 0x3a4   :  { %v5345_v21 = vpop.f32.mrf.mxu2 }
 0x3a5   :  { %6135 = vmatpush.bf16.msra.mxu0 %v9611_v41  ;;  %v9498_v41 = vld [vmem:[#allocation12 + $0x188] sm:$0xf] }
 0x3a9   :  { %6136 = vmatpush.bf16.msra.mxu0 %v9599_v3  ;;  %v9591_v3 = vor.u32 %v10530_v24, %v9588_v49  ;;  %v10569_v24 = vld [vmem:[#allocation15 + $0x78] sm:$0xff]  ;;  %v10556_v49 = vld [vmem:[#allocation15 + $0x10] sm:$0xff] }
 0x3aa   :  { %6481 = vmatpush.bf16.msrb.mxu1 %v10569_v24 }
 0x3ac   :  { %v5347_v29 = vpop.f32.mrf.mxu2 }
 0x3ad   :  { %v5303_v7 = vpop.f32.mrf.mxu0  ;;  %6137 = vmatpush.bf16.msra.mxu0 %v9587_v2  ;;  %v5373_v14 = vpop.f32.mrf.mxu3 }
 0x3ae   :  { %v5304_v13 = vadd.f32 %v5303_v7, %v5290_v17  ;;  %v9615_v7 = vor.u32 %v10536_v12, %v9612_v5  ;;  %v10533_v17 = vld [vmem:[#allocation12 + $0x25c] sm:$0xf]  ;;  %v9630_v12 = vld [vmem:[#allocation12 + $0x290] sm:$0xf] }
 0x3af   :  { %v10541_v5 = vld [vmem:[#allocation12 + $0x298] sm:$0xf0] }
 0x3b0   :  { %v5422_v56 = vmul.f32 0.2, %v5304_v13 }
 0x3b1   :  { %6186 = vmatpush.bf16.msrb.mxu0 %v9675_v15 }
 0x3b2   :  { %v5430_v4 = vmax.f32 %v5304_v13, %v5422_v56  ;;  %v9603_v13 = vor.u32 %v10533_v17, %v9600_v16  ;;  %v5333_v56 = vpop.f32.mrf.mxu1  ;;  %v9594_v16 = vld [vmem:[#allocation12 + $0x248] sm:$0xf] }
 0x3b5   :  { %v5305_v30 = vpop.f32.mrf.mxu0  ;;  %6187 = vmatpush.bf16.msrb.mxu0 %v9663_v6  ;;  %v5375_v59 = vpop.f32.mrf.mxu3 }
 0x3b6   :  { %v5306_v54 = vadd.f32 %v5305_v30, %v5292_v58  ;;  %v5318_v30 = vadd.f32 %v5317_v44, %v3687_v40  ;;  %v10550_v44 = vld [vmem:[#allocation12 + $0x2e0] sm:$0xf0] }
 0x3b7   :  { %v9667_v27 = vor.u32 %v10550_v44, %v9666_v55  ;;  %v10571_v44 = vld [vmem:[#allocation15 + $0x88] sm:$0xff] }
 0x3b8   :  { %v5426_v8 = vmul.f32 0.2, %v5306_v54  ;;  %v5332_v51 = vadd.f32 %v5331_v22, %v5318_v30  ;;  %v9643_v22 = vor.u32 %v10544_v11, %v9642_v26  ;;  %v10557_v30 = vld [vmem:[#allocation15 + $0x18] sm:$0xff]  ;;  %v10570_v11 = vld [vmem:[#allocation15 + $0x80] sm:$0xff] }
 0x3b9   :  { %6188 = vmatpush.bf16.msrb.mxu0 %v9651_v45 }
 0x3ba   :  { %v5434_v33 = vmax.f32 %v5306_v54, %v5426_v8  ;;  %v9499_v54 = vor.u32 %v10508_v53, %v9498_v41  ;;  %v5320_v8 = vadd.f32 %v5319_v0, %v3687_v40  ;;  %v5346_v37 = vadd.f32 %v5345_v21, %v5332_v51  ;;  %v9606_v21 = vld [vmem:[#allocation12 + $0x260] sm:$0xf]  ;;  %v10535_v40 = vld [vmem:[#allocation12 + $0x268] sm:$0xf0]  ;;  %v10532_v0 = vld [vmem:[#allocation12 + $0x250] sm:$0xf0] }
 0x3bb   :  { %v9607_v17 = vor.u32 %v10535_v40, %v9606_v21  ;;  %v10560_v41 = vld [vmem:[#allocation15 + $0x30] sm:$0xff]  ;;  %v10559_v53 = vld [vmem:[#allocation15 + $0x28] sm:$0xff]  ;;  %v10566_v51 = vld [vmem:[#allocation15 + $0x60] sm:$0xff] }
 0x3bc   :  { %v11471_v60 = vpack.c.bf16 %v5434_v33, %v5430_v4  ;;  %v5334_v38 = vadd.f32 %v5333_v56, %v5320_v8  ;;  %v5387_v33 = vpop.f32.mrf.mxu1  ;;  %v10568_v56 = vld [vmem:[#allocation15 + $0x70] sm:$0xff]  ;;  %v10554_v8 = vld [vmem:[#allocation15] sm:$0xff] }
 0x3bd   :  { %6189 = vmatpush.bf16.msrb.mxu0 %v9639_v63  ;;  %v9679_v63 = vor.u32 %v10553_v48, %v9678_v28  ;;  %6482 = vmatpush.bf16.msrb.mxu1 %v10568_v56  ;;  %v10572_v48 = vld [vmem:[#allocation15 + $0x90] sm:$0xff] }
 0x3be   :  { %6124 = vmatmul.bf16.vlgmr.msra.gmra.mxu2 %v11471_v60  ;;  %v5348_v42 = vadd.f32 %v5347_v29, %v5334_v38  ;;  %v10577_v38 = vld [vmem:[#allocation15 + $0xb8] sm:$0xff] }
 0x3bf   :  { %6228 = vmatpush.bf16.msra.mxu2 %v9583_v34 }
 0x3c1   :  { %6190 = vmatpush.bf16.msrb.mxu0 %v9627_v31 }
 0x3c3   :  { %6229 = vmatpush.bf16.msra.mxu2 %v9571_v57 }
 0x3c4   :  { %v5401_v15 = vpop.f32.mrf.mxu2  ;;  %v5389_v46 = vpop.f32.mrf.mxu1 }
 0x3c5   :  { %6191 = vmatpush.bf16.msrb.mxu0 %v9615_v7  ;;  %v9618_v7 = vld [vmem:[#allocation12 + $0x278] sm:$0xf] }
 0x3c6   :  { %v9619_v43 = vor.u32 %v10538_v36, %v9618_v7 }
 0x3c7   :  { %6230 = vmatpush.bf16.msra.mxu2 %v9559_v25 }
 0x3c9   :  { %6192 = vmatpush.bf16.msrb.mxu0 %v9603_v13  ;;  %v10561_v13 = vld [vmem:[#allocation15 + $0x38] sm:$0xff] }
 0x3ca   :  { %6467 = vmatpush.bf16.msrb.mxu3 %v10561_v13 }
 0x3cb   :  { %6231 = vmatpush.bf16.msra.mxu2 %v9547_v50 }
 0x3cc   :  { %v5403_v52 = vpop.f32.mrf.mxu2 }
 0x3cd   :  { %v5359_v58 = vpop.f32.mrf.mxu0  ;;  %6193 = vmatpush.bf16.msrb.mxu0 %v9591_v3  ;;  %v10567_v3 = vld [vmem:[#allocation15 + $0x68] sm:$0xff] }
 0x3ce   :  { %6180 = vmatmul.bf16.vlgmr.msrb.gmra.mxu2 %v11471_v60  ;;  %v5360_v4 = vadd.f32 %v5359_v58, %v5346_v37  ;;  %6468 = vmatpush.bf16.msrb.mxu3 %v10560_v41  ;;  %v10558_v58 = vld [vmem:[#allocation15 + $0x20] sm:$0xff]  ;;  %v10565_v37 = vld [vmem:[#allocation15 + $0x58] sm:$0xff] }
 0x3cf   :  { %6232 = vmatpush.bf16.msra.mxu2 %v9535_v32  ;;  %v10547_v32 = vld [vmem:[#allocation12 + $0x2c8] sm:$0xf0]  ;;  %6483 = vmatpush.bf16.msrb.mxu1 %v10567_v3 }
 0x3d0   :  { %v5374_v62 = vadd.f32 %v5373_v14, %v5360_v4  ;;  %v9655_v31 = vor.u32 %v10547_v32, %v9654_v1 }
 0x3d2   :  { %v5388_v61 = vadd.f32 %v5387_v33, %v5374_v62  ;;  %6469 = vmatpush.bf16.msrb.mxu3 %v10559_v53  ;;  %v10564_v33 = vld [vmem:[#allocation15 + $0x50] sm:$0xff] }
 0x3d3   :  { %6233 = vmatpush.bf16.msra.mxu2 %v9523_v39  ;;  %v9631_v39 = vor.u32 %v10541_v5, %v9630_v12  ;;  %6484 = vmatpush.bf16.msrb.mxu1 %v10566_v51 }
 0x3d4   :  { %v5402_v57 = vadd.f32 %v5401_v15, %v5388_v61  ;;  %v10575_v15 = vld [vmem:[#allocation15 + $0xa8] sm:$0xff] }
 0x3d5   :  { %v5361_v2 = vpop.f32.mrf.mxu0 }
 0x3d6   :  { %v5362_v34 = vadd.f32 %v5361_v2, %v5348_v42  ;;  %6470 = vmatpush.bf16.msrb.mxu3 %v10558_v58  ;;  %v10576_v2 = vld [vmem:[#allocation15 + $0xb0] sm:$0xff]  ;;  %v11477_v42 = vld [vmem:[#allocation14] sm:$0x7] }
 0x3d7   :  { %6234 = vmatpush.bf16.msra.mxu2 %v9511_v9  ;;  %v9595_v9 = vor.u32 %v10532_v0, %v9594_v16  ;;  %6485 = vmatpush.bf16.msrb.mxu1 %v10565_v37  ;;  %v5570_v61 = vperm.slane %v11477_v42, 0 }
 0x3d8   :  { %v5376_v35 = vadd.f32 %v5375_v59, %v5362_v34  ;;  %v10563_v34 = vld [vmem:[#allocation15 + $0x48] sm:$0xff] }
 0x3da   :  { %v5390_v6 = vadd.f32 %v5389_v46, %v5376_v35  ;;  %6471 = vmatpush.bf16.msrb.mxu3 %v10557_v30  ;;  %v10574_v46 = vld [vmem:[#allocation15 + $0xa0] sm:$0xff]  ;;  %v5572_v30 = vperm.slane %v11477_v42, 2 }
 0x3db   :  { %6235 = vmatpush.bf16.msra.mxu2 %v9499_v54  ;;  %v10555_v54 = vld [vmem:[#allocation15 + $0x8] sm:$0xff]  ;;  %6486 = vmatpush.bf16.msrb.mxu1 %v10564_v33 }
 0x3dc   :  { %v5404_v47 = vadd.f32 %v5403_v52, %v5390_v6  ;;  %v10573_v52 = vld [vmem:[#allocation15 + $0x98] sm:$0xff] }
 0x3de   :  { %6236 = vmatmul.bf16.vlgmr.msra.gmra.mxu2 %v11471_v60  ;;  %6472 = vmatpush.bf16.msrb.mxu3 %v10556_v49 }
 0x3df   :  { %6495 = vmatpush.bf16.msrb.mxu2 %v10577_v38  ;;  %6487 = vmatpush.bf16.msrb.mxu1 %v10563_v34 }
 0x3e2   :  { %6473 = vmatpush.bf16.msrb.mxu3 %v10555_v54 }
 0x3e3   :  { %6496 = vmatpush.bf16.msrb.mxu2 %v10576_v2 }
 0x3e4   :  { %v6097_v14 = vpop.f32.mrf.mxu3 }
 0x3e6   :  { %6474 = vmatpush.bf16.msrb.mxu3 %v10554_v8 }
 0x3e7   :  { %6497 = vmatpush.bf16.msrb.mxu2 %v10575_v15 }
 0x3eb   :  { %6498 = vmatpush.bf16.msrb.mxu2 %v10574_v46  ;;  %v10585_v46 = vld [vmem:[%s11518_s9 + $0x38] sm:$0xff] }
 0x3ec   :  { %v6099_v62 = vpop.f32.mrf.mxu3 }
 0x3ed   :  { %v5415_v19 = vpop.f32.mrf.mxu0 }
 0x3ee   :  { %v5416_v20 = vadd.f32 %v5415_v19, %v5402_v57  ;;  %v10562_v19 = vld [vmem:[#allocation15 + $0x40] sm:$0xff]  ;;  %v6098_v57 = vadd.f32 %v6097_v14, %v5570_v61 }
 0x3ef   :  { %6488 = vmatpush.bf16.msrb.mxu1 %v10562_v19  ;;  %6499 = vmatpush.bf16.msrb.mxu2 %v10573_v52  ;;  %v10581_v52 = vld [vmem:[%s11518_s9 + $0x18] sm:$0xff] }
 0x3f0   :  { %v5423_v25 = vmul.f32 0.2, %v5416_v20 }
 0x3f2   :  { %v5431_v23 = vmax.f32 %v5416_v20, %v5423_v25 }
 0x3f3   :  { %6500 = vmatpush.bf16.msrb.mxu2 %v10572_v48 }
 0x3f5   :  { %v5417_v45 = vpop.f32.mrf.mxu0 }
 0x3f6   :  { %v5418_v18 = vadd.f32 %v5417_v45, %v5404_v47  ;;  %v6153_v47 = vpop.f32.mrf.mxu3  ;;  %v6100_v45 = vadd.f32 %v6099_v62, %v5570_v61 }
 0x3f7   :  { %6501 = vmatpush.bf16.msrb.mxu2 %v10571_v44 }
 0x3f8   :  { %v5427_v60 = vmul.f32 0.2, %v5418_v18 }
 0x3f9   :  { %v6111_v29 = vpop.f32.mrf.mxu1 }
 0x3fa   :  { %v5435_v50 = vmax.f32 %v5418_v18, %v5427_v60  ;;  %v6112_v20 = vadd.f32 %v6111_v29, %v6098_v57  ;;  %v10584_v57 = vld [vmem:[%s11518_s9 + $0x30] sm:$0xff] }
 0x3fb   :  { %6502 = vmatpush.bf16.msrb.mxu2 %v10570_v11 }
 0x3fc   :  { %v5439_v10 = vpack.c.bf16 %v5435_v50, %v5431_v23 }
 0x3fe   :  { %6138 = vmatmul.bf16.vlgmr.msra.gmra.mxu0 %v5439_v10  ;;  %v6155_v32 = vpop.f32.mrf.mxu3 }
 0x3ff   :  { %6242 = vmatpush.bf16.msra.mxu0 %v9679_v63 }
 0x401   :  { %v6113_v59 = vpop.f32.mrf.mxu1 }
 0x402   :  { %v6114_v60 = vadd.f32 %v6113_v59, %v6100_v45  ;;  %v10579_v45 = vld [vmem:[%s11518_s9 + $0x8] sm:$0xff] }
 0x403   :  { %6243 = vmatpush.bf16.msra.mxu0 %v9667_v27  ;;  %v5571_v27 = vperm.slane %v11477_v42, 1 }
 0x405   :  { %v6154_v12 = vadd.f32 %v6153_v47, %v5571_v27  ;;  %v10580_v47 = vld [vmem:[%s11518_s9 + $0x10] sm:$0xff] }
 0x407   :  { %6244 = vmatpush.bf16.msra.mxu0 %v9655_v31 }
 0x40a   :  { %v6167_v18 = vpop.f32.mrf.mxu1 }
 0x40b   :  { %6245 = vmatpush.bf16.msra.mxu0 %v9643_v22  ;;  %v6168_v36 = vadd.f32 %v6167_v18, %v6154_v12 }
 0x40d   :  { %v6209_v16 = vpop.f32.mrf.mxu3 }
 0x40e   :  { %6194 = vmatmul.bf16.vlgmr.msrb.gmra.mxu0 %v5439_v10  ;;  %v6210_v54 = vadd.f32 %v6209_v16, %v5572_v30 }
 0x40f   :  { %6246 = vmatpush.bf16.msra.mxu0 %v9631_v39 }
 0x412   :  { %v6169_v22 = vpop.f32.mrf.mxu1 }
 0x413   :  { %6247 = vmatpush.bf16.msra.mxu0 %v9619_v43  ;;  %v6156_v43 = vadd.f32 %v6155_v32, %v5571_v27 }
 0x415   :  { %v6170_v40 = vadd.f32 %v6169_v22, %v6156_v43  ;;  %v6211_v8 = vpop.f32.mrf.mxu3 }
 0x416   :  { %v6212_v37 = vadd.f32 %v6211_v8, %v5572_v30 }
 0x417   :  { %6248 = vmatpush.bf16.msra.mxu0 %v9607_v17 }
 0x41b   :  { %6249 = vmatpush.bf16.msra.mxu0 %v9595_v9 }
 0x41c   :  { %v6223_v9 = vpop.f32.mrf.mxu1 }
 0x41d   :  { %v6224_v14 = vadd.f32 %v6223_v9, %v6210_v54 }
 0x41e   :  { %6250 = vmatmul.bf16.vlgmr.msra.gmra.mxu0 %v5439_v10 }
 0x41f   :  { %6582 = vmatpush.bf16.msrb.mxu0 %v10585_v46 }
 0x423   :  { %6583 = vmatpush.bf16.msrb.mxu0 %v10584_v57 }
 0x424   :  { %v6225_v29 = vpop.f32.mrf.mxu1 }
 0x425   :  { %v6226_v33 = vadd.f32 %v6225_v29, %v6212_v37 }
 0x441   :  { %v6125_v4 = vpop.f32.mrf.mxu2 }
 0x442   :  { %v6126_v25 = vadd.f32 %v6125_v4, %v6112_v20  ;;  %v10582_v20 = vld [vmem:[%s11518_s9 + $0x20] sm:$0xff] }
 0x449   :  { %v6127_v35 = vpop.f32.mrf.mxu2 }
 0x44a   :  { %v6128_v50 = vadd.f32 %v6127_v35, %v6114_v60 }
 0x451   :  { %v6181_v23 = vpop.f32.mrf.mxu2 }
 0x452   :  { %v6182_v21 = vadd.f32 %v6181_v23, %v6168_v36 }
 0x459   :  { %v6183_v39 = vpop.f32.mrf.mxu2 }
 0x45a   :  { %v6184_v0 = vadd.f32 %v6183_v39, %v6170_v40  ;;  %v10612_v39 = vld [vmem:[#allocation18] ss:$0 sm:$0xff] }
 0x461   :  { %v6237_v58 = vpop.f32.mrf.mxu2 }
 0x462   :  { %v6238_v38 = vadd.f32 %v6237_v58, %v6224_v14 }
 0x469   :  { %v6239_v4 = vpop.f32.mrf.mxu2 }
 0x46a   :  { %v6240_v62 = vadd.f32 %v6239_v4, %v6226_v33 }
 0x47b   :  { %v6139_v6 = vpop.f32.mrf.mxu0 }
 0x47c   :  { %v6140_v28 = vadd.f32 %v6139_v6, %v6126_v25  ;;  %v10583_v6 = vld [vmem:[%s11518_s9 + $0x28] sm:$0xff]  ;;  %v10578_v25 = vld [vmem:[%s11518_s9] sm:$0xff]  ;;  %s10948_s9 = smov [#allocation21]  }
 0x47d   :  { %6584 = vmatpush.bf16.msrb.mxu0 %v10583_v6  ;;  %s6679_s17 = sshll.u32 %s10948_s9, 4  ;;  %s6680_s17 = int_to_ptr.vmem [resolvable:$true] %s6679_s17 }
 0x47e   :  { %v6256_v10 = vmul.f32 0.2, %v6140_v28 }
 0x480   :  { %v6262_v31 = vmax.f32 %v6140_v28, %v6256_v10  ;;  %v10611_v28 = vld [vmem:[#allocation17] ss:$0 sm:$0xff] }
 0x481   :  { %6585 = vmatpush.bf16.msrb.mxu0 %v10582_v20 }
 0x483   :  { %v6141_v63 = vpop.f32.mrf.mxu0 }
 0x484   :  { %v6142_v55 = vadd.f32 %v6141_v63, %v6128_v50 }
 0x485   :  { %6586 = vmatpush.bf16.msrb.mxu0 %v10581_v52 }
 0x486   :  { %v6259_v1 = vmul.f32 0.2, %v6142_v55 }
 0x488   :  { %v6265_v26 = vmax.f32 %v6142_v55, %v6259_v1 }
 0x489   :  { %6587 = vmatpush.bf16.msrb.mxu0 %v10580_v47 }
 0x48a   :  { %v6268_v5 = vpack.c.bf16 %v6265_v26, %v6262_v31 }
 0x48b   :  { %v6195_v7 = vpop.f32.mrf.mxu0 }
 0x48c   :  { %6475 = vmatmul.bf16.vlgmr.msrb.gmra.mxu3 %v6268_v5  ;;  %v6196_v17 = vadd.f32 %v6195_v7, %v6182_v21  ;;  %v6600_v5 = vld [vmem:[#allocation20] sm:$0x1] }
 0x48d   :  { %6588 = vmatpush.bf16.msrb.mxu0 %v10579_v45  ;;  %v6601_v7 = vunpack.c.l.bf16 %v6600_v5 }
 0x48e   :  { %v6257_v41 = vmul.f32 0.2, %v6196_v17 }
 0x48f   :  { %v6602_v40 = vperm.slane %v6601_v7, 0 }
 0x490   :  { %v6263_v49 = vmax.f32 %v6196_v17, %v6257_v41 }
 0x491   :  { %6589 = vmatpush.bf16.msrb.mxu0 %v10578_v25 }
 0x493   :  { %v6197_v13 = vpop.f32.mrf.mxu0 }
 0x494   :  { %v6198_v53 = vadd.f32 %v6197_v13, %v6184_v0 }
 0x496   :  { %v6260_v24 = vmul.f32 0.2, %v6198_v53 }
 0x498   :  { %v6266_v56 = vmax.f32 %v6198_v53, %v6260_v24  ;;  %v10947_v24 = vmov 0  }
 0x499   :  { %10609 = vset.pattern.permute.xlu1 %v10947_v24  ;;  %10610 = vset.pattern.permute.xlu0 %v10947_v24 }
 0x49a   :  { %v6269_v3 = vpack.c.bf16 %v6266_v56, %v6263_v49  ;;  %v10613_v49 = vld [vmem:[#allocation2] ss:$0 sm:$0xff] }
 0x49b   :  { %v6251_v51 = vpop.f32.mrf.mxu0 }
 0x49c   :  { %6489 = vmatmul.bf16.vlgmr.msrb.gmra.mxu1 %v6269_v3  ;;  %v6252_v2 = vadd.f32 %v6251_v51, %v6238_v38 }
 0x49e   :  { %v6258_v15 = vmul.f32 0.2, %v6252_v2 }
 0x4a0   :  { %v6264_v61 = vmax.f32 %v6252_v2, %v6258_v15 }
 0x4a3   :  { %v6253_v34 = vpop.f32.mrf.mxu0 }
 0x4a4   :  { %v6254_v59 = vadd.f32 %v6253_v34, %v6240_v62 }
 0x4a6   :  { %v6261_v42 = vmul.f32 0.2, %v6254_v59 }
 0x4a8   :  { %v6267_v35 = vmax.f32 %v6254_v59, %v6261_v42 }
 0x4aa   :  { %v6270_v19 = vpack.c.bf16 %v6267_v35, %v6264_v61 }
 0x4ac   :  { %6503 = vmatmul.bf16.vlgmr.msrb.gmra.mxu2 %v6270_v19 }
 0x50f   :  { %v6476_v18 = vpop.f32.mrf.mxu3 }
 0x510   :  { %v6477_v23 = vadd.f32 %v10611_v28, %v6476_v18 }
 0x517   :  { %v6478_v50 = vpop.f32.mrf.mxu3 }
 0x518   :  { %v6479_v55 = vadd.f32 %v10611_v28, %v6478_v50  ;;  %v6664_v28 = vlaneseq }
 0x519   :  { %v6490_v60 = vpop.f32.mrf.mxu1 }
 0x51a   :  { %v6491_v63 = vadd.f32 %v6490_v60, %v6477_v23  ;;  %v6665_v23 = vand.u32 127, %v6664_v28 }
 0x51c   :  { %v6667_v50 = vadd.s32 4294967288, %v6665_v23 }
 0x521   :  { %v6492_v10 = vpop.f32.mrf.mxu1 }
 0x522   :  { %v6493_v27 = vadd.f32 %v6492_v10, %v6479_v55 }
 0x52f   :  { %v6504_v48 = vpop.f32.mrf.mxu2 }
 0x530   :  { %v6505_v44 = vadd.f32 %v6504_v48, %v6491_v63 }
 0x532   :  { %v6509_v32 = vmul.f32 0.2, %v6505_v44 }
 0x534   :  { %v6511_v11 = vmax.f32 %v6505_v44, %v6509_v32 }
 0x537   :  { %v6506_v1 = vpop.f32.mrf.mxu2 }
 0x538   :  { %v6507_v31 = vadd.f32 %v6506_v1, %v6493_v27 }
 0x53a   :  { %v6510_v26 = vmul.f32 0.2, %v6507_v31 }
 0x53c   :  { %v6512_v22 = vmax.f32 %v6507_v31, %v6510_v26 }
 0x53e   :  { %v6513_v12 = vpack.c.bf16 %v6512_v22, %v6511_v11 }
 0x540   :  { %6590 = vmatmul.bf16.vlgmr.msrb.gmra.mxu0 %v6513_v12 }
 0x5bd   :  { %v6591_v36 = vpop.f32.mrf.mxu0 }
 0x5be   :  { %v6592_v43 = vadd.f32 %v10612_v39, %v6591_v36 }
 0x5c0   :  { %v6596_v21 = vmul.f32 0.2, %v6592_v43 }
 0x5c2   :  { %v6598_v17 = vmax.f32 %v6592_v43, %v6596_v21 }
 0x5c4   :  { %v6603_v16 = vmul.f32 %v6602_v40, %v6598_v17 }
 0x5c5   :  { %v6593_v0 = vpop.f32.mrf.mxu0 }
 0x5c6   :  { %v6594_v9 = vadd.f32 %v10612_v39, %v6593_v0  ;;  %v6606_v13 = vsel %vm6605_vm1, %v6603_v16, 0.0 }
 0x5c7   :  { %6607 = vadd.xlane.f32.xlu0 %v6606_v13 }
 0x5c8   :  { %v6597_v41 = vmul.f32 0.2, %v6594_v9 }
 0x5ca   :  { %v6599_v53 = vmax.f32 %v6594_v9, %v6597_v41 }
 0x5cc   :  { %v6604_v58 = vmul.f32 %v6602_v40, %v6599_v53 }
 0x5ce   :  { %v6609_v30 = vsel %vm6605_vm1, %v6604_v58, 0.0 }
 0x5cf   :  { %6610 = vadd.xlane.f32.xlu0 %v6609_v30 }
 0x63a   :  { %v6608_v56 = vpop.xlane.xlu0 %6607 }
 0x63b   :  { %v6616_v54 = vadd.f32 %v10613_v49, %v6608_v56 }
 0x63d   :  { %v9808_v3 = vmul.f32 -1.442695, %v6616_v54 }
 0x63f   :  { %10614 = vpow2.f32 %v9808_v3 }
 0x642   :  { %v6611_v8 = vpop.xlane.xlu0 %6610 }
 0x643   :  { %v6617_v51 = vadd.f32 %v10613_v49, %v6611_v8 }
 0x645   :  { %v10615_v14 = vpop.eup %10614  ;;  %v9809_v29 = vmul.f32 -1.442695, %v6617_v51 }
 0x646   :  { %v6624_v37 = vadd.f32 1.0, %v10615_v14 }
 0x647   :  { %10616 = vpow2.f32 %v9809_v29 }
 0x648   :  { %10618 = vrcp.f32 %v6624_v37  ;;  %v6637_v34 = vand.u32 2147483648, %v6624_v37  ;;  %v6635_v59 = vand.u32 2147483647, %v6624_v37  ;;  %vm6631_vm3 = vweird.f32 %v6624_v37 }
 0x64a   :  { %v6638_v35 = vor.u32 1.1754944e-38, %v6637_v34  ;;  %vm6636_vm5 = vcmp.eq.f32.partialorder %v6635_v59, 8.507059e+37 }
 0x64d   :  { %v10617_v38 = vpop.eup %10616 }
 0x64e   :  { %v10619_v4 = vpop.eup %10618  ;;  %v6625_v33 = vadd.f32 1.0, %v10617_v38 }
 0x64f   :  { %v6627_v2 = vmul.f32 %v10619_v4, %v6624_v37  ;;  %vm6632_vm2 = vweird.f32 %v10619_v4 }
 0x650   :  { %10620 = vrcp.f32 %v6625_v33  ;;  %vm6633_vm4 = vmor %vm6631_vm3, %vm6632_vm2  ;;  %v6652_v20 = vand.u32 2147483648, %v6625_v33  ;;  %v6650_v47 = vand.u32 2147483647, %v6625_v33  ;;  %vm6646_vm7 = vweird.f32 %v6625_v33 }
 0x651   :  { %v6628_v62 = vsub.f32 1.0, %v6627_v2 }
 0x652   :  { %v6653_v25 = vor.u32 1.1754944e-38, %v6652_v20  ;;  %vm6651_vm9 = vcmp.eq.f32.partialorder %v6650_v47, 8.507059e+37 }
 0x653   :  { %v6629_v15 = vmul.f32 %v10619_v4, %v6628_v62 }
 0x655   :  { %v6630_v42 = vadd.f32 %v10619_v4, %v6629_v15 }
 0x656   :  { %v10621_v61 = vpop.eup %10620 }
 0x657   :  { %v6634_v19 = vsel %vm6633_vm4, %v10619_v4, %v6630_v42  ;;  %v6642_v46 = vmul.f32 %v10621_v61, %v6625_v33  ;;  %vm6647_vm6 = vweird.f32 %v10621_v61 }
 0x658   :  { %v6639_v57 = vsel %vm6636_vm5, %v6638_v35, %v6634_v19  ;;  %vm6648_vm8 = vmor %vm6646_vm7, %vm6647_vm6 }
 0x659   :  { %6659 = vperm.xlu1 %10609, %v6639_v57   ;;  %v6643_v6 = vsub.f32 1.0, %v6642_v46 }
 0x65b   :  { %v6644_v52 = vmul.f32 %v10621_v61, %v6643_v6 }
 0x65d   :  { %v6645_v45 = vadd.f32 %v10621_v61, %v6644_v52 }
 0x65f   :  { %v6649_v18 = vsel %vm6648_vm8, %v10621_v61, %v6645_v45 }
 0x660   :  { %v6654_v60 = vsel %vm6651_vm9, %v6653_v25, %v6649_v18 }
 0x661   :  { %6662 = vperm.xlu1 %10609, %v6654_v60  }
 0x6cb   :  { %v6660_v48 = vpop.permute.xlu1 %6659 }
 0x6cc   :  { %v6666_v10 = vperm.slane %v6660_v48, %v6665_v23 }
 0x6d3   :  { %v6663_v63 = vpop.permute.xlu1 %6662 }
 0x6d4   :  { %v6668_v55 = vperm.slane %v6663_v63, %v6667_v50 }
 0x6d6   :  { %v6670_v44 = vsel %vm6669_vm10, %v6668_v55, %v6666_v10 }
 0x6d7   :  { %6673 = vst.msk [vmem:[#allocation21] sm:$0x1] %vm6672_vm11, %v6670_v44 }
 0x6d8   :  { %6684 = dma.vmem_to_hbm [thread:$0]  %s6680_s17, 16, %s6682_s18, [#allocation5]  }
 0x6d9   :  { %10924 = dma.done.wait [#allocation5], 16  }
 0x6da   :  { %10925 = vsyncadd [#allocation5], 4294967280 }
 0x6db   :  { %6689 = vsyncpa [#allocation4], 1 }
 0x6dc   :  { %6690 = vsyncpa [#allocation7], 1 }
 0x6dd   :  { %6691 = vsyncpa [#allocation10], 1 }
 0x6de   :  { %6692 = vsyncpa [#allocation13], 1 }
 0x6df   :  { %6693 = vsyncpa [#allocation16], 1 }
 0x6e0   :  { %6694 = vsyncpa [#allocation19], 1 }
 0x6e1   :  { %6695 = vsyncpa [#allocation5], 1 }

</bundles_post_ra>
